<compile_context>
chip_gen: v5e
topology: v5e:2x2
jax: 0.10.0
libtpu: 0.0.40
codegen_flags: <defaults>
</compile_context>

<pallas_src>
import jax
import jax.numpy as jnp
import numpy as np
from jax.experimental import pallas as pl
from jax.experimental.pallas import tpu as pltpu

EMBED_DIM = 32
VOCAB = 97
BN_EPS = 1e-5
COS_EPS = 1e-8
SEG_OUT = 128          # per-batch lane padding of the pooled (layer-2 input) slab


# ------------------------------ kernel body ---------------------------------
def _make_kernel(batch, cfg_e, cfg_j):
    """Build the single-step kernel (both towers traced back-to-back)."""

    def tower(slab1, w1, p1, sel, w2, p2, mask2, cfg):
        pool_k, k2 = cfg["pool_k"], cfg["k2"]
        n_valid1, n_pad1 = float(cfg["n_valid1"]), float(cfg["n_pad1"])
        l2, seg_out = cfg["l2"], cfg["seg_out"]

        # --- Conv1: single bf16 im2col matmul (slab built in the wrapper) ---
        bias, gamma, beta = p1[0], p1[1], p1[2]                    # (E, 1)
        y = jnp.dot(w1, slab1, preferred_element_type=jnp.float32) + bias
        # Zero-padded slab columns give y == bias exactly; correct them out of
        # the training-mode (biased) BatchNorm statistics analytically.
        mean = (jnp.sum(y, axis=-1, keepdims=True) - n_pad1 * bias) / n_valid1
        d = y - mean
        var = (jnp.sum(d * d, axis=-1, keepdims=True)
               - n_pad1 * (bias - mean) ** 2) / n_valid1
        z = jnp.maximum(d * (jax.lax.rsqrt(var + BN_EPS) * gamma) + beta, 0.0)

        # --- MaxPool1d(pool_k): windowed max + precomputed one-hot selection
        #     matmul (bf16, MXU).  The selection also re-pads each batch
        #     segment of the pooled output to `seg_out` lanes + guard block.
        zb = z.astype(jnp.bfloat16)
        lw = zb.shape[-1] - pool_k + 1
        m = zb[:, :lw]
        for j in range(1, pool_k):
            m = jnp.maximum(m, zb[:, j:j + lw])
        assert m.shape[-1] == sel.shape[0]
        pooled = jnp.dot(m, sel, preferred_element_type=jnp.float32
                         ).astype(jnp.bfloat16)            # (E, B*128 + 128)

        # --- Conv2: im2col via k2 aligned-width shifted slices --------------
        n2 = batch * seg_out
        slab2 = jnp.concatenate(
            [pooled[:, dk:dk + n2] for dk in range(k2)], axis=0)  # (k2*E, n2)
        bias2, gamma2, beta2 = p2[0], p2[1], p2[2]
        y2 = jnp.dot(w2, slab2, preferred_element_type=jnp.float32) + bias2
        n_valid2 = float(batch * l2)
        mean2 = jnp.sum(y2 * mask2, axis=-1, keepdims=True) / n_valid2
        d2 = y2 - mean2
        var2 = jnp.sum(d2 * d2 * mask2, axis=-1, keepdims=True) / n_valid2
        z2 = jnp.maximum(d2 * (jax.lax.rsqrt(var2 + BN_EPS) * gamma2) + beta2,
                         0.0)

        # --- MaxPool1d(l2) then length-1 Avg/Max pool == per-batch lane max.
        cols = [jnp.max(z2[:, b * seg_out:b * seg_out + l2],
                        axis=-1, keepdims=True) for b in range(batch)]
        return jnp.concatenate(cols, axis=-1)               # (E, batch) f32

    def kernel(slab_e_ref, slab_j_ref, mask2_ref,
               we1_ref, pe1_ref, sele_ref, we2_ref, pe2_ref,
               wj1_ref, pj1_ref, selj_ref, wj2_ref, pj2_ref,
               ef_ref, jf_ref):
        mask2 = mask2_ref[...]
        ef_ref[...] = tower(slab_e_ref[...], we1_ref[...], pe1_ref[...],
                            sele_ref[...], we2_ref[...], pe2_ref[...],
                            mask2, cfg_e)
        jf_ref[...] = tower(slab_j_ref[...], wj1_ref[...], pj1_ref[...],
                            selj_ref[...], wj2_ref[...], pj2_ref[...],
                            mask2, cfg_j)

    return kernel


# ------------------------- wrapper-side precompute ---------------------------
def _round_up(x, m):
    return ((x + m - 1) // m) * m


def _prep_conv(w, b, g, t):
    """(k, O, I) conv weight -> (O, k*I) bf16 im2col weight; pack BN params."""
    k, o, i = w.shape
    w2d = jnp.transpose(w, (1, 0, 2)).reshape(o, k * i).astype(jnp.bfloat16)
    p = jnp.stack([b, g, t], axis=0)[..., None].astype(jnp.float32)   # (3,E,1)
    return w2d, p


def _im2col_slab(x, k, l_out, seg_pad):
    """Layer-1 im2col hoisted to the wrapper.

    x: (B, E, L) bf16 -> (k*E, B*seg_pad) bf16, each batch segment zero-padded
    from l_out to seg_pad lanes (rows are dk-major: dk*E + channel)."""
    B = x.shape[0]
    cols = []
    for b in range(B):
        blk = jnp.concatenate([x[b, :, dk:dk + l_out] for dk in range(k)],
                              axis=0)                          # (k*E, l_out)
        if seg_pad > l_out:
            blk = jnp.pad(blk, ((0, 0), (0, seg_pad - l_out)))
        cols.append(blk)
    return jnp.concatenate(cols, axis=-1)


def _pool_selection(batch, seg_in, pool_k, p, seg_out, out_width):
    """One-hot matrix mapping windowed-max columns (fused, seg_in per batch)
    to stride-pool_k selections, re-padded to seg_out lanes per batch (extra
    columns beyond batch*seg_out are a zero guard block)."""
    n_win = batch * seg_in - pool_k + 1
    sel = np.zeros((n_win, out_width), np.float32)
    for b in range(batch):
        for w in range(p):
            sel[b * seg_in + pool_k * w, b * seg_out + w] = 1.0
    return jnp.asarray(sel, dtype=jnp.bfloat16)


def _valid_mask(batch, seg_out, l_valid):
    m = np.zeros((1, batch * seg_out), np.float32)
    for b in range(batch):
        m[0, b * seg_out:b * seg_out + l_valid] = 1.0
    return jnp.asarray(m)


def pjfnn_forward(expects, jobs, params):
    B = expects.shape[0]
    E = EMBED_DIM
    emb = params["word_emb"]
    # Embedding lookup + permute(0,2,1) (NLC -> NCL) in plain-JAX glue; bf16
    # because the conv inputs feed bf16 MXU matmuls (f32 accumulation).
    ee = jnp.take(emb, expects.reshape(B, -1), axis=0
                  ).transpose(0, 2, 1).astype(jnp.bfloat16)
    je = jnp.take(emb, jobs.reshape(B, -1), axis=0
                  ).transpose(0, 2, 1).astype(jnp.bfloat16)

    we1, pe1 = _prep_conv(*params["e1"])
    we2, pe2 = _prep_conv(*params["e2"])
    wj1, pj1 = _prep_conv(*params["j1"])
    wj2, pj2 = _prep_conv(*params["j2"])

    k1e, k2e = params["e1"][0].shape[0], params["e2"][0].shape[0]
    k1j, k2j = params["j1"][0].shape[0], params["j2"][0].shape[0]
    pool_e, pool_j = 3, 2

    def tower_cfg(L, k1, pool_k, k2):
        l1 = L - k1 + 1                       # conv-1 output length
        seg = _round_up(l1, 128)              # 128-padded per-batch lane segment
        p = l1 // pool_k                      # pool-1 output length
        l2 = p - k2 + 1                       # conv-2 output length
        assert p <= SEG_OUT and (k2 - 1) <= SEG_OUT
        cfg = dict(pool_k=pool_k, k2=k2, n_valid1=B * l1,
                   n_pad1=B * (seg - l1), l2=l2, seg_out=SEG_OUT)
        return l1, seg, p, l2, cfg

    l1e, seg_e, p_e, l2e, cfg_e = tower_cfg(ee.shape[-1], k1e, pool_e, k2e)
    l1j, seg_j, p_j, l2j, cfg_j = tower_cfg(je.shape[-1], k1j, pool_j, k2j)
    assert l2e == l2j            # both towers end with the same valid width

    slab_e = _im2col_slab(ee, k1e, l1e, seg_e)         # (k1e*E, B*seg_e) bf16
    slab_j = _im2col_slab(je, k1j, l1j, seg_j)         # (k1j*E, B*seg_j) bf16
    out_w = B * SEG_OUT + SEG_OUT                      # + guard block for im2col
    sel_e = _pool_selection(B, seg_e, pool_e, p_e, SEG_OUT, out_w)
    sel_j = _pool_selection(B, seg_j, pool_j, p_j, SEG_OUT, out_w)
    mask2 = _valid_mask(B, SEG_OUT, l2e)

    vmem = pl.BlockSpec(memory_space=pltpu.MemorySpace.VMEM)
    kernel = _make_kernel(B, cfg_e, cfg_j)
    e_feat, j_feat = pl.pallas_call(
        kernel,
        out_shape=(jax.ShapeDtypeStruct((E, B), jnp.float32),
                   jax.ShapeDtypeStruct((E, B), jnp.float32)),
        in_specs=[vmem] * 13,
        out_specs=(vmem, vmem),
    )(slab_e, slab_j, mask2, we1, pe1, sel_e, we2, pe2,
      wj1, pj1, sel_j, wj2, pj2)

    # Tiny 2-element cosine similarity in the wrapper.
    dot = jnp.sum(e_feat * j_feat, axis=0)
    na = jnp.sqrt(jnp.sum(e_feat * e_feat, axis=0))
    nb = jnp.sqrt(jnp.sum(j_feat * j_feat, axis=0))
    return dot / jnp.maximum(na * nb, COS_EPS)


# --------------------------- parameter init ----------------------------------
def init_params(key):
    E = EMBED_DIM
    ks = jax.random.split(key, 17)
    emb = 0.5 * jax.random.normal(ks[0], (VOCAB, E), jnp.float32)
    emb = emb.at[0].set(0.0)  # padding_idx=0

    def conv(kw, kb, ksz):
        w = jax.random.normal(kw, (ksz, E, E), jnp.float32) / np.sqrt(E * ksz)
        b = 0.1 * jax.random.normal(kb, (E,), jnp.float32)
        return w, b

    def bn(kg, kb):
        g = 1.0 + 0.1 * jax.random.normal(kg, (E,), jnp.float32)
        bt = 0.1 * jax.random.normal(kb, (E,), jnp.float32)
        return g, bt

    we1, be1 = conv(ks[1], ks[2], 5); ge1, te1 = bn(ks[3], ks[4])
    we2, be2 = conv(ks[5], ks[6], 5); ge2, te2 = bn(ks[7], ks[8])
    wj1, bj1 = conv(ks[9], ks[10], 5); gj1, tj1 = bn(ks[11], ks[12])
    wj2, bj2 = conv(ks[13], ks[14], 3); gj2, tj2 = bn(ks[15], ks[16])

    return {"word_emb": emb,
            "e1": (we1, be1, ge1, te1), "e2": (we2, be2, ge2, te2),
            "j1": (wj1, bj1, gj1, tj1), "j2": (wj2, bj2, gj2, tj2)}


# --------------------------- pure-JAX reference -------------------------------
def ref_forward(expects, jobs, params):
    B = expects.shape[0]
    emb = params["word_emb"]
    ee = jnp.take(emb, expects.reshape(B, -1), axis=0).astype(jnp.float32).transpose(0, 2, 1)
    je = jnp.take(emb, jobs.reshape(B, -1), axis=0).astype(jnp.float32).transpose(0, 2, 1)

    def conv_bn_relu(x, w, b, g, bt):
        wc = jnp.transpose(w, (1, 2, 0))                     # (O, I, k)
        y = jax.lax.conv_general_dilated(
            x, wc, window_strides=(1,), padding="VALID",
            dimension_numbers=("NCH", "OIH", "NCH")) + b[None, :, None]
        mean = jnp.mean(y, axis=(0, 2), keepdims=True)
        var = jnp.mean((y - mean) ** 2, axis=(0, 2), keepdims=True)
        z = (y - mean) / jnp.sqrt(var + BN_EPS) * g[None, :, None] + bt[None, :, None]
        return jnp.maximum(z, 0.0)

    def maxpool(x, K):
        return jax.lax.reduce_window(x, -jnp.inf, jax.lax.max,
                                     (1, 1, K), (1, 1, K), "VALID")

    xe = conv_bn_relu(ee, *params["e1"]); xe = maxpool(xe, 3)
    xe = conv_bn_relu(xe, *params["e2"]); xe = maxpool(xe, 50)
    e_feat = jnp.mean(xe, axis=-1)          # AvgPool1d(expect_len) + squeeze

    xj = conv_bn_relu(je, *params["j1"]); xj = maxpool(xj, 2)
    xj = conv_bn_relu(xj, *params["j2"]); xj = maxpool(xj, 50)
    j_feat = jnp.max(xj, axis=-1)           # MaxPool1d(job_len) + squeeze

    dot = jnp.sum(e_feat * j_feat, axis=-1)
    na = jnp.sqrt(jnp.sum(e_feat * e_feat, axis=-1))
    nb = jnp.sqrt(jnp.sum(j_feat * j_feat, axis=-1))
    return dot / jnp.maximum(na * nb, COS_EPS)


if __name__ == "__main__":
    key = jax.random.PRNGKey(0)
    kp, ke, kj = jax.random.split(key, 3)
    params = init_params(kp)

    # expects flattens to length 166 -> 162 -> 54 -> 50 -> 1
    # jobs    flattens to length 108 -> 104 -> 52 -> 50 -> 1
    expects = jax.random.randint(ke, (2, 2, 83), 0, VOCAB, dtype=jnp.int32)
    jobs = jax.random.randint(kj, (2, 4, 27), 0, VOCAB, dtype=jnp.int32)

    out = jax.block_until_ready(pjfnn_forward(expects, jobs, params))
    ref = jax.block_until_ready(ref_forward(expects, jobs, params))

    assert out.shape == (2,)
    # Tolerance accounts for bf16 MXU matmuls (f32 accumulation); pooling/BN
    # statistics and the cosine remain f32.
    np.testing.assert_allclose(np.asarray(out), np.asarray(ref),
                               rtol=2e-2, atol=2e-2)
    print("KERNEL_OK")
</pallas_src>

<mosaic_0001>
module attributes {stable_mosaic.version = 11 : i64} {
  func.func @kernel(%arg0: memref<160x512xbf16, #tpu.memory_space<vmem>>, %arg1: memref<160x256xbf16, #tpu.memory_space<vmem>>, %arg2: memref<1x256xf32, #tpu.memory_space<vmem>>, %arg3: memref<32x160xbf16, #tpu.memory_space<vmem>>, %arg4: memref<3x32x1xf32, #tpu.memory_space<vmem>>, %arg5: memref<510x384xbf16, #tpu.memory_space<vmem>>, %arg6: memref<32x160xbf16, #tpu.memory_space<vmem>>, %arg7: memref<3x32x1xf32, #tpu.memory_space<vmem>>, %arg8: memref<32x160xbf16, #tpu.memory_space<vmem>>, %arg9: memref<3x32x1xf32, #tpu.memory_space<vmem>>, %arg10: memref<255x384xbf16, #tpu.memory_space<vmem>>, %arg11: memref<32x96xbf16, #tpu.memory_space<vmem>>, %arg12: memref<3x32x1xf32, #tpu.memory_space<vmem>>, %arg13: memref<32x2xf32, #tpu.memory_space<vmem>>, %arg14: memref<32x2xf32, #tpu.memory_space<vmem>>) attributes {dimension_semantics = [], scalar_prefetch = 0 : i64, scratch_operands = 0 : i64, tpu.core_type = #tpu.core_type<tc>} {
    %c0 = arith.constant 0 : index
    %c0_0 = arith.constant 0 : index
    %0 = vector.load %arg2[%c0, %c0_0] : memref<1x256xf32, #tpu.memory_space<vmem>>, vector<1x256xf32>
    %c0_1 = arith.constant 0 : index
    %c0_2 = arith.constant 0 : index
    %1 = vector.load %arg0[%c0_1, %c0_2] : memref<160x512xbf16, #tpu.memory_space<vmem>>, vector<160x512xbf16>
    %c0_3 = arith.constant 0 : index
    %c0_4 = arith.constant 0 : index
    %2 = vector.load %arg3[%c0_3, %c0_4] : memref<32x160xbf16, #tpu.memory_space<vmem>>, vector<32x160xbf16>
    %c0_5 = arith.constant 0 : index
    %c0_6 = arith.constant 0 : index
    %c0_7 = arith.constant 0 : index
    %3 = vector.load %arg4[%c0_5, %c0_6, %c0_7] : memref<3x32x1xf32, #tpu.memory_space<vmem>>, vector<3x32x1xf32>
    %c0_8 = arith.constant 0 : index
    %c0_9 = arith.constant 0 : index
    %4 = vector.load %arg5[%c0_8, %c0_9] : memref<510x384xbf16, #tpu.memory_space<vmem>>, vector<510x384xbf16>
    %c0_10 = arith.constant 0 : index
    %c0_11 = arith.constant 0 : index
    %5 = vector.load %arg6[%c0_10, %c0_11] : memref<32x160xbf16, #tpu.memory_space<vmem>>, vector<32x160xbf16>
    %c0_12 = arith.constant 0 : index
    %c0_13 = arith.constant 0 : index
    %c0_14 = arith.constant 0 : index
    %6 = vector.load %arg7[%c0_12, %c0_13, %c0_14] : memref<3x32x1xf32, #tpu.memory_space<vmem>>, vector<3x32x1xf32>
    %7 = vector.extract_strided_slice %3 {offsets = [0, 0, 0], sizes = [1, 32, 1], strides = [1, 1, 1]} : vector<3x32x1xf32> to vector<1x32x1xf32>
    %8 = vector.shape_cast %7 : vector<1x32x1xf32> to vector<32x1xf32>
    %9 = vector.extract_strided_slice %3 {offsets = [1, 0, 0], sizes = [1, 32, 1], strides = [1, 1, 1]} : vector<3x32x1xf32> to vector<1x32x1xf32>
    %10 = vector.shape_cast %9 : vector<1x32x1xf32> to vector<32x1xf32>
    %11 = vector.extract_strided_slice %3 {offsets = [2, 0, 0], sizes = [1, 32, 1], strides = [1, 1, 1]} : vector<3x32x1xf32> to vector<1x32x1xf32>
    %12 = vector.shape_cast %11 : vector<1x32x1xf32> to vector<32x1xf32>
    %cst = arith.constant dense<0.000000e+00> : vector<32x512xf32>
    %13 = tpu.matmul %2, %1, %cst {dimension_numbers = #tpu.dot_dimension_numbers<[1], [0], [0], [1], [0, 0, 1, 1], [], []>} : vector<32x160xbf16>, vector<160x512xbf16>, vector<32x512xf32> -> vector<32x512xf32>
    %14 = vector.broadcast %8 : vector<32x1xf32> to vector<32x512xf32>
    %15 = arith.addf %13, %14 : vector<32x512xf32>
    %cst_15 = arith.constant dense<0.000000e+00> : vector<32xf32>
    %16 = vector.multi_reduction <add>, %15, %cst_15 [1] : vector<32x512xf32> to vector<32xf32>
    %17 = vector.shape_cast %16 : vector<32xf32> to vector<32x1xf32>
    %cst_16 = arith.constant 1.880000e+02 : f32
    %18 = vector.broadcast %cst_16 : f32 to vector<32x1xf32>
    %19 = arith.mulf %18, %8 : vector<32x1xf32>
    %20 = arith.subf %17, %19 : vector<32x1xf32>
    %cst_17 = arith.constant 3.240000e+02 : f32
    %21 = vector.broadcast %cst_17 : f32 to vector<32x1xf32>
    %22 = arith.divf %20, %21 : vector<32x1xf32>
    %23 = vector.broadcast %22 : vector<32x1xf32> to vector<32x512xf32>
    %24 = arith.subf %15, %23 : vector<32x512xf32>
    %25 = arith.mulf %24, %24 : vector<32x512xf32>
    %cst_18 = arith.constant dense<0.000000e+00> : vector<32xf32>
    %26 = vector.multi_reduction <add>, %25, %cst_18 [1] : vector<32x512xf32> to vector<32xf32>
    %27 = vector.shape_cast %26 : vector<32xf32> to vector<32x1xf32>
    %28 = arith.subf %8, %22 : vector<32x1xf32>
    %29 = arith.mulf %28, %28 : vector<32x1xf32>
    %cst_19 = arith.constant 1.880000e+02 : f32
    %30 = vector.broadcast %cst_19 : f32 to vector<32x1xf32>
    %31 = arith.mulf %30, %29 : vector<32x1xf32>
    %32 = arith.subf %27, %31 : vector<32x1xf32>
    %cst_20 = arith.constant 3.240000e+02 : f32
    %33 = vector.broadcast %cst_20 : f32 to vector<32x1xf32>
    %34 = arith.divf %32, %33 : vector<32x1xf32>
    %cst_21 = arith.constant 9.99999974E-6 : f32
    %35 = vector.broadcast %cst_21 : f32 to vector<32x1xf32>
    %36 = arith.addf %34, %35 : vector<32x1xf32>
    %37 = math.rsqrt %36 : vector<32x1xf32>
    %38 = arith.mulf %37, %10 : vector<32x1xf32>
    %39 = vector.broadcast %38 : vector<32x1xf32> to vector<32x512xf32>
    %40 = arith.mulf %24, %39 : vector<32x512xf32>
    %41 = vector.broadcast %12 : vector<32x1xf32> to vector<32x512xf32>
    %42 = arith.addf %40, %41 : vector<32x512xf32>
    %cst_22 = arith.constant 0.000000e+00 : f32
    %43 = vector.broadcast %cst_22 : f32 to vector<32x512xf32>
    %44 = arith.maximumf %42, %43 : vector<32x512xf32>
    %45 = arith.truncf %44 : vector<32x512xf32> to vector<32x512xbf16>
    %46 = vector.extract_strided_slice %45 {offsets = [0, 0], sizes = [32, 510], strides = [1, 1]} : vector<32x512xbf16> to vector<32x510xbf16>
    %47 = vector.extract_strided_slice %45 {offsets = [0, 1], sizes = [32, 510], strides = [1, 1]} : vector<32x512xbf16> to vector<32x510xbf16>
    %48 = arith.maximumf %46, %47 : vector<32x510xbf16>
    %49 = vector.extract_strided_slice %45 {offsets = [0, 2], sizes = [32, 510], strides = [1, 1]} : vector<32x512xbf16> to vector<32x510xbf16>
    %50 = arith.maximumf %48, %49 : vector<32x510xbf16>
    %cst_23 = arith.constant dense<0.000000e+00> : vector<32x384xf32>
    %51 = tpu.matmul %50, %4, %cst_23 {dimension_numbers = #tpu.dot_dimension_numbers<[1], [0], [0], [1], [0, 0, 1, 1], [], []>} : vector<32x510xbf16>, vector<510x384xbf16>, vector<32x384xf32> -> vector<32x384xf32>
    %52 = arith.truncf %51 : vector<32x384xf32> to vector<32x384xbf16>
    %53 = vector.extract_strided_slice %52 {offsets = [0, 0], sizes = [32, 256], strides = [1, 1]} : vector<32x384xbf16> to vector<32x256xbf16>
    %54 = vector.extract_strided_slice %52 {offsets = [0, 1], sizes = [32, 256], strides = [1, 1]} : vector<32x384xbf16> to vector<32x256xbf16>
    %55 = vector.extract_strided_slice %52 {offsets = [0, 2], sizes = [32, 256], strides = [1, 1]} : vector<32x384xbf16> to vector<32x256xbf16>
    %56 = vector.extract_strided_slice %52 {offsets = [0, 3], sizes = [32, 256], strides = [1, 1]} : vector<32x384xbf16> to vector<32x256xbf16>
    %57 = vector.extract_strided_slice %52 {offsets = [0, 4], sizes = [32, 256], strides = [1, 1]} : vector<32x384xbf16> to vector<32x256xbf16>
    %58 = tpu.concatenate %53, %54, %55, %56, %57 in 0 : vector<32x256xbf16>, vector<32x256xbf16>, vector<32x256xbf16>, vector<32x256xbf16>, vector<32x256xbf16> -> vector<160x256xbf16>
    %59 = vector.extract_strided_slice %6 {offsets = [0, 0, 0], sizes = [1, 32, 1], strides = [1, 1, 1]} : vector<3x32x1xf32> to vector<1x32x1xf32>
    %60 = vector.shape_cast %59 : vector<1x32x1xf32> to vector<32x1xf32>
    %61 = vector.extract_strided_slice %6 {offsets = [1, 0, 0], sizes = [1, 32, 1], strides = [1, 1, 1]} : vector<3x32x1xf32> to vector<1x32x1xf32>
    %62 = vector.shape_cast %61 : vector<1x32x1xf32> to vector<32x1xf32>
    %63 = vector.extract_strided_slice %6 {offsets = [2, 0, 0], sizes = [1, 32, 1], strides = [1, 1, 1]} : vector<3x32x1xf32> to vector<1x32x1xf32>
    %64 = vector.shape_cast %63 : vector<1x32x1xf32> to vector<32x1xf32>
    %cst_24 = arith.constant dense<0.000000e+00> : vector<32x256xf32>
    %65 = tpu.matmul %5, %58, %cst_24 {dimension_numbers = #tpu.dot_dimension_numbers<[1], [0], [0], [1], [0, 0, 1, 1], [], []>} : vector<32x160xbf16>, vector<160x256xbf16>, vector<32x256xf32> -> vector<32x256xf32>
    %66 = vector.broadcast %60 : vector<32x1xf32> to vector<32x256xf32>
    %67 = arith.addf %65, %66 : vector<32x256xf32>
    %68 = vector.broadcast %0 : vector<1x256xf32> to vector<32x256xf32>
    %69 = arith.mulf %67, %68 : vector<32x256xf32>
    %cst_25 = arith.constant dense<0.000000e+00> : vector<32xf32>
    %70 = vector.multi_reduction <add>, %69, %cst_25 [1] : vector<32x256xf32> to vector<32xf32>
    %71 = vector.shape_cast %70 : vector<32xf32> to vector<32x1xf32>
    %cst_26 = arith.constant 1.000000e+02 : f32
    %72 = vector.broadcast %cst_26 : f32 to vector<32x1xf32>
    %73 = arith.divf %71, %72 : vector<32x1xf32>
    %74 = vector.broadcast %73 : vector<32x1xf32> to vector<32x256xf32>
    %75 = arith.subf %67, %74 : vector<32x256xf32>
    %76 = arith.mulf %75, %75 : vector<32x256xf32>
    %77 = vector.broadcast %0 : vector<1x256xf32> to vector<32x256xf32>
    %78 = arith.mulf %76, %77 : vector<32x256xf32>
    %cst_27 = arith.constant dense<0.000000e+00> : vector<32xf32>
    %79 = vector.multi_reduction <add>, %78, %cst_27 [1] : vector<32x256xf32> to vector<32xf32>
    %80 = vector.shape_cast %79 : vector<32xf32> to vector<32x1xf32>
    %cst_28 = arith.constant 1.000000e+02 : f32
    %81 = vector.broadcast %cst_28 : f32 to vector<32x1xf32>
    %82 = arith.divf %80, %81 : vector<32x1xf32>
    %cst_29 = arith.constant 9.99999974E-6 : f32
    %83 = vector.broadcast %cst_29 : f32 to vector<32x1xf32>
    %84 = arith.addf %82, %83 : vector<32x1xf32>
    %85 = math.rsqrt %84 : vector<32x1xf32>
    %86 = arith.mulf %85, %62 : vector<32x1xf32>
    %87 = vector.broadcast %86 : vector<32x1xf32> to vector<32x256xf32>
    %88 = arith.mulf %75, %87 : vector<32x256xf32>
    %89 = vector.broadcast %64 : vector<32x1xf32> to vector<32x256xf32>
    %90 = arith.addf %88, %89 : vector<32x256xf32>
    %cst_30 = arith.constant 0.000000e+00 : f32
    %91 = vector.broadcast %cst_30 : f32 to vector<32x256xf32>
    %92 = arith.maximumf %90, %91 : vector<32x256xf32>
    %93 = vector.extract_strided_slice %92 {offsets = [0, 0], sizes = [32, 50], strides = [1, 1]} : vector<32x256xf32> to vector<32x50xf32>
    %cst_31 = arith.constant dense<0xFF800000> : vector<32xf32>
    %94 = vector.multi_reduction <maximumf>, %93, %cst_31 [1] : vector<32x50xf32> to vector<32xf32>
    %95 = vector.shape_cast %94 : vector<32xf32> to vector<32x1xf32>
    %96 = vector.extract_strided_slice %92 {offsets = [0, 128], sizes = [32, 50], strides = [1, 1]} : vector<32x256xf32> to vector<32x50xf32>
    %cst_32 = arith.constant dense<0xFF800000> : vector<32xf32>
    %97 = vector.multi_reduction <maximumf>, %96, %cst_32 [1] : vector<32x50xf32> to vector<32xf32>
    %98 = vector.shape_cast %97 : vector<32xf32> to vector<32x1xf32>
    %99 = tpu.concatenate %95, %98 in 1 : vector<32x1xf32>, vector<32x1xf32> -> vector<32x2xf32>
    %c0_33 = arith.constant 0 : index
    %c0_34 = arith.constant 0 : index
    %100 = vector.load %arg13[%c0_33, %c0_34] : memref<32x2xf32, #tpu.memory_space<vmem>>, vector<32x2xf32>
    tpu.vector_store %arg13[%c0_33, %c0_34], %99 {strides = array<i32>} : memref<32x2xf32, #tpu.memory_space<vmem>>, vector<32x2xf32>,
    %c0_35 = arith.constant 0 : index
    %c0_36 = arith.constant 0 : index
    %101 = vector.load %arg1[%c0_35, %c0_36] : memref<160x256xbf16, #tpu.memory_space<vmem>>, vector<160x256xbf16>
    %c0_37 = arith.constant 0 : index
    %c0_38 = arith.constant 0 : index
    %102 = vector.load %arg8[%c0_37, %c0_38] : memref<32x160xbf16, #tpu.memory_space<vmem>>, vector<32x160xbf16>
    %c0_39 = arith.constant 0 : index
    %c0_40 = arith.constant 0 : index
    %c0_41 = arith.constant 0 : index
    %103 = vector.load %arg9[%c0_39, %c0_40, %c0_41] : memref<3x32x1xf32, #tpu.memory_space<vmem>>, vector<3x32x1xf32>
    %c0_42 = arith.constant 0 : index
    %c0_43 = arith.constant 0 : index
    %104 = vector.load %arg10[%c0_42, %c0_43] : memref<255x384xbf16, #tpu.memory_space<vmem>>, vector<255x384xbf16>
    %c0_44 = arith.constant 0 : index
    %c0_45 = arith.constant 0 : index
    %105 = vector.load %arg11[%c0_44, %c0_45] : memref<32x96xbf16, #tpu.memory_space<vmem>>, vector<32x96xbf16>
    %c0_46 = arith.constant 0 : index
    %c0_47 = arith.constant 0 : index
    %c0_48 = arith.constant 0 : index
    %106 = vector.load %arg12[%c0_46, %c0_47, %c0_48] : memref<3x32x1xf32, #tpu.memory_space<vmem>>, vector<3x32x1xf32>
    %107 = vector.extract_strided_slice %103 {offsets = [0, 0, 0], sizes = [1, 32, 1], strides = [1, 1, 1]} : vector<3x32x1xf32> to vector<1x32x1xf32>
    %108 = vector.shape_cast %107 : vector<1x32x1xf32> to vector<32x1xf32>
    %109 = vector.extract_strided_slice %103 {offsets = [1, 0, 0], sizes = [1, 32, 1], strides = [1, 1, 1]} : vector<3x32x1xf32> to vector<1x32x1xf32>
    %110 = vector.shape_cast %109 : vector<1x32x1xf32> to vector<32x1xf32>
    %111 = vector.extract_strided_slice %103 {offsets = [2, 0, 0], sizes = [1, 32, 1], strides = [1, 1, 1]} : vector<3x32x1xf32> to vector<1x32x1xf32>
    %112 = vector.shape_cast %111 : vector<1x32x1xf32> to vector<32x1xf32>
    %cst_49 = arith.constant dense<0.000000e+00> : vector<32x256xf32>
    %113 = tpu.matmul %102, %101, %cst_49 {dimension_numbers = #tpu.dot_dimension_numbers<[1], [0], [0], [1], [0, 0, 1, 1], [], []>} : vector<32x160xbf16>, vector<160x256xbf16>, vector<32x256xf32> -> vector<32x256xf32>
    %114 = vector.broadcast %108 : vector<32x1xf32> to vector<32x256xf32>
    %115 = arith.addf %113, %114 : vector<32x256xf32>
    %cst_50 = arith.constant dense<0.000000e+00> : vector<32xf32>
    %116 = vector.multi_reduction <add>, %115, %cst_50 [1] : vector<32x256xf32> to vector<32xf32>
    %117 = vector.shape_cast %116 : vector<32xf32> to vector<32x1xf32>
    %cst_51 = arith.constant 4.800000e+01 : f32
    %118 = vector.broadcast %cst_51 : f32 to vector<32x1xf32>
    %119 = arith.mulf %118, %108 : vector<32x1xf32>
    %120 = arith.subf %117, %119 : vector<32x1xf32>
    %cst_52 = arith.constant 2.080000e+02 : f32
    %121 = vector.broadcast %cst_52 : f32 to vector<32x1xf32>
    %122 = arith.divf %120, %121 : vector<32x1xf32>
    %123 = vector.broadcast %122 : vector<32x1xf32> to vector<32x256xf32>
    %124 = arith.subf %115, %123 : vector<32x256xf32>
    %125 = arith.mulf %124, %124 : vector<32x256xf32>
    %cst_53 = arith.constant dense<0.000000e+00> : vector<32xf32>
    %126 = vector.multi_reduction <add>, %125, %cst_53 [1] : vector<32x256xf32> to vector<32xf32>
    %127 = vector.shape_cast %126 : vector<32xf32> to vector<32x1xf32>
    %128 = arith.subf %108, %122 : vector<32x1xf32>
    %129 = arith.mulf %128, %128 : vector<32x1xf32>
    %cst_54 = arith.constant 4.800000e+01 : f32
    %130 = vector.broadcast %cst_54 : f32 to vector<32x1xf32>
    %131 = arith.mulf %130, %129 : vector<32x1xf32>
    %132 = arith.subf %127, %131 : vector<32x1xf32>
    %cst_55 = arith.constant 2.080000e+02 : f32
    %133 = vector.broadcast %cst_55 : f32 to vector<32x1xf32>
    %134 = arith.divf %132, %133 : vector<32x1xf32>
    %cst_56 = arith.constant 9.99999974E-6 : f32
    %135 = vector.broadcast %cst_56 : f32 to vector<32x1xf32>
    %136 = arith.addf %134, %135 : vector<32x1xf32>
    %137 = math.rsqrt %136 : vector<32x1xf32>
    %138 = arith.mulf %137, %110 : vector<32x1xf32>
    %139 = vector.broadcast %138 : vector<32x1xf32> to vector<32x256xf32>
    %140 = arith.mulf %124, %139 : vector<32x256xf32>
    %141 = vector.broadcast %112 : vector<32x1xf32> to vector<32x256xf32>
    %142 = arith.addf %140, %141 : vector<32x256xf32>
    %cst_57 = arith.constant 0.000000e+00 : f32
    %143 = vector.broadcast %cst_57 : f32 to vector<32x256xf32>
    %144 = arith.maximumf %142, %143 : vector<32x256xf32>
    %145 = arith.truncf %144 : vector<32x256xf32> to vector<32x256xbf16>
    %146 = vector.extract_strided_slice %145 {offsets = [0, 0], sizes = [32, 255], strides = [1, 1]} : vector<32x256xbf16> to vector<32x255xbf16>
    %147 = vector.extract_strided_slice %145 {offsets = [0, 1], sizes = [32, 255], strides = [1, 1]} : vector<32x256xbf16> to vector<32x255xbf16>
    %148 = arith.maximumf %146, %147 : vector<32x255xbf16>
    %cst_58 = arith.constant dense<0.000000e+00> : vector<32x384xf32>
    %149 = tpu.matmul %148, %104, %cst_58 {dimension_numbers = #tpu.dot_dimension_numbers<[1], [0], [0], [1], [0, 0, 1, 1], [], []>} : vector<32x255xbf16>, vector<255x384xbf16>, vector<32x384xf32> -> vector<32x384xf32>
    %150 = arith.truncf %149 : vector<32x384xf32> to vector<32x384xbf16>
    %151 = vector.extract_strided_slice %150 {offsets = [0, 0], sizes = [32, 256], strides = [1, 1]} : vector<32x384xbf16> to vector<32x256xbf16>
    %152 = vector.extract_strided_slice %150 {offsets = [0, 1], sizes = [32, 256], strides = [1, 1]} : vector<32x384xbf16> to vector<32x256xbf16>
    %153 = vector.extract_strided_slice %150 {offsets = [0, 2], sizes = [32, 256], strides = [1, 1]} : vector<32x384xbf16> to vector<32x256xbf16>
    %154 = tpu.concatenate %151, %152, %153 in 0 : vector<32x256xbf16>, vector<32x256xbf16>, vector<32x256xbf16> -> vector<96x256xbf16>
    %155 = vector.extract_strided_slice %106 {offsets = [0, 0, 0], sizes = [1, 32, 1], strides = [1, 1, 1]} : vector<3x32x1xf32> to vector<1x32x1xf32>
    %156 = vector.shape_cast %155 : vector<1x32x1xf32> to vector<32x1xf32>
    %157 = vector.extract_strided_slice %106 {offsets = [1, 0, 0], sizes = [1, 32, 1], strides = [1, 1, 1]} : vector<3x32x1xf32> to vector<1x32x1xf32>
    %158 = vector.shape_cast %157 : vector<1x32x1xf32> to vector<32x1xf32>
    %159 = vector.extract_strided_slice %106 {offsets = [2, 0, 0], sizes = [1, 32, 1], strides = [1, 1, 1]} : vector<3x32x1xf32> to vector<1x32x1xf32>
    %160 = vector.shape_cast %159 : vector<1x32x1xf32> to vector<32x1xf32>
    %cst_59 = arith.constant dense<0.000000e+00> : vector<32x256xf32>
    %161 = tpu.matmul %105, %154, %cst_59 {dimension_numbers = #tpu.dot_dimension_numbers<[1], [0], [0], [1], [0, 0, 1, 1], [], []>} : vector<32x96xbf16>, vector<96x256xbf16>, vector<32x256xf32> -> vector<32x256xf32>
    %162 = vector.broadcast %156 : vector<32x1xf32> to vector<32x256xf32>
    %163 = arith.addf %161, %162 : vector<32x256xf32>
    %164 = vector.broadcast %0 : vector<1x256xf32> to vector<32x256xf32>
    %165 = arith.mulf %163, %164 : vector<32x256xf32>
    %cst_60 = arith.constant dense<0.000000e+00> : vector<32xf32>
    %166 = vector.multi_reduction <add>, %165, %cst_60 [1] : vector<32x256xf32> to vector<32xf32>
    %167 = vector.shape_cast %166 : vector<32xf32> to vector<32x1xf32>
    %cst_61 = arith.constant 1.000000e+02 : f32
    %168 = vector.broadcast %cst_61 : f32 to vector<32x1xf32>
    %169 = arith.divf %167, %168 : vector<32x1xf32>
    %170 = vector.broadcast %169 : vector<32x1xf32> to vector<32x256xf32>
    %171 = arith.subf %163, %170 : vector<32x256xf32>
    %172 = arith.mulf %171, %171 : vector<32x256xf32>
    %173 = vector.broadcast %0 : vector<1x256xf32> to vector<32x256xf32>
    %174 = arith.mulf %172, %173 : vector<32x256xf32>
    %cst_62 = arith.constant dense<0.000000e+00> : vector<32xf32>
    %175 = vector.multi_reduction <add>, %174, %cst_62 [1] : vector<32x256xf32> to vector<32xf32>
    %176 = vector.shape_cast %175 : vector<32xf32> to vector<32x1xf32>
    %cst_63 = arith.constant 1.000000e+02 : f32
    %177 = vector.broadcast %cst_63 : f32 to vector<32x1xf32>
    %178 = arith.divf %176, %177 : vector<32x1xf32>
    %cst_64 = arith.constant 9.99999974E-6 : f32
    %179 = vector.broadcast %cst_64 : f32 to vector<32x1xf32>
    %180 = arith.addf %178, %179 : vector<32x1xf32>
    %181 = math.rsqrt %180 : vector<32x1xf32>
    %182 = arith.mulf %181, %158 : vector<32x1xf32>
    %183 = vector.broadcast %182 : vector<32x1xf32> to vector<32x256xf32>
    %184 = arith.mulf %171, %183 : vector<32x256xf32>
    %185 = vector.broadcast %160 : vector<32x1xf32> to vector<32x256xf32>
    %186 = arith.addf %184, %185 : vector<32x256xf32>
    %cst_65 = arith.constant 0.000000e+00 : f32
    %187 = vector.broadcast %cst_65 : f32 to vector<32x256xf32>
    %188 = arith.maximumf %186, %187 : vector<32x256xf32>
    %189 = vector.extract_strided_slice %188 {offsets = [0, 0], sizes = [32, 50], strides = [1, 1]} : vector<32x256xf32> to vector<32x50xf32>
    %cst_66 = arith.constant dense<0xFF800000> : vector<32xf32>
    %190 = vector.multi_reduction <maximumf>, %189, %cst_66 [1] : vector<32x50xf32> to vector<32xf32>
    %191 = vector.shape_cast %190 : vector<32xf32> to vector<32x1xf32>
    %192 = vector.extract_strided_slice %188 {offsets = [0, 128], sizes = [32, 50], strides = [1, 1]} : vector<32x256xf32> to vector<32x50xf32>
    %cst_67 = arith.constant dense<0xFF800000> : vector<32xf32>
    %193 = vector.multi_reduction <maximumf>, %192, %cst_67 [1] : vector<32x50xf32> to vector<32xf32>
    %194 = vector.shape_cast %193 : vector<32xf32> to vector<32x1xf32>
    %195 = tpu.concatenate %191, %194 in 1 : vector<32x1xf32>, vector<32x1xf32> -> vector<32x2xf32>
    %c0_68 = arith.constant 0 : index
    %c0_69 = arith.constant 0 : index
    %196 = vector.load %arg14[%c0_68, %c0_69] : memref<32x2xf32, #tpu.memory_space<vmem>>, vector<32x2xf32>
    tpu.vector_store %arg14[%c0_68, %c0_69], %195 {strides = array<i32>} : memref<32x2xf32, #tpu.memory_space<vmem>>, vector<32x2xf32>,
    return
  }
}

</mosaic_0001>

<bundles_post_ra>
// kernel: tpu_custom_call.1
= control target key start
LH: loop header
LB: loop body
LE: loop exit
PB: predicated region body
PF: predicated region fallthrough
CT: control target
= control target key end

     0   :  { %20 = vsyncpa [#allocation3], 0  ;;  %s6756_s0 = inlined_call_operand.hbm [shape: bf16[160,512], index: 0, kind: input, shape index: {}]   ;;  %s6757_s1 = inlined_call_operand.vmem [shape: bf16[160,256], index: 1, kind: input, shape index: {}]   ;;  %s6758_s2 = inlined_call_operand.vmem [shape: f32[1,256], index: 2, kind: input, shape index: {}]   ;;  %s6759_s3 = inlined_call_operand.vmem [shape: bf16[32,160], index: 3, kind: input, shape index: {}]   ;;  %s6760_s4 = inlined_call_operand.vmem [shape: f32[3,32,1], index: 4, kind: input, shape index: {}]   ;;  %s6761_s5 = inlined_call_operand.hbm [shape: bf16[510,384], index: 5, kind: input, shape index: {}]   ;;  %s6762_s6 = inlined_call_operand.vmem [shape: bf16[32,160], index: 6, kind: input, shape index: {}]   ;;  %s6763_s7 = inlined_call_operand.vmem [shape: f32[3,32,1], index: 7, kind: input, shape index: {}]   ;;  %s6764_s8 = inlined_call_operand.vmem [shape: bf16[32,160], index: 8, kind: input, shape index: {}]   ;;  %s6765_s9 = inlined_call_operand.vmem [shape: f32[3,32,1], index: 9, kind: input, shape index: {}]   ;;  %s6766_s10 = inlined_call_operand.hbm [shape: bf16[255,384], index: 10, kind: input, shape index: {}]   ;;  %s6767_s11 = inlined_call_operand.vmem [shape: bf16[32,96], index: 11, kind: input, shape index: {}]   ;;  %s6768_s12 = inlined_call_operand.vmem [shape: f32[3,32,1], index: 12, kind: input, shape index: {}]   ;;  %s6769_s13 = inlined_call_operand.vmem [shape: f32[32,2], index: 13, kind: output, shape index: {0}]   ;;  %s6770_s14 = inlined_call_operand.vmem [shape: f32[32,2], index: 14, kind: output, shape index: {1}]  }
   0x1   :  { %21 = vsyncpa [#allocation5], 0  ;;  %s47_s15 = sshll.u32 %s6761_s5, 4  ;;  %s5135_s16 = smov [#allocation4]   ;;  %s48_s15 = int_to_ptr.hbm [resolvable:$true] %s47_s15 }
   0x2   :  { %s49_s17 = sshll.u32 %s5135_s16, 4  ;;  %s26_s20 = sshll.u32 %s6756_s0, 4  ;;  %s50_s17 = int_to_ptr.vmem [resolvable:$true] %s49_s17  ;;  %s27_s20 = int_to_ptr.hbm [resolvable:$true] %s26_s20 }
   0x3   :  { %s5136_s21 = smov 192   ;;  %s5137_s22 = smov 12  }
   0x4   :  { %55 = dma.hbm_to_vmem [thread:$0]  %s48_s15, 12288, %s50_s17, [#allocation5], %s5136_s21, %s5136_s21, %s5137_s22  }
   0x5   :  { %s5138_s23 = smov [#allocation2]   ;;  %s5139_s25 = smov 256  }
   0x6   :  { %s28_s24 = sshll.u32 %s5138_s23, 4  ;;  %s5140_s26 = smov 16   ;;  %s29_s24 = int_to_ptr.vmem [resolvable:$true] %s28_s24 }
   0x7   :  { %34 = dma.hbm_to_vmem [thread:$0]  %s27_s20, 5120, %s29_s24, [#allocation3], %s5139_s25, %s5139_s25, %s5140_s26  }
   0x8   :  { %s68_s28 = sshll.u32 %s6766_s10, 4  ;;  %s5141_s29 = smov [#allocation6]   ;;  %s69_s28 = int_to_ptr.hbm [resolvable:$true] %s68_s28 }
   0x9   :  { %s70_s30 = sshll.u32 %s5141_s29, 4  ;;  %s71_s30 = int_to_ptr.vmem [resolvable:$true] %s70_s30 }
   0xa   :  { %76 = dma.hbm_to_vmem [thread:$0]  %s69_s28, 6144, %s71_s30, [#allocation5], %s5136_s21, %s5136_s21, %s5137_s22  }
   0xb   :  { %5131 = dma.done.wait [#allocation3], 5120  }
   0xc   :  { %5132 = vsyncadd [#allocation3], 4294962176 }
   0xd   :  { %5133 = dma.done.wait [#allocation5], 18432  }
   0xe   :  { %5134 = vsyncadd [#allocation5], 4294948864  ;;  %v3896_v0 = vld [vmem:[#allocation2 + $0xe0] sm:$0xf]  ;;  %v4700_v1 = vld [vmem:[#allocation2 + $0xec] sm:$0xf0] }
   0xf   :  { %v4698_v2 = vld [vmem:[#allocation2 + $0xe4] sm:$0xf]  ;;  %v3897_v3 = vor.u32 %v4700_v1, %v3896_v0  ;;  %v3898_v4 = vld [vmem:[#allocation2 + $0xf0] sm:$0xf0]  ;;  %v3880_v9 = vld [vmem:[#allocation2 + $0xc0] sm:$0xf] }
  0x10   :  { %v4706_v5 = vld [vmem:[#allocation2 + $0x124] sm:$0xf]  ;;  %v3930_v6 = vld [vmem:[#allocation2 + $0x130] sm:$0xf0]  ;;  %v3901_v7 = vor.u32 %v4698_v2, %v3898_v4  ;;  %v4696_v10 = vld [vmem:[#allocation2 + $0xcc] sm:$0xf0] }
  0x11   :  { %v3933_v8 = vor.u32 %v4706_v5, %v3930_v6  ;;  %v3928_v11 = vld [vmem:[#allocation2 + $0x120] sm:$0xf]  ;;  %540 = vmatpush.bf16.msra.mxu0 %v3897_v3  ;;  %v3881_v12 = vor.u32 %v4696_v10, %v3880_v9  ;;  %v4708_v13 = vld [vmem:[#allocation2 + $0x12c] sm:$0xf0]  ;;  %v4694_v14 = vld [vmem:[#allocation2 + $0xc4] sm:$0xf] }
  0x12   :  { %v3882_v15 = vld [vmem:[#allocation2 + $0xd0] sm:$0xf0]  ;;  %578 = vmatpush.bf16.msra.mxu2 %v3901_v7  ;;  %v3929_v16 = vor.u32 %v4708_v13, %v3928_v11  ;;  %v4702_v18 = vld [vmem:[#allocation2 + $0x104] sm:$0xf]  ;;  %v3770_v22 = vld [vmem:[%s6759_s3 + $0x8] sm:$0xf0] }
  0x13   :  { %603 = vmatpush.bf16.msra.mxu3 %v3933_v8  ;;  %v3885_v17 = vor.u32 %v4694_v14, %v3882_v15  ;;  %v3914_v19 = vld [vmem:[#allocation2 + $0x110] sm:$0xf0]  ;;  %v4710_v20 = vld [vmem:[%s6759_s3 + $0x4] sm:$0xf]  ;;  %v3864_v23 = vld [vmem:[#allocation2 + $0xa0] sm:$0xf] }
  0x14   :  { %v3917_v21 = vor.u32 %v4702_v18, %v3914_v19  ;;  %v4692_v24 = vld [vmem:[#allocation2 + $0xac] sm:$0xf0]  ;;  %565 = vmatpush.bf16.msra.mxu1 %v3929_v16  ;;  %v3912_v25 = vld [vmem:[#allocation2 + $0x100] sm:$0xf]  ;;  %v4690_v27 = vld [vmem:[#allocation2 + $0xa4] sm:$0xf]  ;;  %v5241_v28 = vor.u32 %v4710_v20, %v3770_v22 }
  0x15   :  { %v4704_v26 = vld [vmem:[#allocation2 + $0x10c] sm:$0xf0]  ;;  %541 = vmatpush.bf16.msra.mxu0 %v3881_v12  ;;  %vm533_vm0 = vcmask 261120   ;;  %v3865_v29 = vor.u32 %v4692_v24, %v3864_v23  ;;  %v3866_v31 = vld [vmem:[#allocation2 + $0xb0] sm:$0xf0]  ;;  %s5145_s10 = smov 126  }
  0x16   :  { %v3913_v30 = vor.u32 %v4704_v26, %v3912_v25  ;;  %579 = vmatpush.bf16.msra.mxu2 %v3885_v17  ;;  %v3869_v32 = vor.u32 %v4690_v27, %v3866_v31  ;;  %v3848_v33 = vld [vmem:[#allocation2 + $0x80] sm:$0xf]  ;;  %v4688_v34 = vld [vmem:[#allocation2 + $0x8c] sm:$0xf0]  ;;  %v3904_v35 = vld [vmem:[#allocation2 + $0xe8] sm:$0xf] }
  0x17   :  { %604 = vmatpush.bf16.msra.mxu3 %v3917_v21  ;;  %v4686_v36 = vld [vmem:[#allocation2 + $0x84] sm:$0xf]  ;;  %v3850_v37 = vld [vmem:[#allocation2 + $0x90] sm:$0xf0]  ;;  %v4701_v38 = vld [vmem:[#allocation2 + $0xf4] sm:$0xf0]  ;;  %v3849_v41 = vor.u32 %v4688_v34, %v3848_v33 }
  0x18   :  { %566 = vmatpush.bf16.msra.mxu1 %v3913_v30  ;;  %v3905_v39 = vor.u32 %v4701_v38, %v3904_v35  ;;  %v3888_v40 = vld [vmem:[#allocation2 + $0xc8] sm:$0xf]  ;;  %v4697_v42 = vld [vmem:[#allocation2 + $0xd4] sm:$0xf0]  ;;  %v3853_v43 = vor.u32 %v4686_v36, %v3850_v37  ;;  %v3832_v44 = vld [vmem:[#allocation2 + $0x60] sm:$0xf] }
  0x19   :  { %542 = vmatpush.bf16.msra.mxu0 %v3865_v29  ;;  %v4684_v45 = vld [vmem:[#allocation2 + $0x6c] sm:$0xf0]  ;;  %v4682_v46 = vld [vmem:[#allocation2 + $0x64] sm:$0xf]  ;;  %v3889_v47 = vor.u32 %v4697_v42, %v3888_v40  ;;  %v3834_v48 = vld [vmem:[#allocation2 + $0x70] sm:$0xf0] }
  0x1a   :  { %3944 = vmatmul.msk.bf16.vlgmr.msra.gmra.mxu3 %vm533_vm0, %v5241_v28  ;;  %580 = vmatpush.bf16.msra.mxu2 %v3869_v32  ;;  %v3872_v49 = vld [vmem:[#allocation2 + $0xa8] sm:$0xf]  ;;  %v4693_v50 = vld [vmem:[#allocation2 + $0xb4] sm:$0xf0]  ;;  %v3833_v51 = vor.u32 %v4684_v45, %v3832_v44  ;;  %v3837_v52 = vor.u32 %v4682_v46, %v3834_v48  ;;  %v3816_v53 = vld [vmem:[#allocation2 + $0x40] sm:$0xf] }
  0x1b   :  { %3942 = vmatmul.msk.bf16.vlgmr.msra.gmra.mxu1 %vm533_vm0, %v5241_v28  ;;  %v4680_v54 = vld [vmem:[#allocation2 + $0x4c] sm:$0xf0]  ;;  %v4678_v55 = vld [vmem:[#allocation2 + $0x44] sm:$0xf]  ;;  %v3873_v56 = vor.u32 %v4693_v50, %v3872_v49  ;;  %v3818_v57 = vld [vmem:[#allocation2 + $0x50] sm:$0xf0] }
  0x1c   :  { %616 = vmatpush.bf16.msrb.mxu1 %v3905_v39  ;;  %v3856_v58 = vld [vmem:[#allocation2 + $0x88] sm:$0xf]  ;;  %v4689_v59 = vld [vmem:[#allocation2 + $0x94] sm:$0xf0]  ;;  %v4712_v60 = vld [vmem:[%s6759_s3 + $0x14] sm:$0xf]  ;;  %v3817_v63 = vor.u32 %v4680_v54, %v3816_v53  ;;  %v3821_v3 = vor.u32 %v4678_v55, %v3818_v57 }
  0x1d   :  { %543 = vmatpush.bf16.msra.mxu0 %v3849_v41  ;;  %v3778_v61 = vld [vmem:[%s6759_s3 + $0x18] sm:$0xf0]  ;;  %v3800_v62 = vld [vmem:[#allocation2 + $0x20] sm:$0xf]  ;;  %v4676_v0 = vld [vmem:[#allocation2 + $0x2c] sm:$0xf0]  ;;  %v3857_v6 = vor.u32 %v4689_v59, %v3856_v58 }
  0x1e   :  { %581 = vmatpush.bf16.msra.mxu2 %v3853_v43  ;;  %v3936_v1 = vld [vmem:[#allocation2 + $0x128] sm:$0xf]  ;;  %v4709_v2 = vld [vmem:[#allocation2 + $0x134] sm:$0xf0]  ;;  %v4674_v4 = vld [vmem:[#allocation2 + $0x24] sm:$0xf]  ;;  %v5253_v13 = vor.u32 %v4712_v60, %v3778_v61  ;;  %v3801_v14 = vor.u32 %v4676_v0, %v3800_v62 }
  0x1f   :  { %v3802_v5 = vld [vmem:[#allocation2 + $0x30] sm:$0xf0]  ;;  %v3840_v7 = vld [vmem:[#allocation2 + $0x68] sm:$0xf]  ;;  %v3937_v8 = vor.u32 %v4709_v2, %v3936_v1  ;;  %v4685_v9 = vld [vmem:[#allocation2 + $0x74] sm:$0xf0] }
  0x20   :  { %617 = vmatpush.bf16.msrb.mxu1 %v3889_v47  ;;  %v3920_v10 = vld [vmem:[#allocation2 + $0x108] sm:$0xf]  ;;  %v4705_v11 = vld [vmem:[#allocation2 + $0x114] sm:$0xf0]  ;;  %v3784_v15 = vld [vmem:[#allocation2] sm:$0xf]  ;;  %v3805_v17 = vor.u32 %v4674_v4, %v3802_v5  ;;  %v3841_v20 = vor.u32 %v4685_v9, %v3840_v7 }
  0x21   :  { %544 = vmatpush.bf16.msra.mxu0 %v3833_v51  ;;  %641 = vmatpush.bf16.msrb.mxu3 %v3937_v8  ;;  %v3921_v12 = vor.u32 %v4705_v11, %v3920_v10  ;;  %v4672_v16 = vld [vmem:[#allocation2 + $0xc] sm:$0xf0]  ;;  %v4670_v18 = vld [vmem:[#allocation2 + $0x4] sm:$0xf]  ;;  %v3786_v19 = vld [vmem:[#allocation2 + $0x10] sm:$0xf0] }
  0x22   :  { %582 = vmatpush.bf16.msra.mxu2 %v3837_v52  ;;  %v5258_v21 = vld [vmem:[%s6760_s4] sm:$0xff]  ;;  %v3824_v22 = vld [vmem:[#allocation2 + $0x48] sm:$0xf]  ;;  %v4681_v23 = vld [vmem:[#allocation2 + $0x54] sm:$0xf0]  ;;  %v5142_v25 = vmov 0   ;;  %v3785_v30 = vor.u32 %v4672_v16, %v3784_v15  ;;  %v3789_v33 = vor.u32 %v4670_v18, %v3786_v19 }
  0x23   :  { %v4699_v24 = vld [vmem:[#allocation2 + $0xec] sm:$0xf]  ;;  %4918 = vset.pattern.permute.xlu0 %v5142_v25  ;;  %4919 = vset.pattern.permute.xlu1 %v5142_v25  ;;  %v3906_v26 = vld [vmem:[#allocation2 + $0xf8] sm:$0xf0]  ;;  %v3768_v31 = vld [vmem:[%s6759_s3] sm:$0xf]  ;;  %v3825_v34 = vor.u32 %v4681_v23, %v3824_v22 }
  0x24   :  { %618 = vmatpush.bf16.msrb.mxu1 %v3873_v56  ;;  %v4707_v27 = vld [vmem:[#allocation2 + $0x12c] sm:$0xf]  ;;  %v3938_v29 = vld [vmem:[#allocation2 + $0x138] sm:$0xf0]  ;;  %297 = vperm.xlu0 %4918, %v5258_v21   ;;  %v4711_v32 = vld [vmem:[%s6759_s3 + $0x4] sm:$0xf0]  ;;  %v3909_v36 = vor.u32 %v4699_v24, %v3906_v26 }
  0x25   :  { %545 = vmatpush.bf16.msra.mxu0 %v3817_v63  ;;  %642 = vmatpush.bf16.msrb.mxu3 %v3921_v12  ;;  %v3808_v35 = vld [vmem:[#allocation2 + $0x28] sm:$0xf]  ;;  %v4677_v37 = vld [vmem:[#allocation2 + $0x34] sm:$0xf0]  ;;  %v4695_v38 = vld [vmem:[#allocation2 + $0xcc] sm:$0xf]  ;;  %v3941_v39 = vor.u32 %v4707_v27, %v3938_v29  ;;  %v3769_v41 = vor.u32 %v4711_v32, %v3768_v31 }
  0x26   :  { %583 = vmatpush.bf16.msra.mxu2 %v3821_v3  ;;  %v5274_v40 = vld [vmem:[%s6760_s4 + $0x10] sm:$0xff]  ;;  %4920 = vset.pattern.permute.xlu2 %v5142_v25  ;;  %v3890_v42 = vld [vmem:[#allocation2 + $0xd8] sm:$0xf0]  ;;  %v4703_v43 = vld [vmem:[#allocation2 + $0x10c] sm:$0xf]  ;;  %v3809_v46 = vor.u32 %v4677_v37, %v3808_v35  ;;  %vm1700_vm14 = vcmask 1046528  }
  0x27   :  { %v3922_v44 = vld [vmem:[#allocation2 + $0x118] sm:$0xf0]  ;;  %307 = vperm.xlu1 %4919, %v5274_v40   ;;  %v5280_v45 = vld [vmem:[%s6760_s4 + $0x8] sm:$0xff]  ;;  %v3893_v47 = vor.u32 %v4695_v38, %v3890_v42  ;;  %v4673_v49 = vld [vmem:[#allocation2 + $0x14] sm:$0xf0]  ;;  %vm1031_vm15 = vcmask 1039360  }
  0x28   :  { %619 = vmatpush.bf16.msrb.mxu1 %v3857_v6  ;;  %v3792_v48 = vld [vmem:[#allocation2 + $0x8] sm:$0xf]  ;;  %v3925_v50 = vor.u32 %v4703_v43, %v3922_v44  ;;  %v4691_v51 = vld [vmem:[#allocation2 + $0xac] sm:$0xf]  ;;  %v3874_v52 = vld [vmem:[#allocation2 + $0xb8] sm:$0xf0] }
  0x29   :  { %546 = vmatpush.bf16.msra.mxu0 %v3801_v14  ;;  %v5286_v53 = vld [vmem:[%s6760_s4 + $0x18] sm:$0xff]  ;;  %v3793_v54 = vor.u32 %v4673_v49, %v3792_v48  ;;  %v3877_v55 = vor.u32 %v4691_v51, %v3874_v52  ;;  %v4687_v56 = vld [vmem:[#allocation2 + $0x8c] sm:$0xf]  ;;  %v3776_v61 = vld [vmem:[%s6759_s3 + $0x10] sm:$0xf]  ;;  %s5146_s15 = smov 125  }
  0x2a   :  { %3945 = vmatmul.msk.bf16.gmra.mxu3 %vm533_vm0, %v5253_v13  ;;  %584 = vmatpush.bf16.msra.mxu2 %v3805_v17  ;;  %v3858_v57 = vld [vmem:[#allocation2 + $0x98] sm:$0xf0]  ;;  %v4683_v59 = vld [vmem:[#allocation2 + $0x6c] sm:$0xf]  ;;  %v4713_v62 = vld [vmem:[%s6759_s3 + $0x14] sm:$0xf0] }
  0x2b   :  { %3943 = vmatmul.msk.bf16.gmra.mxu1 %vm533_vm0, %v5253_v13  ;;  %v3861_v58 = vor.u32 %v4687_v56, %v3858_v57  ;;  %v3842_v60 = vld [vmem:[#allocation2 + $0x78] sm:$0xf0]  ;;  %v3777_v0 = vor.u32 %v4713_v62, %v3776_v61  ;;  %v4679_v1 = vld [vmem:[#allocation2 + $0x4c] sm:$0xf]  ;;  %s5147_s16 = smov 124  }
  0x2c   :  { %620 = vmatpush.bf16.msrb.mxu1 %v3841_v20  ;;  %302 = vperm.xlu0 %4918, %v5280_v45   ;;  %v3845_v63 = vor.u32 %v4683_v59, %v3842_v60  ;;  %v3826_v2 = vld [vmem:[#allocation2 + $0x58] sm:$0xf0]  ;;  %v4675_v4 = vld [vmem:[#allocation2 + $0x2c] sm:$0xf] }
  0x2d   :  { %547 = vmatpush.bf16.msra.mxu0 %v3785_v30  ;;  %v3829_v3 = vor.u32 %v4679_v1, %v3826_v2  ;;  %v3810_v5 = vld [vmem:[#allocation2 + $0x38] sm:$0xf0]  ;;  %v4671_v7 = vld [vmem:[#allocation2 + $0xc] sm:$0xf] }
  0x2e   :  { %585 = vmatpush.bf16.msra.mxu2 %v3789_v33  ;;  %v3813_v6 = vor.u32 %v4675_v4, %v3810_v5  ;;  %v3794_v8 = vld [vmem:[#allocation2 + $0x18] sm:$0xf0] }
  0x2f   :  { %312 = vperm.xlu1 %4919, %v5286_v53   ;;  %v3797_v9 = vor.u32 %v4671_v7, %v3794_v8 }
  0x30   :  { %621 = vmatpush.bf16.msrb.mxu1 %v3825_v34  ;;  %548 = vmatmul.bf16.vlgmr.msra.gmra.mxu0 %v3769_v41 }
  0x31   :  { %654 = vmatpush.bf16.msrb.mxu0 %v3909_v36  ;;  %586 = vmatmul.bf16.vlgmr.msra.gmra.mxu2 %v3769_v41 }
  0x32   :  { %679 = vmatpush.bf16.msrb.mxu2 %v3941_v39 }
  0x34   :  { %622 = vmatpush.bf16.msrb.mxu1 %v3809_v46 }
  0x35   :  { %655 = vmatpush.bf16.msrb.mxu0 %v3893_v47 }
  0x36   :  { %680 = vmatpush.bf16.msrb.mxu2 %v3925_v50 }
  0x38   :  { %623 = vmatpush.bf16.msrb.mxu1 %v3793_v54 }
  0x39   :  { %656 = vmatpush.bf16.msrb.mxu0 %v3877_v55 }
  0x3a   :  { %3946 = vmatmul.msk.bf16.vlgmr.msrb.gmra.mxu3 %vm533_vm0, %v5241_v28 }
  0x3b   :  { %624 = vmatmul.bf16.vlgmr.msrb.gmra.mxu1 %v3769_v41 }
  0x3d   :  { %657 = vmatpush.bf16.msrb.mxu0 %v3861_v58 }
  0x40   :  { %553 = vmatmul.bf16.gmra.mxu0 %v3777_v0 }
  0x41   :  { %658 = vmatpush.bf16.msrb.mxu0 %v3845_v63  ;;  %591 = vmatmul.bf16.gmra.mxu2 %v3777_v0 }
  0x45   :  { %659 = vmatpush.bf16.msrb.mxu0 %v3829_v3 }
  0x49   :  { %660 = vmatpush.bf16.msrb.mxu0 %v3813_v6 }
  0x4a   :  { %3947 = vmatmul.msk.bf16.gmra.mxu3 %vm533_vm0, %v5253_v13 }
  0x4b   :  { %629 = vmatmul.bf16.gmra.mxu1 %v3777_v0 }
  0x4d   :  { %661 = vmatpush.bf16.msrb.mxu0 %v3797_v9 }
  0x50   :  { %662 = vmatmul.bf16.vlgmr.msrb.gmra.mxu0 %v3769_v41 }
  0x51   :  { %3948 = vmatmul.msk.bf16.vlgmr.msrb.gmra.mxu2 %vm533_vm0, %v5241_v28 }
  0x60   :  { %667 = vmatmul.bf16.gmra.mxu0 %v3777_v0 }
  0x61   :  { %3949 = vmatmul.msk.bf16.gmra.mxu2 %vm533_vm0, %v5253_v13 }
  0x96   :  { %v298_v27 = vpop.permute.xlu0 %297 }
  0x98   :  { %v568_v10 = vpop.f32.mrf.mxu1 }
  0x99   :  { %v308_v54 = vpop.permute.xlu1 %307 }
  0x9d   :  { %v606_v11 = vpop.f32.mrf.mxu3 }
  0x9e   :  { %v303_v38 = vpop.permute.xlu0 %302 }
  0xa0   :  { %v570_v12 = vpop.f32.mrf.mxu1 }
  0xa1   :  { %v313_v9 = vpop.permute.xlu1 %312 }
  0xa5   :  { %v608_v14 = vpop.f32.mrf.mxu3 }
  0xa8   :  { %v573_v16 = vpop.f32.mrf.mxu1 }
  0xad   :  { %v549_v15 = vpop.f32.mrf.mxu0  ;;  %v611_v17 = vpop.f32.mrf.mxu3 }
  0xae   :  { %v550_v31 = vadd.f32 %v549_v15, %v298_v27 }
  0xb0   :  { %v5303_v20 = vpop.f32.mrf.mxu1  ;;  %v5307_v36 = vadd.f32 %v568_v10, %v550_v31 }
  0xb4   :  { %v587_v18 = vpop.f32.mrf.mxu2 }
  0xb5   :  { %v551_v19 = vpop.f32.mrf.mxu0  ;;  %v613_v24 = vpop.f32.mrf.mxu3  ;;  %v588_v13 = vadd.f32 %v587_v18, %v298_v27 }
  0xb6   :  { %v552_v46 = vadd.f32 %v551_v19, %v303_v38 }
  0xb7   :  { %v5305_v35 = vadd.f32 %v606_v11, %v588_v13 }
  0xb8   :  { %v625_v25 = vpop.f32.mrf.mxu1  ;;  %v5319_v56 = vadd.f32 %v570_v12, %v552_v46 }
  0xb9   :  { %v626_v32 = vadd.f32 %v625_v25, %v298_v27  ;;  %v692_v43 = vadd.f32 %v5305_v35, %v5307_v36 }
  0xbc   :  { %v589_v22 = vpop.f32.mrf.mxu2 }
  0xbd   :  { %v554_v23 = vpop.f32.mrf.mxu0  ;;  %v644_v29 = vpop.f32.mrf.mxu3  ;;  %v590_v41 = vadd.f32 %v589_v22, %v303_v38 }
  0xbe   :  { %v5309_v37 = vadd.f32 %v644_v29, %v626_v32  ;;  %v555_v63 = vadd.f32 %v554_v23, %v308_v54  ;;  %v5143_v32 = vmov 324.0  }
  0xbf   :  { %v5316_v51 = vadd.f32 %v608_v14, %v590_v41  ;;  %5021 = vrcp.f32 %v5143_v32  ;;  %v712_v41 = vmul.f32 188.0, %v5258_v21 }
  0xc0   :  { %v627_v34 = vpop.f32.mrf.mxu1  ;;  %v693_v50 = vadd.f32 %v692_v43, %v5309_v37  ;;  %v5331_v6 = vadd.f32 %v573_v16, %v555_v63 }
  0xc1   :  { %v628_v47 = vadd.f32 %v627_v34, %v303_v38  ;;  %v697_v60 = vadd.f32 %v5316_v51, %v5319_v56 }
  0xc4   :  { %v592_v28 = vpop.f32.mrf.mxu2 }
  0xc5   :  { %v556_v26 = vpop.f32.mrf.mxu0  ;;  %v646_v39 = vpop.f32.mrf.mxu3  ;;  %v593_v58 = vadd.f32 %v592_v28, %v308_v54 }
  0xc6   :  { %v5321_v57 = vadd.f32 %v646_v39, %v628_v47  ;;  %v557_v15 = vadd.f32 %v556_v26, %v313_v9  ;;  %v713_v47 = vmul.f32 188.0, %v5280_v45 }
  0xc7   :  { %v5328_v4 = vadd.f32 %v611_v17, %v593_v58 }
  0xc8   :  { %v630_v55 = vpop.f32.mrf.mxu1  ;;  %v698_v2 = vadd.f32 %v697_v60, %v5321_v57  ;;  %v5344_v28 = vadd.f32 %v5303_v20, %v557_v15  ;;  %v715_v60 = vmul.f32 188.0, %v5286_v53 }
  0xc9   :  { %v631_v0 = vadd.f32 %v630_v55, %v308_v54  ;;  %v702_v12 = vadd.f32 %v5328_v4, %v5331_v6 }
  0xcc   :  { %v594_v30 = vpop.f32.mrf.mxu2 }
  0xcd   :  { %v663_v33 = vpop.f32.mrf.mxu0  ;;  %v649_v61 = vpop.f32.mrf.mxu3  ;;  %v595_v11 = vadd.f32 %v594_v30, %v313_v9 }
  0xce   :  { %v664_v42 = vadd.f32 %v663_v33, %v298_v27  ;;  %v5333_v7 = vadd.f32 %v649_v61, %v631_v0  ;;  %v5022_v33 = vpop.eup %5021 }
  0xcf   :  { %v5340_v16 = vadd.f32 %v613_v24, %v595_v11  ;;  %v721_v20 = vmul.f32 324.0, %v5022_v33  ;;  %vm725_vm1 = vweird.f32 %v5022_v33 }
  0xd0   :  { %v632_v10 = vpop.f32.mrf.mxu1  ;;  %v703_v18 = vadd.f32 %v702_v12, %v5333_v7 }
  0xd1   :  { %v633_v17 = vadd.f32 %v632_v10, %v313_v9  ;;  %v707_v26 = vadd.f32 %v5340_v16, %v5344_v28  ;;  %v722_v34 = vsub.f32 1.0, %v721_v20 }
  0xd4   :  { %v682_v44 = vpop.f32.mrf.mxu2 }
  0xd5   :  { %v5313_v48 = vadd.f32 %v682_v44, %v664_v42  ;;  %v665_v49 = vpop.f32.mrf.mxu0  ;;  %v651_v22 = vpop.f32.mrf.mxu3 }
  0xd6   :  { %v666_v59 = vadd.f32 %v665_v49, %v303_v38  ;;  %v5346_v27 = vadd.f32 %v651_v22, %v633_v17  ;;  %v723_v38 = vmul.f32 %v5022_v33, %v722_v34 }
  0xd7   :  { %v694_v52 = vadd.f32 %v693_v50, %v5313_v48 }
  0xd8   :  { %v708_v31 = vadd.f32 %v707_v26, %v5346_v27  ;;  %v724_v39 = vadd.f32 %v5022_v33, %v723_v38 }
  0xd9   :  { %695 = vadd.xlane.f32.xlu2 %v694_v52 }
  0xda   :  { %v5355_v42 = vsel %vm725_vm1, %v5022_v33, %v724_v39  ;;  %vm1132_vm1 = vcmask 1031168  }
  0xdc   :  { %v684_v62 = vpop.f32.mrf.mxu2 }
  0xdd   :  { %v5325_v1 = vadd.f32 %v684_v62, %v666_v59  ;;  %v668_v3 = vpop.f32.mrf.mxu0 }
  0xde   :  { %v669_v8 = vadd.f32 %v668_v3, %v308_v54  ;;  %v714_v54 = vmul.f32 188.0, %v5274_v40 }
  0xdf   :  { %v699_v5 = vadd.f32 %v698_v2, %v5325_v1 }
  0xe1   :  { %700 = vadd.xlane.f32.xlu2 %v699_v5 }
  0xe4   :  { %v687_v14 = vpop.f32.mrf.mxu2 }
  0xe5   :  { %v5338_v19 = vadd.f32 %v687_v14, %v669_v8  ;;  %v670_v25 = vpop.f32.mrf.mxu0 }
  0xe6   :  { %v671_v29 = vadd.f32 %v670_v25, %v313_v9 }
  0xe7   :  { %v704_v23 = vadd.f32 %v703_v18, %v5338_v19 }
  0xe9   :  { %705 = vadd.xlane.f32.xlu0 %v704_v23 }
  0xec   :  { %v689_v13 = vpop.f32.mrf.mxu2 }
  0xed   :  { %v5350_v30 = vadd.f32 %v689_v13, %v671_v29 }
  0xef   :  { %v709_v24 = vadd.f32 %v708_v31, %v5350_v30 }
  0xf1   :  { %710 = vadd.xlane.f32.xlu1 %v709_v24 }
 0x14c   :  { %v696_v43 = vpop.xlane.xlu2 %695 }
 0x14d   :  { %v716_v44 = vsub.f32 %v696_v43, %v712_v41 }
 0x14f   :  { %v5358_v46 = vmul.f32 %v5355_v42, %v716_v44 }
 0x151   :  { %733 = vperm.xlu2 %4920, %v5358_v46  }
 0x154   :  { %v701_v49 = vpop.xlane.xlu2 %700 }
 0x155   :  { %v717_v50 = vsub.f32 %v701_v49, %v713_v47 }
 0x157   :  { %v5363_v52 = vmul.f32 %v5355_v42, %v717_v50 }
 0x159   :  { %738 = vperm.xlu2 %4920, %v5363_v52  }
 0x15c   :  { %v706_v55 = vpop.xlane.xlu0 %705 }
 0x15d   :  { %v718_v58 = vsub.f32 %v706_v55, %v714_v54  ;;  %v803_v54 = vsub.f32 %v5258_v21, %v5358_v46 }
 0x15f   :  { %v5368_v59 = vmul.f32 %v5355_v42, %v718_v58  ;;  %v807_v55 = vmul.f32 %v803_v54, %v803_v54  ;;  %v147_v54 = vld [vmem:[%s6760_s4 + $0x40] sm:$0xff] }
 0x161   :  { %743 = vperm.xlu2 %4920, %v5368_v59   ;;  %v811_v58 = vmul.f32 188.0, %v807_v55 }
 0x164   :  { %v711_v61 = vpop.xlane.xlu1 %710 }
 0x165   :  { %v719_v62 = vsub.f32 %v711_v61, %v715_v60  ;;  %v804_v60 = vsub.f32 %v5280_v45, %v5363_v52 }
 0x167   :  { %v5373_v63 = vmul.f32 %v5355_v42, %v719_v62 }
 0x169   :  { %748 = vperm.xlu2 %4920, %v5373_v63   ;;  %v806_v52 = vsub.f32 %v5286_v53, %v5373_v63 }
 0x1ab   :  { %v734_v0 = vpop.permute.xlu2 %733 }
 0x1ac   :  { %v5377_v2 = vsub.f32 %v5307_v36, %v734_v0  ;;  %v5380_v3 = vsub.f32 %v5305_v35, %v734_v0  ;;  %v5383_v5 = vsub.f32 %v5309_v37, %v734_v0  ;;  %v5386_v8 = vsub.f32 %v5313_v48, %v734_v0 }
 0x1ae   :  { %v767_v9 = vmul.f32 %v5377_v2, %v5377_v2  ;;  %v768_v10 = vmul.f32 %v5380_v3, %v5380_v3  ;;  %v769_v11 = vmul.f32 %v5383_v5, %v5383_v5  ;;  %v770_v35 = vmul.f32 %v5386_v8, %v5386_v8 }
 0x1b0   :  { %v783_v36 = vadd.f32 %v768_v10, %v767_v9  ;;  %v808_v9 = vmul.f32 %v804_v60, %v804_v60 }
 0x1b2   :  { %v784_v12 = vadd.f32 %v783_v36, %v769_v11  ;;  %v812_v11 = vmul.f32 188.0, %v808_v9  ;;  %v805_v36 = vsub.f32 %v5274_v40, %v5368_v59  ;;  %v810_v40 = vmul.f32 %v806_v52, %v806_v52 }
 0x1b3   :  { %v739_v14 = vpop.permute.xlu2 %738 }
 0x1b4   :  { %v5397_v37 = vsub.f32 %v5319_v56, %v739_v14  ;;  %v5400_v48 = vsub.f32 %v5316_v51, %v739_v14  ;;  %v5403_v15 = vsub.f32 %v5321_v57, %v739_v14  ;;  %v785_v18 = vadd.f32 %v784_v12, %v770_v35 }
 0x1b5   :  { %v5406_v17 = vsub.f32 %v5325_v1, %v739_v14  ;;  %v809_v46 = vmul.f32 %v805_v36, %v805_v36  ;;  %v814_v53 = vmul.f32 188.0, %v810_v40 }
 0x1b6   :  { %786 = vadd.xlane.f32.xlu0 %v785_v18  ;;  %v771_v22 = vmul.f32 %v5397_v37, %v5397_v37  ;;  %v772_v23 = vmul.f32 %v5400_v48, %v5400_v48  ;;  %v773_v56 = vmul.f32 %v5403_v15, %v5403_v15 }
 0x1b7   :  { %v774_v51 = vmul.f32 %v5406_v17, %v5406_v17  ;;  %v813_v45 = vmul.f32 188.0, %v809_v46  ;;  %v146_v46 = vld [vmem:[%s6760_s4 + $0x38] sm:$0xff] }
 0x1b8   :  { %v788_v25 = vadd.f32 %v772_v23, %v771_v22 }
 0x1ba   :  { %v789_v57 = vadd.f32 %v788_v25, %v773_v56 }
 0x1bb   :  { %v744_v29 = vpop.permute.xlu2 %743 }
 0x1bc   :  { %v5417_v26 = vsub.f32 %v5331_v6, %v744_v29  ;;  %v5420_v1 = vsub.f32 %v5328_v4, %v744_v29  ;;  %v5423_v13 = vsub.f32 %v5333_v7, %v744_v29  ;;  %v790_v31 = vadd.f32 %v789_v57, %v774_v51 }
 0x1bd   :  { %v5426_v24 = vsub.f32 %v5338_v19, %v744_v29 }
 0x1be   :  { %791 = vadd.xlane.f32.xlu1 %v790_v31  ;;  %v775_v32 = vmul.f32 %v5417_v26, %v5417_v26  ;;  %v776_v33 = vmul.f32 %v5420_v1, %v5420_v1  ;;  %v777_v6 = vmul.f32 %v5423_v13, %v5423_v13 }
 0x1bf   :  { %v778_v4 = vmul.f32 %v5426_v24, %v5426_v24 }
 0x1c0   :  { %v793_v20 = vadd.f32 %v776_v33, %v775_v32  ;;  %v143_v33 = vld [vmem:[%s6760_s4 + $0x20] sm:$0xff] }
 0x1c2   :  { %v794_v7 = vadd.f32 %v793_v20, %v777_v6 }
 0x1c3   :  { %v749_v34 = vpop.permute.xlu2 %748 }
 0x1c4   :  { %v5437_v38 = vsub.f32 %v5344_v28, %v749_v34  ;;  %v5440_v19 = vsub.f32 %v5340_v16, %v749_v34  ;;  %v5443_v39 = vsub.f32 %v5346_v27, %v749_v34  ;;  %v795_v41 = vadd.f32 %v794_v7, %v778_v4 }
 0x1c5   :  { %v5446_v43 = vsub.f32 %v5350_v30, %v749_v34  ;;  %v149_v30 = vld [vmem:[%s6760_s4 + $0x50] sm:$0xff] }
 0x1c6   :  { %796 = vadd.xlane.f32.xlu2 %v795_v41  ;;  %v779_v44 = vmul.f32 %v5437_v38, %v5437_v38  ;;  %v780_v47 = vmul.f32 %v5440_v19, %v5440_v19  ;;  %v781_v28 = vmul.f32 %v5443_v39, %v5443_v39 }
 0x1c7   :  { %v782_v16 = vmul.f32 %v5446_v43, %v5446_v43 }
 0x1c8   :  { %v798_v49 = vadd.f32 %v780_v47, %v779_v44 }
 0x1ca   :  { %v799_v27 = vadd.f32 %v798_v49, %v781_v28 }
 0x1cc   :  { %v800_v50 = vadd.f32 %v799_v27, %v782_v16  ;;  %v144_v27 = vld [vmem:[%s6760_s4 + $0x28] sm:$0xff] }
 0x1ce   :  { %801 = vadd.xlane.f32.xlu0 %v800_v50 }
 0x1de   :  { %919 = vperm.xlu2 %4920, %v149_v30  }
 0x229   :  { %v787_v61 = vpop.xlane.xlu0 %786 }
 0x22a   :  { %v815_v62 = vsub.f32 %v787_v61, %v811_v58 }
 0x22c   :  { %v819_v0 = vmul.f32 %v815_v62, %v5355_v42 }
 0x22e   :  { %v823_v10 = vadd.f32 1e-05, %v819_v0  ;;  %v145_v0 = vld [vmem:[%s6760_s4 + $0x30] sm:$0xff] }
 0x230   :  { %5023 = vrsqrt.f32 %v823_v10  ;;  %vm833_vm3 = vweird.f32 %v823_v10 }
 0x231   :  { %v792_v35 = vpop.xlane.xlu1 %791 }
 0x232   :  { %v816_v12 = vsub.f32 %v792_v35, %v812_v11  ;;  %v148_v11 = vld [vmem:[%s6760_s4 + $0x48] sm:$0xff] }
 0x234   :  { %v820_v21 = vmul.f32 %v816_v12, %v5355_v42 }
 0x236   :  { %v5024_v14 = vpop.eup %5023  ;;  %v824_v18 = vadd.f32 1e-05, %v820_v21 }
 0x237   :  { %v828_v22 = vmul.f32 %v5024_v14, %v823_v10  ;;  %vm834_vm2 = vweird.f32 %v5024_v14 }
 0x238   :  { %5025 = vrsqrt.f32 %v824_v18  ;;  %vm835_vm4 = vmor %vm833_vm3, %vm834_vm2  ;;  %vm843_vm6 = vweird.f32 %v824_v18  ;;  %vm2030_vm2 = vcmask 1022976   ;;  %vm2051_vm3 = vcmask 1014784  }
 0x239   :  { %v829_v23 = vmul.f32 %v5024_v14, %v828_v22  ;;  %v797_v56 = vpop.xlane.xlu2 %796  ;;  %v150_v22 = vld [vmem:[%s6760_s4 + $0x58] sm:$0xff]  ;;  %s5144_s4 = smov 127  }
 0x23a   :  { %v817_v25 = vsub.f32 %v797_v56, %v813_v45 }
 0x23b   :  { %v830_v51 = vmul.f32 0.5, %v829_v23 }
 0x23c   :  { %v821_v57 = vmul.f32 %v817_v25, %v5355_v42 }
 0x23d   :  { %v831_v59 = vsub.f32 1.5, %v830_v51 }
 0x23e   :  { %v5026_v29 = vpop.eup %5025  ;;  %v825_v31 = vadd.f32 1e-05, %v821_v57 }
 0x23f   :  { %v838_v32 = vmul.f32 %v5026_v29, %v824_v18  ;;  %v832_v6 = vmul.f32 %v5024_v14, %v831_v59  ;;  %vm844_vm5 = vweird.f32 %v5026_v29 }
 0x240   :  { %5027 = vrsqrt.f32 %v825_v31  ;;  %vm845_vm7 = vmor %vm843_vm6, %vm844_vm5  ;;  %vm853_vm9 = vweird.f32 %v825_v31 }
 0x241   :  { %v839_v63 = vmul.f32 %v5026_v29, %v838_v32  ;;  %v802_v20 = vpop.xlane.xlu0 %801  ;;  %v836_v4 = vsel %vm835_vm4, %v5024_v14, %v832_v6 }
 0x242   :  { %v818_v7 = vsub.f32 %v802_v20, %v814_v53  ;;  %v867_v34 = vmul.f32 %v836_v4, %v143_v33 }
 0x243   :  { %v840_v41 = vmul.f32 0.5, %v839_v63 }
 0x244   :  { %v822_v44 = vmul.f32 %v818_v7, %v5355_v42  ;;  %873 = vperm.xlu1 %4919, %v867_v34  }
 0x245   :  { %v841_v47 = vsub.f32 1.5, %v840_v41 }
 0x246   :  { %v5028_v28 = vpop.eup %5027  ;;  %v826_v49 = vadd.f32 1e-05, %v822_v44 }
 0x247   :  { %v848_v16 = vmul.f32 %v5028_v28, %v825_v31  ;;  %v842_v50 = vmul.f32 %v5026_v29, %v841_v47  ;;  %vm854_vm8 = vweird.f32 %v5028_v28 }
 0x248   :  { %5029 = vrsqrt.f32 %v826_v49  ;;  %vm855_vm10 = vmor %vm853_vm9, %vm854_vm8  ;;  %vm863_vm12 = vweird.f32 %v826_v49 }
 0x249   :  { %v849_v30 = vmul.f32 %v5028_v28, %v848_v16  ;;  %v846_v42 = vsel %vm845_vm7, %v5026_v29, %v842_v50 }
 0x24a   :  { %v868_v55 = vmul.f32 %v846_v42, %v144_v27 }
 0x24b   :  { %v850_v58 = vmul.f32 0.5, %v849_v30 }
 0x24c   :  { %909 = vperm.xlu1 %4919, %v147_v54   ;;  %878 = vperm.xlu0 %4918, %v868_v55  }
 0x24d   :  { %v851_v60 = vsub.f32 1.5, %v850_v58 }
 0x24e   :  { %v5030_v61 = vpop.eup %5029 }
 0x24f   :  { %v858_v62 = vmul.f32 %v5030_v61, %v826_v49  ;;  %v852_v9 = vmul.f32 %v5028_v28, %v851_v60  ;;  %vm864_vm11 = vweird.f32 %v5030_v61 }
 0x250   :  { %vm865_vm13 = vmor %vm863_vm12, %vm864_vm11 }
 0x251   :  { %v859_v10 = vmul.f32 %v5030_v61, %v858_v62  ;;  %v856_v36 = vsel %vm855_vm10, %v5028_v28, %v852_v9  ;;  %v920_v28 = vpop.permute.xlu2 %919 }
 0x252   :  { %v869_v35 = vmul.f32 %v856_v36, %v145_v0 }
 0x253   :  { %v860_v12 = vmul.f32 0.5, %v859_v10 }
 0x254   :  { %914 = vperm.xlu0 %4918, %v148_v11   ;;  %883 = vperm.xlu1 %4919, %v869_v35  }
 0x255   :  { %v861_v21 = vsub.f32 1.5, %v860_v12 }
 0x257   :  { %v862_v14 = vmul.f32 %v5030_v61, %v861_v21 }
 0x259   :  { %v866_v18 = vsel %vm865_vm13, %v5030_v61, %v862_v14  ;;  %v4760_v14 = vld [vmem:[#allocation4 + $0x170] sm:$0xf0] }
 0x25a   :  { %v870_v45 = vmul.f32 %v866_v18, %v146_v46  ;;  %v4132_v46 = vld [vmem:[#allocation4 + $0x168] sm:$0xf] }
 0x25c   :  { %888 = vperm.xlu0 %4918, %v870_v45   ;;  %924 = vperm.xlu1 %4919, %v150_v22   ;;  %v4133_v22 = vor.u32 %v4760_v14, %v4132_v46  ;;  %v4072_v14 = vld [vmem:[#allocation4 + $0xf0] sm:$0xf] }
 0x25e   :  { %1729 = vmatpush.bf16.msra.mxu3 %v4133_v22  ;;  %v4312_v22 = vld [vmem:[#allocation4 + $0x2d0] sm:$0xf] }
 0x2b6   :  { %v874_v52 = vpop.permute.xlu1 %873 }
 0x2b7   :  { %v891_v23 = vmul.f32 %v874_v52, %v5377_v2  ;;  %v892_v56 = vmul.f32 %v874_v52, %v5380_v3  ;;  %v893_v25 = vmul.f32 %v874_v52, %v5383_v5  ;;  %v894_v51 = vmul.f32 %v874_v52, %v5386_v8 }
 0x2be   :  { %v910_v57 = vpop.permute.xlu1 %909  ;;  %v879_v40 = vpop.permute.xlu0 %878 }
 0x2bf   :  { %v5496_v59 = vadd.f32 %v910_v57, %v891_v23  ;;  %v5498_v29 = vadd.f32 %v910_v57, %v892_v56  ;;  %v5500_v31 = vadd.f32 %v910_v57, %v893_v25  ;;  %v5502_v32 = vadd.f32 %v910_v57, %v894_v51  ;;  %v4120_v25 = vld [vmem:[#allocation4 + $0x150] sm:$0xf]  ;;  %v4757_v51 = vld [vmem:[#allocation4 + $0x158] sm:$0xf0] }
 0x2c0   :  { %v895_v8 = vmul.f32 %v879_v40, %v5397_v37  ;;  %v896_v6 = vmul.f32 %v879_v40, %v5400_v48  ;;  %v897_v53 = vmul.f32 %v879_v40, %v5403_v15  ;;  %v898_v63 = vmul.f32 %v879_v40, %v5406_v17  ;;  %v4108_v40 = vld [vmem:[#allocation4 + $0x138] sm:$0xf] }
 0x2c1   :  { %v943_v33 = vmax.f32 %v5496_v59, 0.0  ;;  %v944_v2 = vmax.f32 %v5498_v29, 0.0  ;;  %v945_v3 = vmax.f32 %v5500_v31, 0.0  ;;  %v946_v5 = vmax.f32 %v5502_v32, 0.0 }
 0x2c2   :  { %v4121_v57 = vor.u32 %v4757_v51, %v4120_v25 }
 0x2c4   :  { %1730 = vmatpush.bf16.msra.mxu3 %v4121_v57  ;;  %v4012_v57 = vld [vmem:[#allocation4 + $0x78] sm:$0xf] }
 0x2c6   :  { %v915_v20 = vpop.permute.xlu0 %914  ;;  %v884_v4 = vpop.permute.xlu1 %883 }
 0x2c7   :  { %v5512_v7 = vadd.f32 %v915_v20, %v895_v8  ;;  %v5514_v34 = vadd.f32 %v915_v20, %v896_v6  ;;  %v5516_v41 = vadd.f32 %v915_v20, %v897_v53  ;;  %v5518_v44 = vadd.f32 %v915_v20, %v898_v63  ;;  %v4754_v8 = vld [vmem:[#allocation4 + $0x140] sm:$0xf0]  ;;  %v4096_v53 = vld [vmem:[#allocation4 + $0x120] sm:$0xf]  ;;  %v4751_v63 = vld [vmem:[#allocation4 + $0x128] sm:$0xf0] }
 0x2c8   :  { %v899_v47 = vmul.f32 %v884_v4, %v5417_v26  ;;  %v900_v37 = vmul.f32 %v884_v4, %v5420_v1  ;;  %v901_v48 = vmul.f32 %v884_v4, %v5423_v13  ;;  %v902_v15 = vmul.f32 %v884_v4, %v5426_v24  ;;  %v4036_v4 = vld [vmem:[#allocation4 + $0xa8] sm:$0xf] }
 0x2c9   :  { %v947_v17 = vmax.f32 %v5512_v7, 0.0  ;;  %v948_v49 = vmax.f32 %v5514_v34, 0.0  ;;  %v949_v16 = vmax.f32 %v5516_v41, 0.0  ;;  %v950_v27 = vmax.f32 %v5518_v44, 0.0  ;;  %v4801_v34 = vld [vmem:[#allocation4 + $0x2bc] sm:$0xf] }
 0x2ca   :  { %v5528_v50 = vadd.f32 %v920_v28, %v899_v47  ;;  %v5530_v30 = vadd.f32 %v920_v28, %v900_v37  ;;  %v5532_v26 = vadd.f32 %v920_v28, %v901_v48  ;;  %v5534_v1 = vadd.f32 %v920_v28, %v902_v15  ;;  %v4736_v47 = vld [vmem:[#allocation4 + $0xb0] sm:$0xf0]  ;;  %v4084_v37 = vld [vmem:[#allocation4 + $0x108] sm:$0xf] }
 0x2cb   :  { %v4921_v13 = vpack.i.bf16 %v945_v3, %v944_v2  ;;  %v4931_v10 = vpack.i.bf16 %v949_v16, %v948_v49  ;;  %v4941_v45 = vpack.i.bf16 %v947_v17, %v943_v33  ;;  %v4946_v52 = vpack.i.bf16 %v950_v27, %v946_v5  ;;  %v4748_v15 = vld [vmem:[#allocation4 + $0x110] sm:$0xf0]  ;;  %v4324_v28 = vld [vmem:[#allocation4 + $0x2e8] sm:$0xf] }
 0x2cc   :  { %v6776_v24 = vmax.f32 %v5528_v50, 0.0  ;;  %v952_v54 = vmax.f32 %v5530_v30, 0.0  ;;  %v6772_v42 = vmax.f32 %v5532_v26, 0.0  ;;  %v6773_v55 = vmax.f32 %v5534_v1, 0.0 }
 0x2cd   :  { %4922 = vrot.lane.b32.xlu0 %v4921_v13, %s5144_s4  ;;  %4932 = vrot.lane.b32.xlu1 %v4931_v10, %s5144_s4  ;;  %v4109_v6 = vor.u32 %v4754_v8, %v4108_v40  ;;  %v4097_v20 = vor.u32 %v4751_v63, %v4096_v53  ;;  %v4037_v48 = vor.u32 %v4736_v47, %v4036_v4  ;;  %v4730_v40 = vld [vmem:[#allocation4 + $0x80] sm:$0xf0]  ;;  %v4060_v8 = vld [vmem:[#allocation4 + $0xd8] sm:$0xf] }
 0x2ce   :  { %v889_v58 = vpop.permute.xlu0 %888  ;;  %v925_v9 = vpop.permute.xlu1 %924  ;;  %v4951_v18 = vpack.i.bf16 %v6772_v42, %v952_v54  ;;  %v4742_v53 = vld [vmem:[#allocation4 + $0xe0] sm:$0xf0]  ;;  %v4300_v63 = vld [vmem:[#allocation4 + $0x2b8] sm:$0xf] }
 0x2cf   :  { %v903_v60 = vmul.f32 %v889_v58, %v5437_v38  ;;  %v904_v61 = vmul.f32 %v889_v58, %v5440_v19  ;;  %v905_v62 = vmul.f32 %v889_v58, %v5443_v39  ;;  %v906_v0 = vmul.f32 %v889_v58, %v5446_v43  ;;  %1731 = vmatpush.bf16.msra.mxu3 %v4109_v6 }
 0x2d0   :  { %v4085_v58 = vor.u32 %v4748_v15, %v4084_v37  ;;  %1710 = vmatpush.bf16.msra.mxu1 %v4037_v48  ;;  %v4013_v6 = vor.u32 %v4730_v40, %v4012_v57  ;;  %v4061_v4 = vor.u32 %v4742_v53, %v4060_v8  ;;  %v4204_v37 = vld [vmem:[#allocation4 + $0x1f8] sm:$0xf]  ;;  %v4778_v48 = vld [vmem:[#allocation4 + $0x200] sm:$0xf0]  ;;  %v4180_v40 = vld [vmem:[#allocation4 + $0x1c8] sm:$0xf] }
 0x2d1   :  { %v5553_v11 = vadd.f32 %v925_v9, %v903_v60  ;;  %v5555_v36 = vadd.f32 %v925_v9, %v904_v61  ;;  %v5557_v35 = vadd.f32 %v925_v9, %v905_v62  ;;  %v5559_v12 = vadd.f32 %v925_v9, %v906_v0  ;;  %v4228_v61 = vld [vmem:[#allocation4 + $0x228] sm:$0xf]  ;;  %v4784_v62 = vld [vmem:[#allocation4 + $0x230] sm:$0xf0]  ;;  %v3976_v53 = vld [vmem:[#allocation4 + $0x30] sm:$0xf] }
 0x2d2   :  { %v4229_v0 = vor.u32 %v4784_v62, %v4228_v61  ;;  %v4205_v15 = vor.u32 %v4778_v48, %v4204_v37  ;;  %v4739_v61 = vld [vmem:[#allocation4 + $0xc8] sm:$0xf0]  ;;  %v4288_v62 = vld [vmem:[#allocation4 + $0x2a0] sm:$0xf]  ;;  %v4772_v8 = vld [vmem:[#allocation4 + $0x1d0] sm:$0xf0] }
 0x2d3   :  { %v6774_v38 = vmax.f32 %v5553_v11, 0.0  ;;  %v956_v19 = vmax.f32 %v5555_v36, 0.0  ;;  %v6771_v39 = vmax.f32 %v5557_v35, 0.0  ;;  %v6775_v43 = vmax.f32 %v5559_v12, 0.0  ;;  %1732 = vmatpush.bf16.msra.mxu3 %v4097_v20  ;;  %v4802_v20 = vld [vmem:[#allocation4 + $0x2c0] sm:$0xf0] }
 0x2d4   :  { %1748 = vmatpush.bf16.msra.mxu0 %v4229_v0  ;;  %v4301_v47 = vor.u32 %v4802_v20, %v4300_v63  ;;  %v4799_v0 = vld [vmem:[#allocation4 + $0x2a8] sm:$0xf0]  ;;  %v4721_v63 = vld [vmem:[#allocation4 + $0x38] sm:$0xf0]  ;;  %v4756_v20 = vld [vmem:[#allocation4 + $0x154] sm:$0xf] }
 0x2d5   :  { %4927 = vrot.lane.b32.xlu0 %v4921_v13, %s5145_s10  ;;  %v4966_v21 = vpack.i.bf16 %v6771_v39, %v956_v19  ;;  %4937 = vrot.lane.b32.xlu1 %v4931_v10, %s5145_s10  ;;  %v4981_v23 = vpack.i.bf16 %v6774_v38, %v6776_v24  ;;  %v4986_v56 = vpack.i.bf16 %v6775_v43, %v6773_v55  ;;  %v4808_v13 = vld [vmem:[#allocation4 + $0x2f0] sm:$0x70]  ;;  %v4024_v10 = vld [vmem:[#allocation4 + $0x90] sm:$0xf]  ;;  %v4793_v48 = vld [vmem:[#allocation4 + $0x278] sm:$0xf0] }
 0x2d6   :  { %v4325_v60 = vor.u32 %v4808_v13, %v4324_v28  ;;  %v4000_v28 = vld [vmem:[#allocation4 + $0x60] sm:$0xf]  ;;  %v4727_v13 = vld [vmem:[#allocation4 + $0x68] sm:$0xf0]  ;;  %v4264_v37 = vld [vmem:[#allocation4 + $0x270] sm:$0xf] }
 0x2d7   :  { %4967 = vrot.lane.b32.xlu2 %v4966_v21, %s5144_s4  ;;  %1733 = vmatpush.bf16.msra.mxu3 %v4085_v58  ;;  %v4048_v58 = vld [vmem:[#allocation4 + $0xc0] sm:$0xf]  ;;  %v4002_v43 = vld [vmem:[#allocation4 + $0x6c] sm:$0xf0]  ;;  %v4795_v36 = vld [vmem:[#allocation4 + $0x28c] sm:$0xf] }
 0x2d8   :  { %v1702_v9 = vsel %vm1700_vm14, %v4325_v60, 0  ;;  %v4001_v60 = vor.u32 %v4727_v13, %v4000_v28  ;;  %v4265_v28 = vor.u32 %v4793_v48, %v4264_v37  ;;  %v4168_v13 = vld [vmem:[#allocation4 + $0x1b0] sm:$0xf]  ;;  %v4763_v37 = vld [vmem:[#allocation4 + $0x188] sm:$0xf0] }
 0x2d9   :  { %1767 = vmatpush.bf16.msra.mxu2 %v1702_v9  ;;  %v4049_v9 = vor.u32 %v4739_v61, %v4048_v58  ;;  %v4769_v58 = vld [vmem:[#allocation4 + $0x1b8] sm:$0xf0]  ;;  %v3964_v61 = vld [vmem:[#allocation4 + $0x18] sm:$0xf] }
 0x2dd   :  { %4952 = vrot.lane.b32.xlu0 %v4951_v18, %s5144_s4  ;;  %4942 = vrot.lane.b32.xlu1 %v4941_v45, %s5144_s4 }
 0x2df   :  { %4972 = vrot.lane.b32.xlu2 %v4966_v21, %s5145_s10  ;;  %v4733_v21 = vld [vmem:[#allocation4 + $0x98] sm:$0xf0] }
 0x2e0   :  { %v4025_v46 = vor.u32 %v4733_v21, %v4024_v10  ;;  %v4289_v10 = vor.u32 %v4799_v0, %v4288_v62  ;;  %v4192_v21 = vld [vmem:[#allocation4 + $0x1e0] sm:$0xf]  ;;  %v4718_v62 = vld [vmem:[#allocation4 + $0x20] sm:$0xf0]  ;;  %v4753_v0 = vld [vmem:[#allocation4 + $0x13c] sm:$0xf] }
 0x2e2   :  { %1711 = vmatpush.bf16.msra.mxu1 %v4025_v46  ;;  %v4775_v46 = vld [vmem:[#allocation4 + $0x1e8] sm:$0xf0] }
 0x2e5   :  { %4957 = vrot.lane.b32.xlu0 %v4951_v18, %s5145_s10  ;;  %4947 = vrot.lane.b32.xlu1 %v4946_v52, %s5144_s4  ;;  %v4745_v18 = vld [vmem:[#allocation4 + $0xf8] sm:$0xf0] }
 0x2e6   :  { %1712 = vmatpush.bf16.msra.mxu1 %v4013_v6  ;;  %v4181_v6 = vor.u32 %v4772_v8, %v4180_v40  ;;  %v4098_v8 = vld [vmem:[#allocation4 + $0x12c] sm:$0xf0] }
 0x2e7   :  { %4977 = vrot.lane.b32.xlu2 %v4946_v52, %s5145_s10  ;;  %v4805_v52 = vld [vmem:[#allocation4 + $0x2d8] sm:$0xf0] }
 0x2e8   :  { %v4313_v25 = vor.u32 %v4805_v52, %v4312_v22  ;;  %v4724_v22 = vld [vmem:[#allocation4 + $0x50] sm:$0xf0] }
 0x2ea   :  { %1768 = vmatpush.bf16.msra.mxu2 %v4313_v25  ;;  %1713 = vmatpush.bf16.msra.mxu1 %v4001_v60  ;;  %v4796_v25 = vld [vmem:[#allocation4 + $0x290] sm:$0xf0]  ;;  %v4169_v60 = vor.u32 %v4769_v58, %v4168_v13  ;;  %v4038_v13 = vld [vmem:[#allocation4 + $0xb4] sm:$0xf0]  ;;  %v4747_v58 = vld [vmem:[#allocation4 + $0x10c] sm:$0xf] }
 0x2ed   :  { %4962 = vrot.lane.b32.xlu0 %v4941_v45, %s5145_s10  ;;  %4982 = vrot.lane.b32.xlu1 %v4981_v23, %s5144_s4  ;;  %v4073_v45 = vor.u32 %v4745_v18, %v4072_v14  ;;  %v4193_v14 = vor.u32 %v4775_v46, %v4192_v21  ;;  %v3988_v18 = vld [vmem:[#allocation4 + $0x48] sm:$0xf]  ;;  %v4252_v46 = vld [vmem:[#allocation4 + $0x258] sm:$0xf] }
 0x2ee   :  { %1769 = vmatpush.bf16.msra.mxu2 %v4301_v47  ;;  %v3989_v52 = vor.u32 %v4724_v22, %v3988_v18  ;;  %v4122_v47 = vld [vmem:[#allocation4 + $0x15c] sm:$0xf0]  ;;  %v4110_v21 = vld [vmem:[#allocation4 + $0x144] sm:$0xf0]  ;;  %v4156_v22 = vld [vmem:[#allocation4 + $0x198] sm:$0xf] }
 0x2ef   :  { %4992 = vrot.lane.b32.xlu2 %v4981_v23, %s5145_s10  ;;  %v4216_v23 = vld [vmem:[#allocation4 + $0x210] sm:$0xf]  ;;  %1734 = vmatpush.bf16.msra.mxu3 %v4073_v45  ;;  %v4759_v45 = vld [vmem:[#allocation4 + $0x16c] sm:$0xf]  ;;  %v4113_v18 = vor.u32 %v4753_v0, %v4110_v21  ;;  %v4086_v21 = vld [vmem:[#allocation4 + $0x114] sm:$0xf0] }
 0x2f0   :  { %1714 = vmatpush.bf16.msra.mxu1 %v3989_v52 }
 0x2f2   :  { %1770 = vmatpush.bf16.msra.mxu2 %v4289_v10  ;;  %v3965_v10 = vor.u32 %v4718_v62, %v3964_v61 }
 0x2f3   :  { %1735 = vmatpush.bf16.msra.mxu3 %v4061_v4  ;;  %v3977_v4 = vor.u32 %v4721_v63, %v3976_v53  ;;  %v4787_v53 = vld [vmem:[#allocation4 + $0x248] sm:$0xf0] }
 0x2f5   :  { %4987 = vrot.lane.b32.xlu0 %v4986_v56, %s5144_s4  ;;  %4997 = vrot.lane.b32.xlu1 %v4986_v56, %s5145_s10  ;;  %v4781_v56 = vld [vmem:[#allocation4 + $0x218] sm:$0xf0] }
 0x2f6   :  { %v4217_v51 = vor.u32 %v4781_v56, %v4216_v23  ;;  %v4134_v23 = vld [vmem:[#allocation4 + $0x174] sm:$0xf0]  ;;  %v4276_v56 = vld [vmem:[#allocation4 + $0x288] sm:$0xf]  ;;  %1715 = vmatpush.bf16.msra.mxu1 %v3977_v4 }
 0x2f7   :  { %1736 = vmatpush.bf16.msra.mxu3 %v4049_v9  ;;  %v4277_v57 = vor.u32 %v4796_v25, %v4276_v56  ;;  %v3952_v25 = vld [vmem:[#allocation4] sm:$0xf] }
 0x2f8   :  { %1749 = vmatpush.bf16.msra.mxu0 %v4217_v51  ;;  %v4137_v51 = vor.u32 %v4759_v45, %v4134_v23  ;;  %v4766_v45 = vld [vmem:[#allocation4 + $0x1a0] sm:$0xf0] }
 0x2f9   :  { %1771 = vmatpush.bf16.msra.mxu2 %v4277_v57  ;;  %v4157_v56 = vor.u32 %v4766_v45, %v4156_v22  ;;  %v4750_v57 = vld [vmem:[#allocation4 + $0x124] sm:$0xf]  ;;  %v4089_v45 = vor.u32 %v4747_v58, %v4086_v21  ;;  %v4780_v21 = vld [vmem:[#allocation4 + $0x214] sm:$0xf] }
 0x2fa   :  { %1716 = vmatpush.bf16.msra.mxu1 %v3965_v10 }
 0x2fb   :  { %1805 = vmatpush.bf16.msrb.mxu3 %v4137_v51  ;;  %v4715_v51 = vld [vmem:[#allocation4 + $0x8] sm:$0xf0] }
 0x2fc   :  { %1750 = vmatpush.bf16.msra.mxu0 %v4205_v15  ;;  %v4125_v15 = vor.u32 %v4756_v20, %v4122_v47  ;;  %v3953_v40 = vor.u32 %v4715_v51, %v3952_v25  ;;  %v4101_v20 = vor.u32 %v4750_v57, %v4098_v8  ;;  %v4144_v47 = vld [vmem:[#allocation4 + $0x180] sm:$0xf]  ;;  %v4732_v57 = vld [vmem:[#allocation4 + $0x94] sm:$0xf] }
 0x2fd   :  { %1772 = vmatpush.bf16.msra.mxu2 %v4265_v28  ;;  %v4145_v48 = vor.u32 %v4763_v37, %v4144_v47  ;;  %v4735_v28 = vld [vmem:[#allocation4 + $0xac] sm:$0xf]  ;;  %v4744_v8 = vld [vmem:[#allocation4 + $0xf4] sm:$0xf]  ;;  %v4074_v37 = vld [vmem:[#allocation4 + $0xfc] sm:$0xf0] }
 0x2fe   :  { %1717 = vmatpush.bf16.msra.mxu1 %v3953_v40  ;;  %v4041_v10 = vor.u32 %v4735_v28, %v4038_v13  ;;  %v4026_v40 = vld [vmem:[#allocation4 + $0x9c] sm:$0xf0]  ;;  %v4077_v58 = vor.u32 %v4744_v8, %v4074_v37  ;;  %v4741_v8 = vld [vmem:[#allocation4 + $0xdc] sm:$0xf] }
 0x2ff   :  { %1806 = vmatpush.bf16.msrb.mxu3 %v4125_v15  ;;  %v4029_v47 = vor.u32 %v4732_v57, %v4026_v40  ;;  %v4729_v57 = vld [vmem:[#allocation4 + $0x7c] sm:$0xf]  ;;  %v4014_v40 = vld [vmem:[#allocation4 + $0x84] sm:$0xf0] }
 0x300   :  { %1751 = vmatpush.bf16.msra.mxu0 %v4193_v14  ;;  %v4790_v14 = vld [vmem:[#allocation4 + $0x260] sm:$0xf0]  ;;  %v4017_v29 = vor.u32 %v4729_v57, %v4014_v40  ;;  %v4050_v57 = vld [vmem:[#allocation4 + $0xcc] sm:$0xf0] }
 0x301   :  { %v4253_v23 = vor.u32 %v4790_v14, %v4252_v46  ;;  %v4807_v46 = vld [vmem:[#allocation4 + $0x2ec] sm:$0xf]  ;;  %v4326_v14 = vld [vmem:[#allocation4 + $0x2f4] sm:$0x70] }
 0x302   :  { %1786 = vmatpush.bf16.msrb.mxu1 %v4041_v10  ;;  %v4329_v25 = vor.u32 %v4807_v46, %v4326_v14  ;;  %v4314_v10 = vld [vmem:[#allocation4 + $0x2dc] sm:$0xf0] }
 0x303   :  { %1807 = vmatpush.bf16.msrb.mxu3 %v4113_v18  ;;  %1773 = vmatpush.bf16.msra.mxu2 %v4253_v23  ;;  %v4783_v23 = vld [vmem:[#allocation4 + $0x22c] sm:$0xf]  ;;  %v4218_v46 = vld [vmem:[#allocation4 + $0x21c] sm:$0xf0] }
 0x304   :  { %1752 = vmatpush.bf16.msra.mxu0 %v4181_v6  ;;  %v4240_v6 = vld [vmem:[#allocation4 + $0x240] sm:$0xf] }
 0x305   :  { %v4241_v4 = vor.u32 %v4787_v53, %v4240_v6 }
 0x306   :  { %1787 = vmatpush.bf16.msrb.mxu1 %v4029_v47 }
 0x307   :  { %1808 = vmatpush.bf16.msrb.mxu3 %v4101_v20  ;;  %1774 = vmatpush.bf16.msra.mxu2 %v4241_v4  ;;  %v1705_v4 = vsel %vm1700_vm14, %v4329_v25, 0 }
 0x308   :  { %1753 = vmatpush.bf16.msra.mxu0 %v4169_v60 }
 0x30a   :  { %1788 = vmatpush.bf16.msrb.mxu1 %v4017_v29  ;;  %v4194_v29 = vld [vmem:[#allocation4 + $0x1ec] sm:$0xf0] }
 0x30b   :  { %1809 = vmatpush.bf16.msrb.mxu3 %v4089_v45  ;;  %1843 = vmatpush.bf16.msrb.mxu2 %v1705_v4 }
 0x30c   :  { %1754 = vmatpush.bf16.msra.mxu0 %v4157_v56  ;;  %v4230_v56 = vld [vmem:[#allocation4 + $0x234] sm:$0xf0] }
 0x30d   :  { %v4233_v51 = vor.u32 %v4783_v23, %v4230_v56  ;;  %v4221_v56 = vor.u32 %v4780_v21, %v4218_v46  ;;  %v4206_v21 = vld [vmem:[#allocation4 + $0x204] sm:$0xf0]  ;;  %v4726_v46 = vld [vmem:[#allocation4 + $0x64] sm:$0xf] }
 0x30f   :  { %1810 = vmatpush.bf16.msrb.mxu3 %v4077_v58 }
 0x310   :  { %1755 = vmatpush.bf16.msra.mxu0 %v4145_v48  ;;  %v4804_v48 = vld [vmem:[#allocation4 + $0x2d4] sm:$0xf] }
 0x311   :  { %v4317_v23 = vor.u32 %v4804_v48, %v4314_v10  ;;  %v4777_v10 = vld [vmem:[#allocation4 + $0x1fc] sm:$0xf] }
 0x312   :  { %v4209_v38 = vor.u32 %v4777_v10, %v4206_v21  ;;  %v3990_v10 = vld [vmem:[#allocation4 + $0x54] sm:$0xf0]  ;;  %v4140_v21 = vld [vmem:[#allocation4 + $0x170] sm:$0xf] }
 0x313   :  { %1844 = vmatpush.bf16.msrb.mxu2 %v4317_v23  ;;  %v4798_v23 = vld [vmem:[#allocation4 + $0x2a4] sm:$0xf] }
 0x314   :  { %1824 = vmatpush.bf16.msrb.mxu0 %v4233_v51 }
 0x318   :  { %1825 = vmatpush.bf16.msrb.mxu0 %v4221_v56  ;;  %v4738_v56 = vld [vmem:[#allocation4 + $0xc4] sm:$0xf] }
 0x31c   :  { %1826 = vmatpush.bf16.msrb.mxu0 %v4209_v38 }
 0x331   :  { %v5607_v52 = vpop.permute.xlu2 %4967 }
 0x332   :  { %v6779_v4 = vunpack.i.h.bf16 %v5607_v52  ;;  %v6782_v37 = vunpack.i.l.bf16 %v5607_v52 }
 0x339   :  { %v5624_v53 = vpop.permute.xlu2 %4972 }
 0x33a   :  { %v6781_v39 = vunpack.i.l.bf16 %v5624_v53 }
 0x33f   :  { %v5605_v9 = vpop.permute.xlu0 %4922  ;;  %v5609_v63 = vpop.permute.xlu1 %4932 }
 0x340   :  { %v4925_v15 = vunpack.i.h.bf16 %v5605_v9  ;;  %v4924_v60 = vunpack.i.l.bf16 %v5605_v9  ;;  %v4935_v62 = vunpack.i.h.bf16 %v5609_v63  ;;  %v4934_v0 = vunpack.i.l.bf16 %v5609_v63  ;;  %v4104_v9 = vld [vmem:[#allocation4 + $0x128] sm:$0xf] }
 0x342   :  { %v1033_v6 = vsel %vm1031_vm15, %v4924_v60, %v4925_v15  ;;  %v1036_v20 = vsel %vm1031_vm15, %v4934_v0, %v4935_v62 }
 0x343   :  { %v1061_v25 = vmax.f32 %v944_v2, %v1033_v6  ;;  %v1065_v51 = vmax.f32 %v948_v49, %v1036_v20  ;;  %v4062_v2 = vld [vmem:[#allocation4 + $0xe4] sm:$0xf0]  ;;  %v6778_v6 = vunpack.i.h.bf16 %v5624_v53 }
 0x344   :  { %v4302_v49 = vld [vmem:[#allocation4 + $0x2c4] sm:$0xf0]  ;;  %v4065_v42 = vor.u32 %v4741_v8, %v4062_v2  ;;  %v1042_v8 = vsel %vm1031_vm15, %v6782_v37, %v6779_v4  ;;  %v3978_v4 = vld [vmem:[#allocation4 + $0x3c] sm:$0xf0] }
 0x345   :  { %v4305_v55 = vor.u32 %v4801_v34, %v4302_v49 }
 0x346   :  { %1811 = vmatpush.bf16.msrb.mxu3 %v4065_v42  ;;  %v5677_v42 = vmax.f32 %v956_v19, %v1042_v8  ;;  %v4278_v19 = vld [vmem:[#allocation4 + $0x294] sm:$0xf0] }
 0x347   :  { %v5613_v61 = vpop.permute.xlu0 %4927  ;;  %v5637_v13 = vpop.permute.xlu1 %4937  ;;  %1845 = vmatpush.bf16.msrb.mxu2 %v4305_v55 }
 0x348   :  { %v4930_v18 = vunpack.i.h.bf16 %v5613_v61  ;;  %v6777_v22 = vunpack.i.l.bf16 %v5613_v61  ;;  %v4940_v14 = vunpack.i.h.bf16 %v5637_v13  ;;  %v4939_v45 = vunpack.i.l.bf16 %v5637_v13 }
 0x34a   :  { %v1134_v28 = vsel %vm1132_vm1, %v6777_v22, %v4930_v18  ;;  %v1137_v47 = vsel %vm1132_vm1, %v4939_v45, %v4940_v14 }
 0x34b   :  { %v1162_v20 = vmax.f32 %v1061_v25, %v1134_v28  ;;  %v1166_v58 = vmax.f32 %v1065_v51, %v1137_v47  ;;  %v4005_v28 = vor.u32 %v4726_v46, %v4002_v43  ;;  %v4290_v25 = vld [vmem:[#allocation4 + $0x2ac] sm:$0xf0]  ;;  %v4774_v51 = vld [vmem:[#allocation4 + $0x1e4] sm:$0xf]  ;;  %v4053_v47 = vor.u32 %v4738_v56, %v4050_v57 }
 0x34c   :  { %v4293_v34 = vor.u32 %v4798_v23, %v4290_v25  ;;  %v4197_v49 = vor.u32 %v4774_v51, %v4194_v29  ;;  %v5671_v43 = vsel %vm1132_vm1, %v6781_v39, %v6778_v6  ;;  %v4771_v29 = vld [vmem:[#allocation4 + $0x1cc] sm:$0xf]  ;;  %v4720_v6 = vld [vmem:[#allocation4 + $0x34] sm:$0xf]  ;;  %v4758_v39 = vld [vmem:[#allocation4 + $0x160] sm:$0xf0] }
 0x34d   :  { %v5658_v22 = vpack.c.bf16 %v1166_v58, %v1162_v20  ;;  %v5673_v20 = vpop.permute.xlu2 %4977  ;;  %1789 = vmatpush.bf16.msrb.mxu1 %v4005_v28  ;;  %v4723_v58 = vld [vmem:[#allocation4 + $0x4c] sm:$0xf]  ;;  %1812 = vmatpush.bf16.msrb.mxu3 %v4053_v47  ;;  %v4761_v28 = vld [vmem:[#allocation4 + $0x178] sm:$0xf0]  ;;  %v1174_v8 = vmax.f32 %v5677_v42, %v5671_v43  ;;  %v4266_v42 = vld [vmem:[#allocation4 + $0x27c] sm:$0xf0] }
 0x34e   :  { %1827 = vmatpush.bf16.msrb.mxu0 %v4197_v49  ;;  %v3993_v57 = vor.u32 %v4723_v58, %v3990_v10  ;;  %v4979_v23 = vunpack.i.l.bf16 %v5673_v20  ;;  %1846 = vmatpush.bf16.msrb.mxu2 %v4293_v34  ;;  %v4141_v49 = vor.u32 %v4761_v28, %v4140_v21  ;;  %v4281_v58 = vor.u32 %v4795_v36, %v4278_v19  ;;  %v4792_v34 = vld [vmem:[#allocation4 + $0x274] sm:$0xf]  ;;  %v4170_v36 = vld [vmem:[#allocation4 + $0x1bc] sm:$0xf0] }
 0x34f   :  { %v5652_v48 = vpop.permute.xlu0 %4952  ;;  %v4943_v2 = vpop.permute.xlu1 %4942  ;;  %1737 = vmatmul.bf16.vlgmr.msra.gmra.mxu3 %v5658_v22  ;;  %v4980_v37 = vunpack.i.h.bf16 %v5673_v20 }
 0x350   :  { %v6780_v40 = vunpack.i.h.bf16 %v5652_v48  ;;  %v4954_v24 = vunpack.i.l.bf16 %v5652_v48  ;;  %v4944_v38 = vunpack.i.l.bf16 %v4943_v2  ;;  %v4945_v46 = vunpack.i.h.bf16 %v4943_v2  ;;  %v4182_v2 = vld [vmem:[#allocation4 + $0x1d4] sm:$0xf0] }
 0x351   :  { %1790 = vmatpush.bf16.msrb.mxu1 %v3993_v57  ;;  %v4185_v10 = vor.u32 %v4771_v29, %v4182_v2  ;;  %1881 = vmatpush.bf16.msra.mxu3 %v4141_v49  ;;  %v4116_v29 = vld [vmem:[#allocation4 + $0x140] sm:$0xf]  ;;  %v4755_v2 = vld [vmem:[#allocation4 + $0x148] sm:$0xf0] }
 0x352   :  { %v1039_v55 = vsel %vm1031_vm15, %v4954_v24, %v6780_v40  ;;  %v4128_v40 = vld [vmem:[#allocation4 + $0x158] sm:$0xf]  ;;  %v1032_v43 = vsel %vm1031_vm15, %v4944_v38, %v4924_v60  ;;  %v1035_v21 = vsel %vm1031_vm15, %v4945_v46, %v4934_v0  ;;  %v4717_v60 = vld [vmem:[#allocation4 + $0x1c] sm:$0xf]  ;;  %v3966_v38 = vld [vmem:[#allocation4 + $0x24] sm:$0xf0]  ;;  %1847 = vmatpush.bf16.msrb.mxu2 %v4281_v58  ;;  %v4269_v0 = vor.u32 %v4792_v34, %v4266_v42 }
 0x353   :  { %v1069_v47 = vmax.f32 %v952_v54, %v1039_v55  ;;  %v3981_v54 = vor.u32 %v4720_v6, %v3978_v4  ;;  %v4768_v55 = vld [vmem:[#allocation4 + $0x1b4] sm:$0xf]  ;;  %1828 = vmatpush.bf16.msrb.mxu0 %v4185_v10  ;;  %v4129_v28 = vor.u32 %v4758_v39, %v4128_v40  ;;  %v1135_v4 = vsel %vm1132_vm1, %v4930_v18, %v4979_v23  ;;  %v4789_v39 = vld [vmem:[#allocation4 + $0x25c] sm:$0xf]  ;;  %v4158_v42 = vld [vmem:[#allocation4 + $0x1a4] sm:$0xf0] }
 0x354   :  { %v1138_v6 = vsel %vm1132_vm1, %v4940_v14, %v4980_v37  ;;  %v4173_v46 = vor.u32 %v4768_v55, %v4170_v36  ;;  %v1060_v40 = vmax.f32 %v943_v33, %v1032_v43  ;;  %v3969_v10 = vor.u32 %v4717_v60, %v3966_v38  ;;  %v4765_v18 = vld [vmem:[#allocation4 + $0x19c] sm:$0xf]  ;;  %v4714_v55 = vld [vmem:[#allocation4 + $0x4] sm:$0xf]  ;;  %v3954_v36 = vld [vmem:[#allocation4 + $0xc] sm:$0xf0] }
 0x355   :  { %1791 = vmatpush.bf16.msrb.mxu1 %v3981_v54  ;;  %v4117_v58 = vor.u32 %v4755_v2, %v4116_v29  ;;  %1882 = vmatpush.bf16.msra.mxu3 %v4129_v28  ;;  %v4161_v32 = vor.u32 %v4765_v18, %v4158_v42  ;;  %v4762_v60 = vld [vmem:[#allocation4 + $0x184] sm:$0xf]  ;;  %v4146_v38 = vld [vmem:[#allocation4 + $0x18c] sm:$0xf0]  ;;  %v5741_v20 = vpop.permute.xlu2 %4992 }
 0x356   :  { %1848 = vmatpush.bf16.msrb.mxu2 %v4269_v0  ;;  %v4149_v29 = vor.u32 %v4762_v60, %v4146_v38  ;;  %v4044_v2 = vld [vmem:[#allocation4 + $0xb0] sm:$0xf]  ;;  %v6791_v60 = vmax.f32 %v5553_v11, 0.0 }
 0x357   :  { %v5684_v56 = vpop.permute.xlu0 %4957  ;;  %v4948_v19 = vpop.permute.xlu1 %4947  ;;  %1829 = vmatpush.bf16.msrb.mxu0 %v4173_v46  ;;  %v4332_v18 = vld [vmem:[#allocation4 + $0x2f0] sm:$0xf] }
 0x358   :  { %v4960_v25 = vunpack.i.h.bf16 %v5684_v56  ;;  %v6783_v51 = vunpack.i.l.bf16 %v5684_v56  ;;  %v4949_v49 = vunpack.i.l.bf16 %v4948_v19 }
 0x359   :  { %1792 = vmatpush.bf16.msrb.mxu1 %v3969_v10  ;;  %1883 = vmatpush.bf16.msra.mxu3 %v4117_v58  ;;  %v4809_v58 = vld [vmem:[#allocation4 + $0x2f8] sm:$0x70] }
 0x35a   :  { %v1140_v30 = vsel %vm1132_vm1, %v6783_v51, %v4960_v25  ;;  %v1064_v51 = vmax.f32 %v947_v17, %v1035_v21  ;;  %v1034_v33 = vsel %vm1031_vm15, %v4925_v15, %v4949_v49  ;;  %v1063_v7 = vmax.f32 %v946_v5, %v4949_v49  ;;  %v4752_v15 = vld [vmem:[#allocation4 + $0x130] sm:$0xf0]  ;;  %v4786_v21 = vld [vmem:[#allocation4 + $0x244] sm:$0xf] }
 0x35b   :  { %v1170_v57 = vmax.f32 %v1069_v47, %v1140_v30  ;;  %v4950_v47 = vunpack.i.h.bf16 %v4948_v19  ;;  %v4254_v30 = vld [vmem:[#allocation4 + $0x264] sm:$0xf0]  ;;  %v3957_v5 = vor.u32 %v4714_v55, %v3954_v36  ;;  %v4105_v0 = vor.u32 %v4752_v15, %v4104_v9  ;;  %1830 = vmatpush.bf16.msrb.mxu0 %v4161_v32  ;;  %v4320_v32 = vld [vmem:[#allocation4 + $0x2d8] sm:$0xf] }
 0x35c   :  { %v4257_v34 = vor.u32 %v4789_v39, %v4254_v30  ;;  %v1164_v63 = vmax.f32 %v1063_v7, %v4979_v23  ;;  %v4737_v39 = vld [vmem:[#allocation4 + $0xb8] sm:$0xf0]  ;;  %v6785_v55 = vunpack.i.l.bf16 %v5607_v52  ;;  %v6786_v9 = vunpack.i.l.bf16 %v5624_v53 }
 0x35d   :  { %v5717_v14 = vpack.c.bf16 %v1174_v8, %v1170_v57  ;;  %v1067_v59 = vmax.f32 %v950_v27, %v4950_v47  ;;  %v1037_v43 = vsel %vm1031_vm15, %v4935_v62, %v4950_v47  ;;  %v1062_v8 = vmax.f32 %v945_v3, %v1034_v33  ;;  %v4242_v57 = vld [vmem:[#allocation4 + $0x24c] sm:$0xf0]  ;;  %1793 = vmatpush.bf16.msrb.mxu1 %v3957_v5  ;;  %v4749_v30 = vld [vmem:[#allocation4 + $0x118] sm:$0xf0]  ;;  %v4806_v5 = vld [vmem:[#allocation4 + $0x2e0] sm:$0xf0] }
 0x35e   :  { %v1066_v44 = vmax.f32 %v949_v16, %v1037_v43  ;;  %v6784_v16 = vunpack.i.l.bf16 %v5613_v61  ;;  %1849 = vmatpush.bf16.msrb.mxu2 %v4257_v34  ;;  %1884 = vmatpush.bf16.msra.mxu3 %v4105_v0  ;;  %v4045_v10 = vor.u32 %v4737_v39, %v4044_v2  ;;  %v4785_v33 = vld [vmem:[#allocation4 + $0x238] sm:$0xf0]  ;;  %v4032_v43 = vld [vmem:[#allocation4 + $0x98] sm:$0xf]  ;;  %v5787_v11 = vor.u32 %v4806_v5, %v4320_v32  ;;  %v4212_v2 = vld [vmem:[#allocation4 + $0x200] sm:$0xf] }
 0x35f   :  { %v4963_v17 = vpop.permute.xlu0 %4962  ;;  %v1168_v62 = vmax.f32 %v1067_v59, %v4980_v37  ;;  %v1163_v31 = vmax.f32 %v1062_v8, %v1135_v4  ;;  %v4983_v4 = vpop.permute.xlu1 %4982  ;;  %1742 = vmatmul.bf16.gmra.mxu3 %v5717_v14  ;;  %v4236_v59 = vld [vmem:[#allocation4 + $0x230] sm:$0xf]  ;;  %1831 = vmatpush.bf16.msrb.mxu0 %v4149_v29  ;;  %v4734_v8 = vld [vmem:[#allocation4 + $0xa0] sm:$0xf0]  ;;  %v4296_v32 = vld [vmem:[#allocation4 + $0x2a8] sm:$0xf] }
 0x360   :  { %v4965_v27 = vunpack.i.h.bf16 %v4963_v17  ;;  %v4964_v54 = vunpack.i.l.bf16 %v4963_v17  ;;  %v1167_v3 = vmax.f32 %v1066_v44, %v1138_v6  ;;  %v4985_v6 = vunpack.i.h.bf16 %v4983_v4  ;;  %v4080_v44 = vld [vmem:[#allocation4 + $0xf8] sm:$0xf]  ;;  %v4800_v5 = vld [vmem:[#allocation4 + $0x2b0] sm:$0xf0] }
 0x361   :  { %v5743_v37 = vpack.c.bf16 %v1168_v62, %v1164_v63  ;;  %v4984_v46 = vunpack.i.l.bf16 %v4983_v4  ;;  %v4333_v17 = vor.u32 %v4809_v58, %v4332_v18  ;;  %v6787_v63 = vmax.f32 %v5528_v50, 0.0  ;;  %v4782_v50 = vld [vmem:[#allocation4 + $0x220] sm:$0xf0] }
 0x362   :  { %v1136_v41 = vsel %vm1132_vm1, %v4965_v27, %v4939_v45  ;;  %v1133_v28 = vsel %vm1132_vm1, %v4964_v54, %v6784_v16  ;;  %v5746_v13 = vpack.c.bf16 %v1167_v3, %v1163_v31  ;;  %v4245_v45 = vor.u32 %v4786_v21, %v4242_v57  ;;  %v4746_v27 = vld [vmem:[#allocation4 + $0x100] sm:$0xf0]  ;;  %v4224_v21 = vld [vmem:[#allocation4 + $0x218] sm:$0xf] }
 0x363   :  { %v1165_v23 = vmax.f32 %v1064_v51, %v1136_v41  ;;  %v1161_v19 = vmax.f32 %v1060_v40, %v1133_v28  ;;  %4334 = vmatmul.msk.bf16.vlgmr.msra.gmra.mxu2 %vm1132_vm1, %v5743_v37  ;;  %v4995_v51 = vunpack.i.h.bf16 %v5741_v20  ;;  %v4092_v40 = vld [vmem:[#allocation4 + $0x110] sm:$0xf]  ;;  %v1038_v49 = vsel %vm1031_vm15, %v4984_v46, %v4954_v24 }
 0x364   :  { %1756 = vmatmul.bf16.vlgmr.msra.gmra.mxu0 %v5746_v13  ;;  %v1041_v36 = vsel %vm1031_vm15, %v4985_v6, %v6785_v55  ;;  %1850 = vmatpush.bf16.msrb.mxu2 %v4245_v45  ;;  %v4093_v7 = vor.u32 %v4749_v30, %v4092_v40  ;;  %v4237_v24 = vor.u32 %v4785_v33, %v4236_v59  ;;  %v4994_v54 = vunpack.i.l.bf16 %v5741_v20  ;;  %v4020_v20 = vld [vmem:[#allocation4 + $0x80] sm:$0xf]  ;;  %v4743_v6 = vld [vmem:[#allocation4 + $0xe8] sm:$0xf0] }
 0x365   :  { %v5748_v61 = vpack.c.bf16 %v1165_v23, %v1161_v19  ;;  %v5765_v15 = vsel %vm1132_vm1, %v4995_v51, %v6786_v9  ;;  %v5769_v62 = vmax.f32 %v6787_v63, %v1038_v49  ;;  %v6788_v57 = vmax.f32 %v5559_v12, 0.0  ;;  %v4731_v23 = vld [vmem:[#allocation4 + $0x88] sm:$0xf0]  ;;  %v4776_v9 = vld [vmem:[#allocation4 + $0x1f0] sm:$0xf0] }
 0x366   :  { %v6789_v3 = vunpack.i.h.bf16 %v5652_v48  ;;  %v6790_v16 = vunpack.i.h.bf16 %v5607_v52  ;;  %v1072_v38 = vmax.f32 %v6791_v60, %v1041_v36  ;;  %1885 = vmatpush.bf16.msra.mxu3 %v4093_v7  ;;  %v6792_v19 = vmax.f32 %v5534_v1, 0.0  ;;  %1900 = vmatpush.bf16.msra.mxu0 %v4237_v24  ;;  %v4068_v52 = vld [vmem:[#allocation4 + $0xe0] sm:$0xf]  ;;  %v4779_v30 = vld [vmem:[#allocation4 + $0x208] sm:$0xf0] }
 0x367   :  { %v4988_v47 = vpop.permute.xlu0 %4987  ;;  %1718 = vmatmul.bf16.vlgmr.msra.gmra.mxu1 %v5748_v61  ;;  %v4998_v12 = vpop.permute.xlu1 %4997  ;;  %v5784_v4 = vsel %vm1700_vm14, %v4333_v17, 0  ;;  %v4033_v48 = vor.u32 %v4734_v8, %v4032_v43  ;;  %v4081_v45 = vor.u32 %v4746_v27, %v4080_v44  ;;  %v4225_v51 = vor.u32 %v4782_v50, %v4224_v21  ;;  %v4803_v36 = vld [vmem:[#allocation4 + $0x2c8] sm:$0xf0]  ;;  %v4008_v17 = vld [vmem:[#allocation4 + $0x68] sm:$0xf] }
 0x368   :  { %v4990_v34 = vunpack.i.h.bf16 %v4988_v47  ;;  %v4989_v42 = vunpack.i.l.bf16 %v4988_v47  ;;  %1862 = vmatpush.bf16.msra.mxu1 %v4045_v10  ;;  %v5000_v46 = vunpack.i.h.bf16 %v4998_v12  ;;  %v4999_v29 = vunpack.i.l.bf16 %v4998_v12  ;;  %1919 = vmatpush.bf16.msra.mxu2 %v5784_v4  ;;  %v4056_v24 = vld [vmem:[#allocation4 + $0xc8] sm:$0xf]  ;;  %v4740_v8 = vld [vmem:[#allocation4 + $0xd0] sm:$0xf0]  ;;  %v4188_v60 = vld [vmem:[#allocation4 + $0x1d0] sm:$0xf] }
 0x369   :  { %v6793_v1 = vmax.f32 %v5532_v26, 0.0  ;;  %v6794_v40 = vmax.f32 %v5557_v35, 0.0  ;;  %v4021_v49 = vor.u32 %v4731_v23, %v4020_v20  ;;  %v4069_v10 = vor.u32 %v4743_v6, %v4068_v52  ;;  %v4308_v26 = vld [vmem:[#allocation4 + $0x2c0] sm:$0xf]  ;;  %v4728_v44 = vld [vmem:[#allocation4 + $0x70] sm:$0xf0] }
 0x36a   :  { %v1075_v31 = vmax.f32 %v6788_v57, %v4990_v34  ;;  %v1040_v41 = vsel %vm1031_vm15, %v6789_v3, %v4989_v42  ;;  %v1043_v28 = vsel %vm1031_vm15, %v6790_v16, %v4990_v34  ;;  %v1071_v0 = vmax.f32 %v6792_v19, %v4989_v42  ;;  %1886 = vmatpush.bf16.msra.mxu3 %v4081_v45  ;;  %v4200_v27 = vld [vmem:[#allocation4 + $0x1e8] sm:$0xf]  ;;  %v3996_v3 = vld [vmem:[#allocation4 + $0x50] sm:$0xf]  ;;  %v4773_v50 = vld [vmem:[#allocation4 + $0x1d8] sm:$0xf0] }
 0x36b   :  { %v1070_v39 = vmax.f32 %v6793_v1, %v1040_v41  ;;  %v1074_v47 = vmax.f32 %v6794_v40, %v1043_v28  ;;  %v1141_v58 = vsel %vm1132_vm1, %v4960_v25, %v4999_v29  ;;  %v6795_v34 = vunpack.i.h.bf16 %v5624_v53  ;;  %1901 = vmatpush.bf16.msra.mxu0 %v4225_v51  ;;  %v4725_v41 = vld [vmem:[#allocation4 + $0x58] sm:$0xf0]  ;;  %v4284_v16 = vld [vmem:[#allocation4 + $0x290] sm:$0xf]  ;;  %v3984_v23 = vld [vmem:[#allocation4 + $0x38] sm:$0xf] }
 0x36c   :  { %1863 = vmatpush.bf16.msra.mxu1 %v4033_v48  ;;  %v1176_v18 = vmax.f32 %v1075_v31, %v5000_v46  ;;  %v1172_v55 = vmax.f32 %v1071_v0, %v4999_v29  ;;  %v6796_v35 = vunpack.i.l.bf16 %v5684_v56  ;;  %v4213_v7 = vor.u32 %v4779_v30, %v4212_v2  ;;  %1920 = vmatpush.bf16.msra.mxu2 %v5787_v11  ;;  %v4797_v28 = vld [vmem:[#allocation4 + $0x298] sm:$0xf0]  ;;  %v4722_v19 = vld [vmem:[#allocation4 + $0x40] sm:$0xf0]  ;;  %v4176_v0 = vld [vmem:[#allocation4 + $0x1b8] sm:$0xf] }
 0x36d   :  { %v1144_v42 = vsel %vm1132_vm1, %v6795_v34, %v5000_v46  ;;  %v1171_v33 = vmax.f32 %v1070_v39, %v1141_v58  ;;  %v1173_v53 = vmax.f32 %v1072_v38, %v5765_v15  ;;  %v4309_v56 = vor.u32 %v4803_v36, %v4308_v26  ;;  %v4770_v48 = vld [vmem:[#allocation4 + $0x1c0] sm:$0xf0]  ;;  %v4272_v45 = vld [vmem:[#allocation4 + $0x278] sm:$0xf]  ;;  %v3972_v29 = vld [vmem:[#allocation4 + $0x20] sm:$0xf] }
 0x36e   :  { %v1139_v59 = vsel %vm1132_vm1, %v4994_v54, %v6796_v35  ;;  %v1175_v43 = vmax.f32 %v1074_v47, %v1144_v42  ;;  %v5805_v63 = vpack.c.bf16 %v1176_v18, %v1172_v55  ;;  %1887 = vmatpush.bf16.msra.mxu3 %v4069_v10  ;;  %v4057_v54 = vor.u32 %v4740_v8, %v4056_v24  ;;  %v4794_v52 = vld [vmem:[#allocation4 + $0x280] sm:$0xf0]  ;;  %v4719_v51 = vld [vmem:[#allocation4 + $0x28] sm:$0xf0]  ;;  %v4260_v39 = vld [vmem:[#allocation4 + $0x260] sm:$0xf] }
 0x36f   :  { %v1169_v25 = vmax.f32 %v5769_v62, %v1139_v59  ;;  %1813 = vmatmul.bf16.vlgmr.msrb.gmra.mxu3 %v5658_v22  ;;  %1902 = vmatpush.bf16.msra.mxu0 %v4213_v7  ;;  %v4009_v62 = vor.u32 %v4728_v44, %v4008_v17  ;;  %v4201_v15 = vor.u32 %v4776_v9, %v4200_v27  ;;  %v4767_v1 = vld [vmem:[#allocation4 + $0x1a8] sm:$0xf0]  ;;  %v3960_v10 = vld [vmem:[#allocation4 + $0x8] sm:$0xf]  ;;  %v4716_v30 = vld [vmem:[#allocation4 + $0x10] sm:$0xf0] }
 0x370   :  { %1864 = vmatpush.bf16.msra.mxu1 %v4021_v49  ;;  %v5808_v21 = vpack.c.bf16 %v1175_v43, %v1171_v33  ;;  %1921 = vmatpush.bf16.msra.mxu2 %v4309_v56  ;;  %v4297_v31 = vor.u32 %v4800_v5, %v4296_v32  ;;  %v3997_v38 = vor.u32 %v4725_v41, %v3996_v3  ;;  %v4791_v40 = vld [vmem:[#allocation4 + $0x268] sm:$0xf0]  ;;  %v4152_v58 = vld [vmem:[#allocation4 + $0x188] sm:$0xf]  ;;  %v4764_v34 = vld [vmem:[#allocation4 + $0x190] sm:$0xf0] }
 0x371   :  { %v5810_v57 = vpack.c.bf16 %v1173_v53, %v1169_v25  ;;  %v4189_v20 = vor.u32 %v4773_v50, %v4188_v60  ;;  %v4285_v12 = vor.u32 %v4797_v28, %v4284_v16  ;;  %v3985_v6 = vor.u32 %v4722_v19, %v3984_v23  ;;  %v4788_v42 = vld [vmem:[#allocation4 + $0x250] sm:$0xf0] }
 0x372   :  { %1888 = vmatpush.bf16.msra.mxu3 %v4057_v54  ;;  %v4177_v46 = vor.u32 %v4770_v48, %v4176_v0  ;;  %v4273_v2 = vor.u32 %v4794_v52, %v4272_v45  ;;  %v3973_v47 = vor.u32 %v4719_v51, %v3972_v29  ;;  %v4261_v18 = vor.u32 %v4791_v40, %v4260_v39 }
 0x373   :  { %4335 = vmatmul.msk.bf16.gmra.mxu2 %vm1132_vm1, %v5805_v63  ;;  %1903 = vmatpush.bf16.msra.mxu0 %v4201_v15  ;;  %v3961_v55 = vor.u32 %v4716_v30, %v3960_v10  ;;  %v4153_v26 = vor.u32 %v4764_v34, %v4152_v58 }
 0x374   :  { %1761 = vmatmul.bf16.gmra.mxu0 %v5808_v21  ;;  %1865 = vmatpush.bf16.msra.mxu1 %v4009_v62 }
 0x375   :  { %1922 = vmatpush.bf16.msra.mxu2 %v4297_v31 }
 0x376   :  { %4888 = vmatpush.bf16.msrb.mxu3 %v5784_v4  ;;  %v4164_v4 = vld [vmem:[#allocation4 + $0x1a0] sm:$0xf] }
 0x377   :  { %1723 = vmatmul.bf16.gmra.mxu1 %v5810_v57  ;;  %1904 = vmatpush.bf16.msra.mxu0 %v4189_v20  ;;  %v4165_v49 = vor.u32 %v4767_v1, %v4164_v4 }
 0x378   :  { %1866 = vmatpush.bf16.msra.mxu1 %v3997_v38 }
 0x379   :  { %1923 = vmatpush.bf16.msra.mxu2 %v4285_v12 }
 0x37a   :  { %4889 = vmatpush.bf16.msrb.mxu3 %v5787_v11  ;;  %v4248_v11 = vld [vmem:[#allocation4 + $0x248] sm:$0xf] }
 0x37b   :  { %1905 = vmatpush.bf16.msra.mxu0 %v4177_v46  ;;  %v4249_v36 = vor.u32 %v4788_v42, %v4248_v11 }
 0x37c   :  { %1867 = vmatpush.bf16.msra.mxu1 %v3985_v6 }
 0x37d   :  { %1924 = vmatpush.bf16.msra.mxu2 %v4273_v2 }
 0x37e   :  { %4890 = vmatpush.bf16.msrb.mxu3 %v4309_v56 }
 0x37f   :  { %1818 = vmatmul.bf16.gmra.mxu3 %v5717_v14  ;;  %1906 = vmatpush.bf16.msra.mxu0 %v4165_v49 }
 0x380   :  { %1868 = vmatpush.bf16.msra.mxu1 %v3973_v47 }
 0x381   :  { %1925 = vmatpush.bf16.msra.mxu2 %v4261_v18 }
 0x382   :  { %4891 = vmatpush.bf16.msrb.mxu3 %v4297_v31 }
 0x383   :  { %4336 = vmatmul.msk.bf16.vlgmr.msrb.gmra.mxu2 %vm1132_vm1, %v5743_v37  ;;  %1907 = vmatpush.bf16.msra.mxu0 %v4153_v26 }
 0x384   :  { %1832 = vmatmul.bf16.vlgmr.msrb.gmra.mxu0 %v5746_v13  ;;  %1869 = vmatpush.bf16.msra.mxu1 %v3961_v55 }
 0x385   :  { %1926 = vmatpush.bf16.msra.mxu2 %v4249_v36 }
 0x386   :  { %4892 = vmatpush.bf16.msrb.mxu3 %v4285_v12 }
 0x387   :  { %1794 = vmatmul.bf16.vlgmr.msrb.gmra.mxu1 %v5748_v61 }
 0x38a   :  { %4893 = vmatpush.bf16.msrb.mxu3 %v4273_v2 }
 0x38e   :  { %4894 = vmatpush.bf16.msrb.mxu3 %v4261_v18 }
 0x38f   :  { %1889 = vmatmul.bf16.vlgmr.msra.gmra.mxu3 %v5658_v22 }
 0x392   :  { %4895 = vmatpush.bf16.msrb.mxu3 %v4249_v36 }
 0x393   :  { %4337 = vmatmul.msk.bf16.gmra.mxu2 %vm1132_vm1, %v5805_v63 }
 0x394   :  { %1837 = vmatmul.bf16.gmra.mxu0 %v5808_v21 }
 0x397   :  { %1799 = vmatmul.bf16.gmra.mxu1 %v5810_v57 }
 0x39f   :  { %1894 = vmatmul.bf16.gmra.mxu3 %v5717_v14 }
 0x3a3   :  { %4338 = vmatmul.msk.bf16.vlgmr.msra.gmra.mxu2 %vm1132_vm1, %v5743_v37 }
 0x3a4   :  { %1908 = vmatmul.bf16.vlgmr.msra.gmra.mxu0 %v5746_v13 }
 0x3a7   :  { %1870 = vmatmul.bf16.vlgmr.msra.gmra.mxu1 %v5748_v61 }
 0x3af   :  { %4339 = vmatmul.msk.bf16.vlgmr.msrb.gmra.mxu3 %vm1132_vm1, %v5805_v63 }
 0x3b4   :  { %1913 = vmatmul.bf16.gmra.mxu0 %v5808_v21 }
 0x3b7   :  { %1875 = vmatmul.bf16.gmra.mxu1 %v5810_v57 }
 0x3d2   :  { %v1738_v22 = vpop.f32.mrf.mxu3 }
 0x3da   :  { %v1740_v35 = vpop.f32.mrf.mxu3 }
 0x3e1   :  { %v1757_v59 = vpop.f32.mrf.mxu0 }
 0x3e2   :  { %v1743_v43 = vpop.f32.mrf.mxu3 }
 0x3e4   :  { %v1719_v33 = vpop.f32.mrf.mxu1 }
 0x3e5   :  { %v1739_v21 = vadd.f32 %v1738_v22, %v1719_v33 }
 0x3e6   :  { %v1776_v14 = vpop.f32.mrf.mxu2 }
 0x3e7   :  { %v1758_v3 = vadd.f32 %v1757_v59, %v1739_v21 }
 0x3e9   :  { %v1759_v7 = vpop.f32.mrf.mxu0  ;;  %v1777_v28 = vadd.f32 %v1776_v14, %v1758_v3 }
 0x3ea   :  { %v1745_v37 = vpop.f32.mrf.mxu3 }
 0x3ec   :  { %v1721_v17 = vpop.f32.mrf.mxu1 }
 0x3ed   :  { %v1741_v62 = vadd.f32 %v1740_v35, %v1721_v17 }
 0x3ee   :  { %v1778_v24 = vpop.f32.mrf.mxu2 }
 0x3ef   :  { %v1760_v60 = vadd.f32 %v1759_v7, %v1741_v62 }
 0x3f1   :  { %v1762_v13 = vpop.f32.mrf.mxu0  ;;  %v1779_v23 = vadd.f32 %v1778_v24, %v1760_v60 }
 0x3f2   :  { %v1814_v61 = vpop.f32.mrf.mxu3 }
 0x3f4   :  { %v1724_v8 = vpop.f32.mrf.mxu1 }
 0x3f5   :  { %v1744_v58 = vadd.f32 %v1743_v43, %v1724_v8 }
 0x3f6   :  { %v1781_v25 = vpop.f32.mrf.mxu2 }
 0x3f7   :  { %v1763_v22 = vadd.f32 %v1762_v13, %v1744_v58 }
 0x3f9   :  { %v1764_v53 = vpop.f32.mrf.mxu0  ;;  %v1782_v33 = vadd.f32 %v1781_v25, %v1763_v22 }
 0x3fa   :  { %v1816_v27 = vpop.f32.mrf.mxu3 }
 0x3fc   :  { %v1726_v44 = vpop.f32.mrf.mxu1 }
 0x3fd   :  { %v1746_v49 = vadd.f32 %v1745_v37, %v1726_v44 }
 0x3fe   :  { %v1783_v9 = vpop.f32.mrf.mxu2 }
 0x3ff   :  { %v1765_v11 = vadd.f32 %v1764_v53, %v1746_v49 }
 0x401   :  { %v1833_v56 = vpop.f32.mrf.mxu0  ;;  %v1784_v35 = vadd.f32 %v1783_v9, %v1765_v11 }
 0x402   :  { %v1819_v32 = vpop.f32.mrf.mxu3 }
 0x404   :  { %v1795_v63 = vpop.f32.mrf.mxu1 }
 0x405   :  { %v1815_v54 = vadd.f32 %v1814_v61, %v1795_v63 }
 0x406   :  { %v1852_v5 = vpop.f32.mrf.mxu2 }
 0x407   :  { %v1834_v15 = vadd.f32 %v1833_v56, %v1815_v54 }
 0x409   :  { %v1835_v57 = vpop.f32.mrf.mxu0  ;;  %v1853_v41 = vadd.f32 %v1852_v5, %v1834_v15 }
 0x40a   :  { %v1821_v50 = vpop.f32.mrf.mxu3 }
 0x40b   :  { %v1938_v19 = vpack.c.bf16 %v1853_v41, %v1777_v28 }
 0x40c   :  { %v1797_v31 = vpop.f32.mrf.mxu1 }
 0x40d   :  { %v1817_v16 = vadd.f32 %v1816_v27, %v1797_v31  ;;  %v1950_v52 = vunpack.c.l.b16 %v1938_v19  ;;  %v1951_v6 = vunpack.c.h.b16 %v1938_v19 }
 0x40e   :  { %v1854_v20 = vpop.f32.mrf.mxu2 }
 0x40f   :  { %v1836_v38 = vadd.f32 %v1835_v57, %v1817_v16 }
 0x411   :  { %v1855_v0 = vadd.f32 %v1854_v20, %v1836_v38  ;;  %v1838_v48 = vpop.f32.mrf.mxu0 }
 0x412   :  { %v1890_v4 = vpop.f32.mrf.mxu3 }
 0x413   :  { %v1940_v12 = vpack.c.bf16 %v1855_v0, %v1779_v23 }
 0x414   :  { %v1800_v45 = vpop.f32.mrf.mxu1 }
 0x415   :  { %v1952_v46 = vunpack.c.l.b16 %v1940_v12  ;;  %v1953_v29 = vunpack.c.h.b16 %v1940_v12  ;;  %v1820_v10 = vadd.f32 %v1819_v32, %v1800_v45 }
 0x416   :  { %v1857_v1 = vpop.f32.mrf.mxu2 }
 0x417   :  { %v5837_v51 = vpack.c.b16 %v1952_v46, %v1950_v52  ;;  %v5839_v2 = vpack.c.b16 %v1953_v29, %v1951_v6  ;;  %v1839_v42 = vadd.f32 %v1838_v48, %v1820_v10 }
 0x419   :  { %2020 = vrot.lane.b32.xlu2 %v5839_v2, %s5146_s15  ;;  %2018 = vrot.lane.b32.xlu0 %v5837_v51, %s5146_s15  ;;  %v1840_v39 = vpop.f32.mrf.mxu0  ;;  %v1858_v59 = vadd.f32 %v1857_v1, %v1839_v42  ;;  %v5885_v1 = vld [vmem:[%s6765_s9] sm:$0xff] }
 0x41a   :  { %v1892_v30 = vpop.f32.mrf.mxu3 }
 0x41b   :  { %v1942_v37 = vpack.c.bf16 %v1858_v59, %v1782_v33 }
 0x41c   :  { %v1802_v40 = vpop.f32.mrf.mxu1 }
 0x41d   :  { %v1822_v47 = vadd.f32 %v1821_v50, %v1802_v40  ;;  %v1954_v13 = vunpack.c.l.b16 %v1942_v37  ;;  %v1955_v27 = vunpack.c.h.b16 %v1942_v37  ;;  %v5900_v40 = vld [vmem:[%s6765_s9 + $0x10] sm:$0xff] }
 0x41e   :  { %v1859_v18 = vpop.f32.mrf.mxu2 }
 0x41f   :  { %v1841_v34 = vadd.f32 %v1840_v39, %v1822_v47  ;;  %v5893_v39 = vld [vmem:[%s6765_s9 + $0x18] sm:$0xff] }
 0x421   :  { %1999 = vrot.lane.b32.xlu2 %v5839_v2, %s5145_s10  ;;  %1997 = vrot.lane.b32.xlu0 %v5837_v51, %s5145_s10  ;;  %v1860_v55 = vadd.f32 %v1859_v18, %v1841_v34  ;;  %v1909_v26 = vpop.f32.mrf.mxu0 }
 0x422   :  { %v1895_v17 = vpop.f32.mrf.mxu3 }
 0x423   :  { %v1944_v14 = vpack.c.bf16 %v1860_v55, %v1784_v35 }
 0x424   :  { %v1871_v36 = vpop.f32.mrf.mxu1 }
 0x425   :  { %v1891_v7 = vadd.f32 %v1890_v4, %v1871_v36  ;;  %v1956_v24 = vunpack.c.l.b16 %v1944_v14  ;;  %v1957_v8 = vunpack.c.h.b16 %v1944_v14  ;;  %v5880_v4 = vld [vmem:[%s6765_s9 + $0x8] sm:$0xff] }
 0x426   :  { %v1928_v43 = vpop.f32.mrf.mxu2 }
 0x427   :  { %v1910_v61 = vadd.f32 %v1909_v26, %v1891_v7  ;;  %v5853_v56 = vpack.c.b16 %v1956_v24, %v1954_v13  ;;  %v5855_v63 = vpack.c.b16 %v1957_v8, %v1955_v27  ;;  %v4342_v13 = vld [vmem:[%s6762_s6] sm:$0xf]  ;;  %v4811_v27 = vld [vmem:[%s6762_s6 + $0x4] sm:$0xf0] }
 0x429   :  { %1978 = vrot.lane.b32.xlu2 %v5839_v2, %s5144_s4  ;;  %1976 = vrot.lane.b32.xlu0 %v5837_v51, %s5144_s4  ;;  %v1911_v53 = vpop.f32.mrf.mxu0  ;;  %v1929_v9 = vadd.f32 %v1928_v43, %v1910_v61  ;;  %v4434_v61 = vld [vmem:[%s6757_s1 + $0x70] sm:$0xf] }
 0x42a   :  { %v1897_v32 = vpop.f32.mrf.mxu3 }
 0x42b   :  { %v1939_v21 = vpack.c.bf16 %v1929_v9, %v1929_v9 }
 0x42c   :  { %v1873_v44 = vpop.f32.mrf.mxu1 }
 0x42d   :  { %v1893_v25 = vadd.f32 %v1892_v30, %v1873_v44  ;;  %v1970_v3 = vunpack.c.l.b16 %v1939_v21  ;;  %v4344_v21 = vld [vmem:[%s6762_s6 + $0x8] sm:$0xf0] }
 0x42e   :  { %v1930_v5 = vpop.f32.mrf.mxu2 }
 0x42f   :  { %v1912_v54 = vadd.f32 %v1911_v53, %v1893_v25  ;;  %v4829_v53 = vld [vmem:[%s6757_s1 + $0x74] sm:$0xf0]  ;;  %v4426_v25 = vld [vmem:[%s6757_s1 + $0x60] sm:$0xf] }
 0x430   :  { %v4435_v9 = vor.u32 %v4829_v53, %v4434_v61  ;;  %v4828_v53 = vld [vmem:[%s6757_s1 + $0x74] sm:$0xf] }
 0x431   :  { %v1931_v62 = vadd.f32 %v1930_v5, %v1912_v54  ;;  %2026 = vrot.lane.b32.xlu2 %v5855_v63, %s5146_s15  ;;  %2024 = vrot.lane.b32.xlu0 %v5853_v56, %s5146_s15  ;;  %v1914_v31 = vpop.f32.mrf.mxu0  ;;  %v4827_v54 = vld [vmem:[%s6757_s1 + $0x64] sm:$0xf0]  ;;  %v4810_v5 = vld [vmem:[%s6762_s6 + $0x4] sm:$0xf] }
 0x432   :  { %v1933_v28 = vpop.f32.mrf.mxu3 }
 0x433   :  { %v1941_v15 = vpack.c.bf16 %v1931_v62, %v1931_v62  ;;  %v4833_v62 = vld [vmem:[%s6757_s1 + $0x94] sm:$0xf0] }
 0x434   :  { %v1876_v57 = vpop.f32.mrf.mxu1 }
 0x435   :  { %v1971_v41 = vunpack.c.l.b16 %v1941_v15  ;;  %v1896_v20 = vadd.f32 %v1895_v17, %v1876_v57  ;;  %v4427_v57 = vor.u32 %v4827_v54, %v4426_v25  ;;  %v4452_v25 = vld [vmem:[%s6757_s1 + $0x98] sm:$0xf0] }
 0x437   :  { %v1974_v16 = vpack.c.b16 %v1971_v41, %v1970_v3  ;;  %v1915_v0 = vadd.f32 %v1914_v31, %v1896_v20  ;;  %v4831_v20 = vld [vmem:[%s6757_s1 + $0x84] sm:$0xf0] }
 0x439   :  { %2022 = vrot.lane.b32.xlu1 %v1974_v16, %s5146_s15  ;;  %2005 = vrot.lane.b32.xlu2 %v5855_v63, %s5145_s10  ;;  %v1916_v50 = vpop.f32.mrf.mxu0  ;;  %v1934_v48 = vadd.f32 %v1933_v28, %v1915_v0  ;;  %v4825_v28 = vld [vmem:[%s6757_s1 + $0x54] sm:$0xf0] }
 0x43a   :  { %2003 = vrot.lane.b32.xlu0 %v5853_v56, %s5145_s10  ;;  %v1935_v23 = vpop.f32.mrf.mxu3 }
 0x43b   :  { %v1943_v52 = vpack.c.bf16 %v1934_v48, %v1934_v48  ;;  %v4823_v48 = vld [vmem:[%s6757_s1 + $0x44] sm:$0xf0] }
 0x43c   :  { %v1878_v60 = vpop.f32.mrf.mxu1 }
 0x43d   :  { %v1898_v38 = vadd.f32 %v1897_v32, %v1878_v60  ;;  %v1972_v46 = vunpack.c.l.b16 %v1943_v52  ;;  %v5951_v32 = vor.u32 %v4811_v27, %v4342_v13  ;;  %v4835_v13 = vld [vmem:[%s6764_s8 + $0x4] sm:$0xf0] }
 0x43f   :  { %v1917_v19 = vadd.f32 %v1916_v50, %v1898_v38  ;;  %v5978_v38 = vor.u32 %v4810_v5, %v4344_v21  ;;  %v4442_v50 = vld [vmem:[%s6757_s1 + $0x80] sm:$0xf]  ;;  %v4364_v5 = vld [vmem:[%s6764_s8 + $0x8] sm:$0xf0] }
 0x441   :  { %2001 = vrot.lane.b32.xlu1 %v1974_v16, %s5145_s10  ;;  %1984 = vrot.lane.b32.xlu2 %v5855_v63, %s5144_s4  ;;  %v1936_v12 = vadd.f32 %v1935_v23, %v1917_v19  ;;  %v4443_v19 = vor.u32 %v4831_v20, %v4442_v50  ;;  %v4822_v50 = vld [vmem:[%s6757_s1 + $0x44] sm:$0xf]  ;;  %v4412_v20 = vld [vmem:[%s6757_s1 + $0x48] sm:$0xf0] }
 0x442   :  { %1982 = vrot.lane.b32.xlu0 %v5853_v56, %s5144_s4 }
 0x443   :  { %v1945_v45 = vpack.c.bf16 %v1936_v12, %v1936_v12  ;;  %v4410_v12 = vld [vmem:[%s6757_s1 + $0x40] sm:$0xf] }
 0x444   :  { %v4411_v52 = vor.u32 %v4823_v48, %v4410_v12  ;;  %v4818_v12 = vld [vmem:[%s6757_s1 + $0x24] sm:$0xf]  ;;  %v4396_v48 = vld [vmem:[%s6757_s1 + $0x28] sm:$0xf0] }
 0x445   :  { %v1973_v6 = vunpack.c.l.b16 %v1945_v45 }
 0x447   :  { %v1975_v29 = vpack.c.b16 %v1973_v6, %v1972_v46  ;;  %v4402_v46 = vld [vmem:[%s6757_s1 + $0x30] sm:$0xf] }
 0x449   :  { %1980 = vrot.lane.b32.xlu1 %v1974_v16, %s5144_s4  ;;  %2047 = vrot.lane.b32.xlu2 %v5855_v63, %s5147_s16 }
 0x44a   :  { %2045 = vrot.lane.b32.xlu0 %v5853_v56, %s5147_s16 }
 0x451   :  { %2028 = vrot.lane.b32.xlu1 %v1975_v29, %s5146_s15  ;;  %2041 = vrot.lane.b32.xlu2 %v5839_v2, %s5147_s16 }
 0x452   :  { %2039 = vrot.lane.b32.xlu0 %v5837_v51, %s5147_s16 }
 0x459   :  { %2007 = vrot.lane.b32.xlu1 %v1975_v29, %s5145_s10  ;;  %2526 = vperm.xlu2 %4920, %v5880_v4  }
 0x45a   :  { %2521 = vperm.xlu0 %4918, %v5885_v1  }
 0x461   :  { %1986 = vrot.lane.b32.xlu1 %v1975_v29, %s5144_s4 }
 0x462   :  { %2536 = vperm.xlu0 %4918, %v5893_v39  }
 0x469   :  { %2049 = vrot.lane.b32.xlu1 %v1975_v29, %s5147_s16  ;;  %v4821_v29 = vld [vmem:[%s6757_s1 + $0x34] sm:$0xf0] }
 0x471   :  { %2043 = vrot.lane.b32.xlu1 %v1974_v16, %s5147_s16  ;;  %v4418_v16 = vld [vmem:[%s6757_s1 + $0x50] sm:$0xf] }
 0x472   :  { %v4419_v23 = vor.u32 %v4825_v28, %v4418_v16 }
 0x473   :  { %v5903_v47 = vpop.permute.xlu2 %2020 }
 0x479   :  { %2531 = vperm.xlu1 %4919, %v5900_v40  }
 0x47b   :  { %v5905_v49 = vpop.permute.xlu2 %1999 }
 0x483   :  { %v5907_v30 = vpop.permute.xlu2 %1978 }
 0x48b   :  { %v2019_v10 = vpop.permute.xlu0 %2018  ;;  %v2027_v34 = vpop.permute.xlu2 %2026 }
 0x48c   :  { %v2031_v26 = vsel %vm2030_vm2, %v2019_v10, %v5903_v47  ;;  %v4813_v10 = vld [vmem:[%s6762_s6 + $0x14] sm:$0xf0] }
 0x493   :  { %v1998_v18 = vpop.permute.xlu0 %1997  ;;  %v5910_v55 = vpop.permute.xlu2 %2005 }
 0x494   :  { %v2010_v33 = vsel %vm1132_vm1, %v1998_v18, %v5905_v49  ;;  %v4403_v18 = vor.u32 %v4821_v29, %v4402_v46  ;;  %v4399_v46 = vor.u32 %v4818_v12, %v4396_v48  ;;  %v4816_v29 = vld [vmem:[%s6757_s1 + $0x14] sm:$0xf] }
 0x49b   :  { %v1977_v58 = vpop.permute.xlu0 %1976  ;;  %v5916_v59 = vpop.permute.xlu2 %1984 }
 0x49c   :  { %v1989_v43 = vsel %vm1031_vm15, %v1977_v58, %v5907_v30 }
 0x4a3   :  { %v2025_v11 = vpop.permute.xlu0 %2024  ;;  %v5926_v37 = vpop.permute.xlu2 %2047 }
 0x4a4   :  { %v2033_v42 = vsel %vm2030_vm2, %v2025_v11, %v2027_v34  ;;  %v4819_v11 = vld [vmem:[%s6757_s1 + $0x24] sm:$0xf0] }
 0x4a5   :  { %2104 = vmatpush.bf16.msrb.mxu1 %v2033_v42 }
 0x4a9   :  { %2105 = vmatpush.bf16.msrb.mxu1 %v2031_v26  ;;  %v4352_v26 = vld [vmem:[%s6762_s6 + $0x18] sm:$0xf0] }
 0x4ab   :  { %v2023_v36 = vpop.permute.xlu1 %2022  ;;  %v5966_v3 = vpop.permute.xlu2 %2041 }
 0x4ac   :  { %v2004_v22 = vpop.permute.xlu0 %2003  ;;  %v2032_v0 = vsel %vm2030_vm2, %v5903_v47, %v2023_v36  ;;  %v4350_v47 = vld [vmem:[%s6762_s6 + $0x10] sm:$0xf] }
 0x4ad   :  { %v2012_v35 = vsel %vm1132_vm1, %v2004_v22, %v5910_v55  ;;  %v6019_v42 = vor.u32 %v4813_v10, %v4350_v47  ;;  %v4388_v47 = vld [vmem:[%s6757_s1 + $0x18] sm:$0xf0] }
 0x4ae   :  { %2106 = vmatpush.bf16.msrb.mxu1 %v2012_v35  ;;  %v4386_v35 = vld [vmem:[%s6757_s1 + $0x10] sm:$0xf] }
 0x4b2   :  { %2107 = vmatpush.bf16.msrb.mxu1 %v2010_v33  ;;  %v4817_v33 = vld [vmem:[%s6757_s1 + $0x14] sm:$0xf0] }
 0x4b3   :  { %v5920_v14 = vpop.permute.xlu1 %2001 }
 0x4b4   :  { %v1983_v7 = vpop.permute.xlu0 %1982  ;;  %v2011_v58 = vsel %vm1132_vm1, %v5905_v49, %v5920_v14 }
 0x4b5   :  { %v1991_v17 = vsel %vm1031_vm15, %v1983_v7, %v5916_v59  ;;  %v4387_v7 = vor.u32 %v4817_v33, %v4386_v35 }
 0x4b6   :  { %2108 = vmatpush.bf16.msrb.mxu1 %v1991_v17 }
 0x4ba   :  { %2109 = vmatpush.bf16.msrb.mxu1 %v1989_v43  ;;  %v4815_v43 = vld [vmem:[%s6757_s1 + $0x4] sm:$0xf0] }
 0x4bb   :  { %v5928_v24 = vpop.permute.xlu1 %1980 }
 0x4bc   :  { %v2046_v8 = vpop.permute.xlu0 %2045  ;;  %v1990_v17 = vsel %vm1031_vm15, %v5907_v30, %v5928_v24  ;;  %v4436_v30 = vld [vmem:[%s6757_s1 + $0x78] sm:$0xf0] }
 0x4bd   :  { %v2054_v44 = vsel %vm2051_vm3, %v2046_v8, %v5926_v37  ;;  %v4439_v27 = vor.u32 %v4828_v53, %v4436_v30 }
 0x4be   :  { %2110 = vmatpush.bf16.msrb.mxu1 %v5853_v56  ;;  %2129 = vmatpush.bf16.msra.mxu3 %v2054_v44  ;;  %v4450_v56 = vld [vmem:[%s6757_s1 + $0x90] sm:$0xf]  ;;  %v4362_v44 = vld [vmem:[%s6764_s8] sm:$0xf] }
 0x4bf   :  { %v4451_v31 = vor.u32 %v4833_v62, %v4450_v56  ;;  %v4363_v54 = vor.u32 %v4835_v13, %v4362_v44  ;;  %v4834_v56 = vld [vmem:[%s6764_s8 + $0x4] sm:$0xf]  ;;  %v4824_v62 = vld [vmem:[%s6757_s1 + $0x54] sm:$0xf] }
 0x4c0   :  { %v4367_v16 = vor.u32 %v4834_v56, %v4364_v5 }
 0x4c2   :  { %2111 = vmatpush.bf16.msrb.mxu1 %v5837_v51 }
 0x4c3   :  { %v2029_v15 = vpop.permute.xlu1 %2028 }
 0x4c4   :  { %v2034_v51 = vsel %vm2030_vm2, %v2027_v34, %v2029_v15  ;;  %v2040_v41 = vpop.permute.xlu0 %2039  ;;  %v4394_v34 = vld [vmem:[%s6757_s1 + $0x20] sm:$0xf] }
 0x4c5   :  { %2112 = vmatmul.bf16.vlgmr.msrb.gmra.mxu1 %v5951_v32  ;;  %v2052_v60 = vsel %vm2051_vm3, %v2040_v41, %v5966_v3  ;;  %2142 = vmatpush.bf16.msrb.mxu0 %v2034_v51  ;;  %v4395_v36 = vor.u32 %v4819_v11, %v4394_v34  ;;  %v4444_v51 = vld [vmem:[%s6757_s1 + $0x88] sm:$0xf0] }
 0x4c6   :  { %2663 = vmatpush.bf16.msra.mxu1 %v4435_v9  ;;  %2130 = vmatpush.bf16.msra.mxu3 %v2052_v60  ;;  %v4826_v9 = vld [vmem:[%s6757_s1 + $0x64] sm:$0xf]  ;;  %v4380_v34 = vld [vmem:[%s6757_s1 + $0x8] sm:$0xf0] }
 0x4c9   :  { %4356 = vmatmul.msk.bf16.vlgmr.msra.gmra.mxu3 %vm533_vm0, %v5978_v38  ;;  %2143 = vmatpush.bf16.msrb.mxu0 %v2032_v0 }
 0x4ca   :  { %2664 = vmatpush.bf16.msra.mxu1 %v4427_v57  ;;  %2688 = vmatpush.bf16.msrb.mxu3 %v4451_v31  ;;  %v4830_v31 = vld [vmem:[%s6757_s1 + $0x84] sm:$0xf] }
 0x4cb   :  { %v2008_v45 = vpop.permute.xlu1 %2007  ;;  %v4447_v60 = vor.u32 %v4830_v31, %v4444_v51 }
 0x4cc   :  { %v2013_v6 = vsel %vm1132_vm1, %v5910_v55, %v2008_v45  ;;  %v4812_v55 = vld [vmem:[%s6762_s6 + $0x14] sm:$0xf]  ;;  %v2522_v13 = vpop.permute.xlu0 %2521 }
 0x4cd   :  { %2144 = vmatpush.bf16.msrb.mxu0 %v2013_v6  ;;  %v6036_v14 = vor.u32 %v4812_v55, %v4352_v26  ;;  %v4372_v6 = vld [vmem:[%s6764_s8 + $0x18] sm:$0xf0] }
 0x4ce   :  { %2665 = vmatpush.bf16.msra.mxu1 %v4419_v23  ;;  %2689 = vmatpush.bf16.msrb.mxu3 %v4443_v19  ;;  %v4404_v23 = vld [vmem:[%s6757_s1 + $0x38] sm:$0xf0]  ;;  %v4370_v19 = vld [vmem:[%s6764_s8 + $0x10] sm:$0xf] }
 0x4d1   :  { %2145 = vmatpush.bf16.msrb.mxu0 %v2011_v58  ;;  %v4814_v58 = vld [vmem:[%s6757_s1 + $0x4] sm:$0xf] }
 0x4d2   :  { %2666 = vmatpush.bf16.msra.mxu1 %v4411_v52  ;;  %v4836_v52 = vld [vmem:[%s6764_s8 + $0x14] sm:$0xf]  ;;  %v4383_v11 = vor.u32 %v4814_v58, %v4380_v34 }
 0x4d3   :  { %v1987_v49 = vpop.permute.xlu1 %1986  ;;  %v4375_v10 = vor.u32 %v4836_v52, %v4372_v6 }
 0x4d4   :  { %v1992_v22 = vsel %vm1031_vm15, %v5916_v59, %v1987_v49  ;;  %v4378_v59 = vld [vmem:[%s6757_s1] sm:$0xf]  ;;  %v2537_v48 = vpop.permute.xlu0 %2536 }
 0x4d5   :  { %2117 = vmatmul.bf16.gmra.mxu1 %v6019_v42  ;;  %2146 = vmatpush.bf16.msrb.mxu0 %v1992_v22  ;;  %v4379_v61 = vor.u32 %v4815_v43, %v4378_v59 }
 0x4d6   :  { %2667 = vmatpush.bf16.msra.mxu1 %v4403_v18  ;;  %v4391_v18 = vor.u32 %v4816_v29, %v4388_v47 }
 0x4d9   :  { %4357 = vmatmul.msk.bf16.gmra.mxu3 %vm533_vm0, %v6036_v14  ;;  %2147 = vmatpush.bf16.msrb.mxu0 %v1990_v17 }
 0x4da   :  { %2668 = vmatpush.bf16.msra.mxu1 %v4395_v36 }
 0x4db   :  { %v2050_v8 = vpop.permute.xlu1 %2049 }
 0x4dc   :  { %v2055_v24 = vsel %vm2051_vm3, %v5926_v37, %v2050_v8  ;;  %v4428_v37 = vld [vmem:[%s6757_s1 + $0x68] sm:$0xf0] }
 0x4dd   :  { %2148 = vmatpush.bf16.msrb.mxu0 %v5855_v63  ;;  %2167 = vmatpush.bf16.msrb.mxu2 %v2055_v24  ;;  %v4832_v63 = vld [vmem:[%s6757_s1 + $0x94] sm:$0xf]  ;;  %v4431_v21 = vor.u32 %v4826_v9, %v4428_v37 }
 0x4de   :  { %2669 = vmatpush.bf16.msra.mxu1 %v4387_v7  ;;  %v4455_v15 = vor.u32 %v4832_v63, %v4452_v25 }
 0x4e1   :  { %2149 = vmatpush.bf16.msrb.mxu0 %v5839_v2  ;;  %v4420_v2 = vld [vmem:[%s6757_s1 + $0x58] sm:$0xf0] }
 0x4e2   :  { %2670 = vmatpush.bf16.msra.mxu1 %v4379_v61  ;;  %v4423_v28 = vor.u32 %v4824_v62, %v4420_v2  ;;  %v2527_v62 = vpop.permute.xlu2 %2526 }
 0x4e3   :  { %v2044_v57 = vpop.permute.xlu1 %2043 }
 0x4e4   :  { %2150 = vmatmul.bf16.vlgmr.msrb.gmra.mxu0 %v5951_v32  ;;  %v2053_v41 = vsel %vm2051_vm3, %v5966_v3, %v2044_v57  ;;  %v4415_v32 = vor.u32 %v4822_v50, %v4412_v20  ;;  %v4820_v3 = vld [vmem:[%s6757_s1 + $0x34] sm:$0xf] }
 0x4e5   :  { %2701 = vmatpush.bf16.msra.mxu0 %v4439_v27  ;;  %2671 = vmatmul.bf16.vlgmr.msra.gmra.mxu1 %v4363_v54  ;;  %v4407_v0 = vor.u32 %v4820_v3, %v4404_v23 }
 0x4e6   :  { %2168 = vmatpush.bf16.msrb.mxu2 %v2053_v41 }
 0x4e9   :  { %2702 = vmatpush.bf16.msra.mxu0 %v4431_v21  ;;  %4358 = vmatmul.msk.bf16.vlgmr.msrb.gmra.mxu2 %vm533_vm0, %v5978_v38  ;;  %v4837_v38 = vld [vmem:[%s6764_s8 + $0x14] sm:$0xf0] }
 0x4ea   :  { %2726 = vmatpush.bf16.msra.mxu2 %v4455_v15  ;;  %4456 = vmatmul.msk.bf16.vlgmr.msrb.gmra.mxu3 %vm533_vm0, %v4367_v16  ;;  %v4371_v45 = vor.u32 %v4837_v38, %v4370_v19 }
 0x4eb   :  { %v2532_v50 = vpop.permute.xlu1 %2531 }
 0x4ed   :  { %2703 = vmatpush.bf16.msra.mxu0 %v4423_v28 }
 0x4ee   :  { %2727 = vmatpush.bf16.msra.mxu2 %v4447_v60 }
 0x4f1   :  { %2704 = vmatpush.bf16.msra.mxu0 %v4415_v32 }
 0x4f4   :  { %2155 = vmatmul.bf16.gmra.mxu0 %v6019_v42 }
 0x4f5   :  { %2705 = vmatpush.bf16.msra.mxu0 %v4407_v0  ;;  %2676 = vmatmul.bf16.gmra.mxu1 %v4371_v45 }
 0x4f9   :  { %2706 = vmatpush.bf16.msra.mxu0 %v4399_v46  ;;  %4359 = vmatmul.msk.bf16.gmra.mxu2 %vm533_vm0, %v6036_v14 }
 0x4fa   :  { %4457 = vmatmul.msk.bf16.gmra.mxu3 %vm533_vm0, %v4375_v10 }
 0x4fd   :  { %2707 = vmatpush.bf16.msra.mxu0 %v4391_v18  ;;  %v5148_v18 = vmov 208.0  }
 0x4fe   :  { %5031 = vrcp.f32 %v5148_v18 }
 0x501   :  { %2708 = vmatpush.bf16.msra.mxu0 %v4383_v11 }
 0x504   :  { %2709 = vmatmul.bf16.vlgmr.msra.gmra.mxu0 %v4363_v54  ;;  %v5032_v58 = vpop.eup %5031 }
 0x505   :  { %v2760_v34 = vmul.f32 208.0, %v5032_v58 }
 0x507   :  { %v2761_v11 = vsub.f32 1.0, %v2760_v34 }
 0x509   :  { %4458 = vmatmul.msk.bf16.vlgmr.msra.gmra.mxu2 %vm533_vm0, %v4367_v16 }
 0x514   :  { %2714 = vmatmul.bf16.gmra.mxu0 %v4371_v45 }
 0x519   :  { %4459 = vmatmul.msk.bf16.gmra.mxu2 %vm533_vm0, %v4375_v10  ;;  %vm2764_vm0 = vweird.f32 %v5032_v58 }
 0x542   :  { %v6149_v42 = vpop.f32.mrf.mxu1 }
 0x54a   :  { %v6155_v49 = vpop.f32.mrf.mxu1 }
 0x54c   :  { %v6151_v55 = vpop.f32.mrf.mxu3 }
 0x552   :  { %v6163_v33 = vpop.f32.mrf.mxu1 }
 0x554   :  { %v6157_v36 = vpop.f32.mrf.mxu3 }
 0x55a   :  { %v6171_v59 = vpop.f32.mrf.mxu1 }
 0x55c   :  { %v6165_v14 = vpop.f32.mrf.mxu3 }
 0x561   :  { %v6153_v26 = vpop.f32.mrf.mxu0 }
 0x562   :  { %v2672_v53 = vpop.f32.mrf.mxu1 }
 0x563   :  { %v2673_v27 = vadd.f32 %v2672_v53, %v2522_v13  ;;  %v2762_v53 = vmul.f32 %v5032_v58, %v2761_v11 }
 0x564   :  { %v6173_v43 = vpop.f32.mrf.mxu3 }
 0x569   :  { %v6159_v22 = vpop.f32.mrf.mxu0 }
 0x56a   :  { %v2674_v9 = vpop.f32.mrf.mxu1 }
 0x56b   :  { %v2675_v15 = vadd.f32 %v2674_v9, %v2527_v62 }
 0x56c   :  { %v6161_v35 = vpop.f32.mrf.mxu2 }
 0x56d   :  { %v2691_v24 = vpop.f32.mrf.mxu3 }
 0x56e   :  { %v6181_v54 = vadd.f32 %v2691_v24, %v2673_v27  ;;  %v2751_v24 = vmul.f32 48.0, %v5885_v1 }
 0x571   :  { %v6167_v7 = vpop.f32.mrf.mxu0 }
 0x572   :  { %v2677_v41 = vpop.f32.mrf.mxu1 }
 0x573   :  { %v2678_v20 = vadd.f32 %v2677_v41, %v2532_v50  ;;  %v2754_v41 = vmul.f32 48.0, %v5893_v39 }
 0x574   :  { %v6169_v17 = vpop.f32.mrf.mxu2 }
 0x575   :  { %v2693_v5 = vpop.f32.mrf.mxu3 }
 0x576   :  { %v6187_v31 = vadd.f32 %v2693_v5, %v2675_v15 }
 0x579   :  { %v6175_v8 = vpop.f32.mrf.mxu0 }
 0x57a   :  { %v2679_v0 = vpop.f32.mrf.mxu1 }
 0x57b   :  { %v2680_v52 = vadd.f32 %v2679_v0, %v2537_v48 }
 0x57c   :  { %v6177_v61 = vpop.f32.mrf.mxu2 }
 0x57d   :  { %v2696_v60 = vpop.f32.mrf.mxu3 }
 0x57e   :  { %v2697_v23 = vadd.f32 %v2696_v60, %v2678_v20 }
 0x581   :  { %v2710_v30 = vpop.f32.mrf.mxu0 }
 0x582   :  { %v2711_v37 = vadd.f32 %v2710_v30, %v2522_v13  ;;  %v2763_v30 = vadd.f32 %v5032_v58, %v2762_v53 }
 0x584   :  { %v6179_v44 = vpop.f32.mrf.mxu2  ;;  %v6194_v13 = vsel %vm2764_vm0, %v5032_v58, %v2763_v30  ;;  %v2435_v30 = vld [vmem:[%s6765_s9 + $0x40] sm:$0xff]  ;;  %vm3269_vm0 = vcmask 1047552  }
 0x585   :  { %v2698_v45 = vpop.f32.mrf.mxu3 }
 0x586   :  { %v2699_v29 = vadd.f32 %v2698_v45, %v2680_v52 }
 0x589   :  { %v2712_v63 = vpop.f32.mrf.mxu0 }
 0x58a   :  { %v2713_v57 = vadd.f32 %v2712_v63, %v2527_v62  ;;  %v2752_v63 = vmul.f32 48.0, %v5880_v4  ;;  %v2753_v62 = vmul.f32 48.0, %v5900_v40 }
 0x58c   :  { %v2729_v25 = vpop.f32.mrf.mxu2 }
 0x58d   :  { %v6183_v56 = vadd.f32 %v2729_v25, %v2711_v37 }
 0x58f   :  { %v2739_v21 = vadd.f32 %v6183_v56, %v6181_v54 }
 0x591   :  { %2740 = vadd.xlane.f32.xlu2 %v2739_v21  ;;  %v2715_v16 = vpop.f32.mrf.mxu0 }
 0x592   :  { %v2716_v32 = vadd.f32 %v2715_v16, %v2532_v50 }
 0x594   :  { %v2731_v2 = vpop.f32.mrf.mxu2 }
 0x595   :  { %v6189_v51 = vadd.f32 %v2731_v2, %v2713_v57 }
 0x597   :  { %v2742_v28 = vadd.f32 %v6189_v51, %v6187_v31 }
 0x599   :  { %2743 = vadd.xlane.f32.xlu1 %v2742_v28  ;;  %v2717_v12 = vpop.f32.mrf.mxu0 }
 0x59a   :  { %v2718_v6 = vadd.f32 %v2717_v12, %v2537_v48 }
 0x59c   :  { %v2734_v3 = vpop.f32.mrf.mxu2 }
 0x59d   :  { %v2735_v19 = vadd.f32 %v2734_v3, %v2716_v32 }
 0x59f   :  { %v2745_v38 = vadd.f32 %v2735_v19, %v2697_v23 }
 0x5a1   :  { %2746 = vadd.xlane.f32.xlu0 %v2745_v38 }
 0x5a4   :  { %v2736_v46 = vpop.f32.mrf.mxu2 }
 0x5a5   :  { %v2737_v47 = vadd.f32 %v2736_v46, %v2718_v6 }
 0x5a7   :  { %v2748_v10 = vadd.f32 %v2737_v47, %v2699_v29 }
 0x5a9   :  { %2749 = vadd.xlane.f32.xlu2 %v2748_v10 }
 0x604   :  { %v2741_v27 = vpop.xlane.xlu2 %2740 }
 0x605   :  { %v2755_v9 = vsub.f32 %v2741_v27, %v2751_v24 }
 0x607   :  { %v2766_v37 = vmul.f32 %v6194_v13, %v2755_v9 }
 0x609   :  { %2772 = vperm.xlu1 %4919, %v2766_v37  }
 0x60c   :  { %v2744_v25 = vpop.xlane.xlu1 %2743 }
 0x60d   :  { %v2756_v5 = vsub.f32 %v2744_v25, %v2752_v63 }
 0x60f   :  { %v2767_v21 = vmul.f32 %v6194_v13, %v2756_v5 }
 0x611   :  { %2777 = vperm.xlu0 %4918, %v2767_v21  }
 0x614   :  { %v2747_v15 = vpop.xlane.xlu0 %2746 }
 0x615   :  { %v2757_v57 = vsub.f32 %v2747_v15, %v2753_v62 }
 0x617   :  { %v2768_v2 = vmul.f32 %v6194_v13, %v2757_v57  ;;  %v2819_v57 = vsub.f32 %v5880_v4, %v2767_v21 }
 0x619   :  { %2782 = vperm.xlu2 %4920, %v2768_v2   ;;  %v2820_v24 = vsub.f32 %v5900_v40, %v2768_v2 }
 0x61b   :  { %v2824_v27 = vmul.f32 %v2820_v24, %v2820_v24 }
 0x61c   :  { %v2750_v16 = vpop.xlane.xlu2 %2749 }
 0x61d   :  { %v2758_v28 = vsub.f32 %v2750_v16, %v2754_v41 }
 0x61f   :  { %v2769_v60 = vmul.f32 %v6194_v13, %v2758_v28 }
 0x621   :  { %2787 = vperm.xlu0 %4918, %v2769_v60   ;;  %v2821_v4 = vsub.f32 %v5893_v39, %v2769_v60 }
 0x673   :  { %v2783_v50 = vpop.permute.xlu2 %2782 }
 0x674   :  { %v6203_v20 = vsub.f32 %v2697_v23, %v2783_v50  ;;  %v6205_v32 = vsub.f32 %v2735_v19, %v2783_v50  ;;  %v2823_v50 = vmul.f32 %v2819_v57, %v2819_v57  ;;  %v2432_v57 = vld [vmem:[%s6765_s9 + $0x28] sm:$0xff] }
 0x676   :  { %v2802_v3 = vmul.f32 %v6203_v20, %v6203_v20  ;;  %v2803_v38 = vmul.f32 %v6205_v32, %v6205_v32 }
 0x678   :  { %v2812_v0 = vadd.f32 %v2803_v38, %v2802_v3  ;;  %v2827_v3 = vmul.f32 48.0, %v2823_v50 }
 0x67a   :  { %2813 = vadd.xlane.f32.xlu0 %v2812_v0 }
 0x67b   :  { %v2773_v12 = vpop.permute.xlu1 %2772 }
 0x67c   :  { %v6212_v48 = vsub.f32 %v6181_v54, %v2773_v12  ;;  %v6215_v45 = vsub.f32 %v6183_v56, %v2773_v12 }
 0x67e   :  { %v2798_v23 = vmul.f32 %v6212_v48, %v6212_v48  ;;  %v2799_v19 = vmul.f32 %v6215_v45, %v6215_v45 }
 0x680   :  { %v2806_v52 = vadd.f32 %v2799_v19, %v2798_v23 }
 0x682   :  { %2807 = vadd.xlane.f32.xlu1 %v2806_v52 }
 0x683   :  { %v2778_v6 = vpop.permute.xlu0 %2777 }
 0x684   :  { %v6222_v46 = vsub.f32 %v6187_v31, %v2778_v6  ;;  %v6225_v10 = vsub.f32 %v6189_v51, %v2778_v6 }
 0x686   :  { %v2800_v54 = vmul.f32 %v6222_v46, %v6222_v46  ;;  %v2801_v56 = vmul.f32 %v6225_v10, %v6225_v10 }
 0x688   :  { %v2809_v18 = vadd.f32 %v2801_v56, %v2800_v54  ;;  %v2825_v56 = vmul.f32 %v2821_v4, %v2821_v4 }
 0x68a   :  { %2810 = vadd.xlane.f32.xlu2 %v2809_v18  ;;  %v2829_v24 = vmul.f32 48.0, %v2825_v56 }
 0x693   :  { %v2788_v58 = vpop.permute.xlu0 %2787 }
 0x694   :  { %v6231_v34 = vsub.f32 %v2699_v29, %v2788_v58  ;;  %v6233_v11 = vsub.f32 %v2737_v47, %v2788_v58  ;;  %v2828_v29 = vmul.f32 48.0, %v2824_v27  ;;  %v2818_v47 = vsub.f32 %v5885_v1, %v2766_v37 }
 0x696   :  { %v2804_v31 = vmul.f32 %v6231_v34, %v6231_v34  ;;  %v2805_v51 = vmul.f32 %v6233_v11, %v6233_v11  ;;  %v2822_v5 = vmul.f32 %v2818_v47, %v2818_v47 }
 0x698   :  { %v2815_v53 = vadd.f32 %v2805_v51, %v2804_v31  ;;  %v2826_v15 = vmul.f32 48.0, %v2822_v5 }
 0x69a   :  { %2816 = vadd.xlane.f32.xlu1 %v2815_v53  ;;  %v2431_v53 = vld [vmem:[%s6765_s9 + $0x20] sm:$0xff] }
 0x6b3   :  { %2916 = vperm.xlu1 %4919, %v2435_v30  }
 0x6ed   :  { %v2814_v9 = vpop.xlane.xlu0 %2813 }
 0x6ee   :  { %v2832_v63 = vsub.f32 %v2814_v9, %v2828_v29 }
 0x6f0   :  { %v2836_v25 = vmul.f32 %v2832_v63, %v6194_v13 }
 0x6f2   :  { %v2840_v62 = vadd.f32 1e-05, %v2836_v25 }
 0x6f4   :  { %5033 = vrsqrt.f32 %v2840_v62  ;;  %vm2868_vm8 = vweird.f32 %v2840_v62 }
 0x6f5   :  { %v2808_v41 = vpop.xlane.xlu1 %2807 }
 0x6f6   :  { %v2830_v16 = vsub.f32 %v2808_v41, %v2826_v15 }
 0x6f8   :  { %v2834_v28 = vmul.f32 %v2830_v16, %v6194_v13  ;;  %v2433_v16 = vld [vmem:[%s6765_s9 + $0x30] sm:$0xff] }
 0x6fa   :  { %v2838_v40 = vadd.f32 1e-05, %v2834_v28  ;;  %v5034_v2 = vpop.eup %5033 }
 0x6fb   :  { %v2863_v38 = vmul.f32 %v5034_v2, %v2840_v62  ;;  %vm2869_vm7 = vweird.f32 %v5034_v2 }
 0x6fc   :  { %5035 = vrsqrt.f32 %v2838_v40  ;;  %vm2848_vm5 = vweird.f32 %v2838_v40  ;;  %vm2870_vm10 = vmor %vm2868_vm8, %vm2869_vm7 }
 0x6fd   :  { %v2811_v1 = vpop.xlane.xlu2 %2810  ;;  %v2864_v19 = vmul.f32 %v5034_v2, %v2863_v38  ;;  %v2438_v38 = vld [vmem:[%s6765_s9 + $0x58] sm:$0xff] }
 0x6fe   :  { %v2831_v37 = vsub.f32 %v2811_v1, %v2827_v3 }
 0x6ff   :  { %v2865_v6 = vmul.f32 0.5, %v2864_v19  ;;  %v2437_v19 = vld [vmem:[%s6765_s9 + $0x50] sm:$0xff] }
 0x700   :  { %v2835_v0 = vmul.f32 %v2831_v37, %v6194_v13  ;;  %v2436_v37 = vld [vmem:[%s6765_s9 + $0x48] sm:$0xff] }
 0x701   :  { %v2866_v31 = vsub.f32 1.5, %v2865_v6  ;;  %v4642_v6 = vld [vmem:[#allocation6 + $0x168] sm:$0xf] }
 0x702   :  { %v5036_v12 = vpop.eup %5035  ;;  %v2839_v23 = vadd.f32 1e-05, %v2835_v0 }
 0x703   :  { %v2843_v52 = vmul.f32 %v5036_v12, %v2838_v40  ;;  %vm2849_vm4 = vweird.f32 %v5036_v12  ;;  %v2867_v63 = vmul.f32 %v5034_v2, %v2866_v31  ;;  %v4883_v31 = vld [vmem:[#allocation6 + $0x16c] sm:$0xf] }
 0x704   :  { %5037 = vrsqrt.f32 %v2839_v23  ;;  %vm2850_vm6 = vmor %vm2848_vm5, %vm2849_vm4  ;;  %vm2858_vm11 = vweird.f32 %v2839_v23 }
 0x705   :  { %v2844_v21 = vmul.f32 %v5036_v12, %v2843_v52  ;;  %v2871_v28 = vsel %vm2870_vm10, %v5034_v2, %v2867_v63  ;;  %v4859_v63 = vld [vmem:[#allocation6 + $0xac] sm:$0xf] }
 0x706   :  { %v2884_v62 = vmul.f32 %v2871_v28, %v2433_v16  ;;  %v4880_v16 = vld [vmem:[#allocation6 + $0x154] sm:$0xf]  ;;  %v4632_v28 = vld [vmem:[#allocation6 + $0x15c] sm:$0xf0] }
 0x707   :  { %v2845_v54 = vmul.f32 0.5, %v2844_v21 }
 0x709   :  { %v2846_v18 = vsub.f32 1.5, %v2845_v54  ;;  %v4884_v54 = vld [vmem:[#allocation6 + $0x170] sm:$0xf0] }
 0x70a   :  { %v5038_v58 = vpop.eup %5037  ;;  %v4643_v56 = vor.u32 %v4884_v54, %v4642_v6  ;;  %v4524_v6 = vld [vmem:[#allocation6 + $0x84] sm:$0xf0] }
 0x70b   :  { %v2853_v51 = vmul.f32 %v5038_v58, %v2839_v23  ;;  %v2847_v30 = vmul.f32 %v5036_v12, %v2846_v18  ;;  %vm2859_vm9 = vweird.f32 %v5038_v58  ;;  %v5149_v18 = vmov 65535  }
 0x70c   :  { %vm2860_vm12 = vmor %vm2858_vm11, %vm2859_vm9 }
 0x70d   :  { %v2854_v27 = vmul.f32 %v5038_v58, %v2853_v51  ;;  %v2817_v29 = vpop.xlane.xlu1 %2816  ;;  %v2851_v39 = vsel %vm2850_vm6, %v5036_v12, %v2847_v30  ;;  %v2434_v12 = vld [vmem:[%s6765_s9 + $0x38] sm:$0xff] }
 0x70e   :  { %v2833_v60 = vsub.f32 %v2817_v29, %v2829_v24  ;;  %v2882_v47 = vmul.f32 %v2851_v39, %v2431_v53  ;;  %v4644_v51 = vld [vmem:[#allocation6 + $0x174] sm:$0xf0]  ;;  %v4546_v24 = vld [vmem:[#allocation6 + $0xa8] sm:$0xf] }
 0x70f   :  { %v2855_v9 = vmul.f32 0.5, %v2854_v27  ;;  %v4647_v30 = vor.u32 %v4883_v31, %v4644_v51  ;;  %v4860_v27 = vld [vmem:[#allocation6 + $0xb0] sm:$0xf0] }
 0x710   :  { %v2837_v25 = vmul.f32 %v2833_v60, %v6194_v13  ;;  %2888 = vperm.xlu2 %4920, %v2882_v47  }
 0x711   :  { %v2856_v5 = vsub.f32 1.5, %v2855_v9  ;;  %v4547_v9 = vor.u32 %v4860_v27, %v4546_v24 }
 0x712   :  { %v2841_v15 = vadd.f32 1e-05, %v2837_v25  ;;  %v4548_v25 = vld [vmem:[#allocation6 + $0xb4] sm:$0xf0] }
 0x713   :  { %v2857_v41 = vmul.f32 %v5038_v58, %v2856_v5  ;;  %v4630_v5 = vld [vmem:[#allocation6 + $0x150] sm:$0xf]  ;;  %3281 = vmatpush.bf16.msrb.mxu1 %v4547_v9 }
 0x714   :  { %5039 = vrsqrt.f32 %v2841_v15  ;;  %vm2878_vm2 = vweird.f32 %v2841_v15 }
 0x715   :  { %v2861_v13 = vsel %vm2860_vm12, %v5038_v58, %v2857_v41  ;;  %v3270_v58 = vsel %vm1700_vm14, 4294967295, %v5149_v18  ;;  %v4881_v41 = vld [vmem:[#allocation6 + $0x158] sm:$0xf0]  ;;  %vm3503_vm14 = vcmask 785408  }
 0x716   :  { %v2883_v50 = vmul.f32 %v2861_v13, %v2432_v57  ;;  %v6272_v53 = vsel %vm3269_vm0, %v3270_v58, 0  ;;  %v4551_v57 = vor.u32 %v4859_v63, %v4548_v25  ;;  %v4631_v13 = vor.u32 %v4881_v41, %v4630_v5 }
 0x717   :  { %v3273_v47 = vand.u32 %v4643_v56, %v6272_v53 }
 0x718   :  { %2893 = vperm.xlu0 %4918, %v2883_v50   ;;  %2898 = vperm.xlu2 %4920, %v2884_v62   ;;  %v4534_v50 = vld [vmem:[#allocation6 + $0x90] sm:$0xf]  ;;  %v4856_v62 = vld [vmem:[#allocation6 + $0x94] sm:$0xf] }
 0x719   :  { %3300 = vmatpush.bf16.msra.mxu3 %v3273_v47  ;;  %3319 = vmatpush.bf16.msrb.mxu0 %v4551_v57 }
 0x71a   :  { %v5040_v40 = vpop.eup %5039 }
 0x71b   :  { %v2873_v3 = vmul.f32 %v5040_v40, %v2841_v15  ;;  %vm2879_vm13 = vweird.f32 %v5040_v40  ;;  %v3276_v15 = vand.u32 %v4647_v30, %v6272_v53 }
 0x71c   :  { %vm2880_vm3 = vmor %vm2878_vm2, %vm2879_vm13 }
 0x71d   :  { %v2874_v1 = vmul.f32 %v5040_v40, %v2873_v3  ;;  %3338 = vmatpush.bf16.msrb.mxu2 %v3276_v15  ;;  %3301 = vmatpush.bf16.msra.mxu3 %v4631_v13 }
 0x71f   :  { %v2875_v0 = vmul.f32 0.5, %v2874_v1  ;;  %v4536_v1 = vld [vmem:[#allocation6 + $0x9c] sm:$0xf0] }
 0x720   :  { %2921 = vperm.xlu0 %4918, %v2436_v37   ;;  %2931 = vperm.xlu2 %4920, %v2438_v38   ;;  %v4618_v37 = vld [vmem:[#allocation6 + $0x138] sm:$0xf]  ;;  %v4878_v38 = vld [vmem:[#allocation6 + $0x140] sm:$0xf0] }
 0x721   :  { %v2876_v2 = vsub.f32 1.5, %v2875_v0  ;;  %v4619_v56 = vor.u32 %v4878_v38, %v4618_v37  ;;  %v4608_v38 = vld [vmem:[#allocation6 + $0x12c] sm:$0xf0] }
 0x723   :  { %v2877_v23 = vmul.f32 %v5040_v40, %v2876_v2  ;;  %3302 = vmatpush.bf16.msra.mxu3 %v4619_v56  ;;  %v4872_v56 = vld [vmem:[#allocation6 + $0x110] sm:$0xf0] }
 0x725   :  { %v2881_v52 = vsel %vm2880_vm3, %v5040_v40, %v2877_v23  ;;  %v4635_v40 = vor.u32 %v4880_v16, %v4632_v28  ;;  %v4877_v23 = vld [vmem:[#allocation6 + $0x13c] sm:$0xf]  ;;  %vm2368_vm3 = vcmask 408576  }
 0x726   :  { %v2885_v4 = vmul.f32 %v2881_v52, %v2434_v12  ;;  %v4539_v12 = vor.u32 %v4856_v62, %v4536_v1  ;;  %v4522_v52 = vld [vmem:[#allocation6 + $0x78] sm:$0xf]  ;;  %v4874_v1 = vld [vmem:[#allocation6 + $0x124] sm:$0xf] }
 0x727   :  { %3339 = vmatpush.bf16.msrb.mxu2 %v4635_v40  ;;  %v4606_v40 = vld [vmem:[#allocation6 + $0x120] sm:$0xf] }
 0x728   :  { %2926 = vperm.xlu0 %4918, %v2437_v19   ;;  %2903 = vperm.xlu1 %4919, %v2885_v4   ;;  %v4620_v19 = vld [vmem:[#allocation6 + $0x144] sm:$0xf0]  ;;  %v4854_v4 = vld [vmem:[#allocation6 + $0x80] sm:$0xf0] }
 0x729   :  { %v4523_v18 = vor.u32 %v4854_v4, %v4522_v52  ;;  %3320 = vmatpush.bf16.msrb.mxu0 %v4539_v12  ;;  %v4623_v31 = vor.u32 %v4877_v23, %v4620_v19  ;;  %v4510_v12 = vld [vmem:[#allocation6 + $0x60] sm:$0xf]  ;;  %v4851_v23 = vld [vmem:[#allocation6 + $0x68] sm:$0xf0]  ;;  %v4611_v19 = vor.u32 %v4874_v1, %v4608_v38  ;;  %v4850_v4 = vld [vmem:[#allocation6 + $0x64] sm:$0xf] }
 0x72a   :  { %v4511_v52 = vor.u32 %v4851_v23, %v4510_v12  ;;  %v4570_v38 = vld [vmem:[#allocation6 + $0xd8] sm:$0xf]  ;;  %v4866_v12 = vld [vmem:[#allocation6 + $0xe0] sm:$0xf0] }
 0x72b   :  { %3340 = vmatpush.bf16.msrb.mxu2 %v4623_v31 }
 0x72f   :  { %3341 = vmatpush.bf16.msrb.mxu2 %v4611_v19  ;;  %v4865_v19 = vld [vmem:[#allocation6 + $0xdc] sm:$0xf] }
 0x76a   :  { %v2889_v21 = vpop.permute.xlu2 %2888 }
 0x76b   :  { %v2906_v29 = vmul.f32 %v2889_v21, %v6212_v48  ;;  %v2907_v39 = vmul.f32 %v2889_v21, %v6215_v45  ;;  %v4857_v48 = vld [vmem:[#allocation6 + $0x98] sm:$0xf0]  ;;  %v2917_v45 = vpop.permute.xlu1 %2916 }
 0x76c   :  { %v4535_v3 = vor.u32 %v4857_v48, %v4534_v50  ;;  %v4853_v21 = vld [vmem:[#allocation6 + $0x7c] sm:$0xf] }
 0x76d   :  { %v6278_v0 = vadd.f32 %v2917_v45, %v2906_v29  ;;  %v6280_v2 = vadd.f32 %v2917_v45, %v2907_v39  ;;  %v4527_v51 = vor.u32 %v4853_v21, %v4524_v6  ;;  %v4512_v21 = vld [vmem:[#allocation6 + $0x6c] sm:$0xf0]  ;;  %v4594_v6 = vld [vmem:[#allocation6 + $0x108] sm:$0xf] }
 0x76e   :  { %3282 = vmatpush.bf16.msrb.mxu1 %v4535_v3  ;;  %v4875_v3 = vld [vmem:[#allocation6 + $0x128] sm:$0xf0]  ;;  %v4595_v31 = vor.u32 %v4872_v56, %v4594_v6  ;;  %v4474_v6 = vld [vmem:[#allocation6 + $0x18] sm:$0xf]  ;;  %v4841_v56 = vld [vmem:[#allocation6 + $0x1c] sm:$0xf] }
 0x76f   :  { %v2942_v30 = vmax.f32 %v6278_v0, 0.0  ;;  %v2943_v24 = vmax.f32 %v6280_v2, 0.0  ;;  %3321 = vmatpush.bf16.msrb.mxu0 %v4527_v51  ;;  %v4607_v37 = vor.u32 %v4875_v3, %v4606_v40  ;;  %v4844_v40 = vld [vmem:[#allocation6 + $0x34] sm:$0xf]  ;;  %v4488_v3 = vld [vmem:[#allocation6 + $0x3c] sm:$0xf0] }
 0x770   :  { %v4491_v23 = vor.u32 %v4844_v40, %v4488_v3  ;;  %v4554_v3 = vld [vmem:[#allocation6 + $0xb0] sm:$0xf] }
 0x771   :  { %3303 = vmatpush.bf16.msra.mxu3 %v4607_v37 }
 0x772   :  { %v2899_v27 = vpop.permute.xlu2 %2898  ;;  %3283 = vmatpush.bf16.msrb.mxu1 %v4523_v18  ;;  %v4871_v18 = vld [vmem:[#allocation6 + $0x10c] sm:$0xf] }
 0x773   :  { %v2911_v9 = vmul.f32 %v2899_v27, %v6205_v32 }
 0x775   :  { %3304 = vmatpush.bf16.msra.mxu3 %v4595_v31 }
 0x776   :  { %3284 = vmatpush.bf16.msrb.mxu1 %v4511_v52  ;;  %v4572_v52 = vld [vmem:[#allocation6 + $0xe4] sm:$0xf0] }
 0x77a   :  { %v2932_v16 = vpop.permute.xlu2 %2931 }
 0x78a   :  { %v2894_v60 = vpop.permute.xlu0 %2893 }
 0x78b   :  { %v2908_v54 = vmul.f32 %v2894_v60, %v6222_v46  ;;  %v2909_v58 = vmul.f32 %v2894_v60, %v6225_v10  ;;  %v2910_v60 = vmul.f32 %v2899_v27, %v6203_v20  ;;  %v4498_v27 = vld [vmem:[#allocation6 + $0x48] sm:$0xf] }
 0x792   :  { %v2922_v29 = vpop.permute.xlu0 %2921 }
 0x793   :  { %v6286_v39 = vadd.f32 %v2922_v29, %v2908_v54  ;;  %v6288_v47 = vadd.f32 %v2922_v29, %v2909_v58  ;;  %v4515_v54 = vor.u32 %v4850_v4, %v4512_v21  ;;  %v4596_v58 = vld [vmem:[#allocation6 + $0x114] sm:$0xf0]  ;;  %v4848_v29 = vld [vmem:[#allocation6 + $0x50] sm:$0xf0]  ;;  %v4571_v4 = vor.u32 %v4866_v12, %v4570_v38 }
 0x794   :  { %v4599_v51 = vor.u32 %v4871_v18, %v4596_v58  ;;  %v4575_v21 = vor.u32 %v4865_v19, %v4572_v52  ;;  %v4476_v58 = vld [vmem:[#allocation6 + $0x24] sm:$0xf0]  ;;  %v4638_v12 = vld [vmem:[#allocation6 + $0x158] sm:$0xf] }
 0x795   :  { %v2944_v46 = vmax.f32 %v6286_v39, 0.0  ;;  %v2945_v10 = vmax.f32 %v6288_v47, 0.0  ;;  %3322 = vmatpush.bf16.msrb.mxu0 %v4515_v54  ;;  %v4842_v54 = vld [vmem:[#allocation6 + $0x20] sm:$0xf0]  ;;  %v4479_v31 = vor.u32 %v4841_v56, %v4476_v58  ;;  %v4542_v19 = vld [vmem:[#allocation6 + $0x98] sm:$0xf] }
 0x796   :  { %3342 = vmatpush.bf16.msrb.mxu2 %v4599_v51  ;;  %v4475_v18 = vor.u32 %v4842_v54, %v4474_v6  ;;  %v4558_v51 = vld [vmem:[#allocation6 + $0xc0] sm:$0xf]  ;;  %v4879_v6 = vld [vmem:[#allocation6 + $0x148] sm:$0xf0] }
 0x797   :  { %v5001_v28 = vpack.i.bf16 %v2945_v10, %v2943_v24  ;;  %v5006_v20 = vpack.i.bf16 %v2944_v46, %v2942_v30  ;;  %v4530_v56 = vld [vmem:[#allocation6 + $0x80] sm:$0xf] }
 0x799   :  { %5002 = vrot.lane.b32.xlu1 %v5001_v28, %s5144_s4  ;;  %5007 = vrot.lane.b32.xlu0 %v5006_v20, %s5144_s4  ;;  %v4584_v28 = vld [vmem:[#allocation6 + $0xfc] sm:$0xf0]  ;;  %v4486_v20 = vld [vmem:[#allocation6 + $0x30] sm:$0xf] }
 0x79a   :  { %v2904_v63 = vpop.permute.xlu1 %2903  ;;  %v2927_v25 = vpop.permute.xlu0 %2926 }
 0x79b   :  { %v2912_v5 = vmul.f32 %v2904_v63, %v6231_v34  ;;  %v2913_v15 = vmul.f32 %v2904_v63, %v6233_v11  ;;  %v6296_v57 = vadd.f32 %v2927_v25, %v2910_v60  ;;  %v6298_v41 = vadd.f32 %v2927_v25, %v2911_v9  ;;  %v4847_v60 = vld [vmem:[#allocation6 + $0x4c] sm:$0xf]  ;;  %v4500_v63 = vld [vmem:[#allocation6 + $0x54] sm:$0xf0]  ;;  %v4582_v25 = vld [vmem:[#allocation6 + $0xf0] sm:$0xf] }
 0x79c   :  { %v4499_v9 = vor.u32 %v4848_v29, %v4498_v27  ;;  %v4863_v27 = vld [vmem:[#allocation6 + $0xc8] sm:$0xf0]  ;;  %v4862_v29 = vld [vmem:[#allocation6 + $0xc4] sm:$0xf] }
 0x79d   :  { %v6308_v32 = vadd.f32 %v2932_v16, %v2912_v5  ;;  %v6310_v34 = vadd.f32 %v2932_v16, %v2913_v15  ;;  %v2946_v11 = vmax.f32 %v6296_v57, 0.0  ;;  %v2947_v13 = vmax.f32 %v6298_v41, 0.0  ;;  %v4869_v5 = vld [vmem:[#allocation6 + $0xf8] sm:$0xf0]  ;;  %v4868_v16 = vld [vmem:[#allocation6 + $0xf4] sm:$0xf] }
 0x79e   :  { %v4503_v15 = vor.u32 %v4847_v60, %v4500_v63  ;;  %3285 = vmatpush.bf16.msrb.mxu1 %v4499_v9  ;;  %v4587_v1 = vor.u32 %v4868_v16, %v4584_v28  ;;  %v4559_v60 = vor.u32 %v4863_v27, %v4558_v51  ;;  %v4560_v9 = vld [vmem:[#allocation6 + $0xcc] sm:$0xf0]  ;;  %v4462_v63 = vld [vmem:[#allocation6] sm:$0xf]  ;;  %v4838_v16 = vld [vmem:[#allocation6 + $0x4] sm:$0xf] }
 0x79f   :  { %v2948_v50 = vmax.f32 %v6308_v32, 0.0  ;;  %v2949_v48 = vmax.f32 %v6310_v34, 0.0  ;;  %v4464_v28 = vld [vmem:[#allocation6 + $0xc] sm:$0xf0]  ;;  %v4614_v51 = vld [vmem:[#allocation6 + $0x128] sm:$0xf] }
 0x7a0   :  { %3323 = vmatpush.bf16.msrb.mxu0 %v4503_v15  ;;  %3343 = vmatpush.bf16.msrb.mxu2 %v4587_v1  ;;  %v4861_v1 = vld [vmem:[#allocation6 + $0xb8] sm:$0xf0]  ;;  %v4876_v27 = vld [vmem:[#allocation6 + $0x130] sm:$0xf0] }
 0x7a1   :  { %v5011_v62 = vpack.i.bf16 %v2949_v48, %v2947_v13  ;;  %v5016_v45 = vpack.i.bf16 %v2948_v50, %v2946_v11 }
 0x7a3   :  { %5012 = vrot.lane.b32.xlu2 %v5011_v62, %s5144_s4  ;;  %5017 = vrot.lane.b32.xlu1 %v5016_v45, %s5144_s4  ;;  %v4583_v62 = vor.u32 %v4869_v5, %v4582_v25  ;;  %v4845_v45 = vld [vmem:[#allocation6 + $0x38] sm:$0xf0]  ;;  %v4839_v25 = vld [vmem:[#allocation6 + $0x8] sm:$0xf0]  ;;  %v4563_v5 = vor.u32 %v4862_v29, %v4560_v9  ;;  %v4518_v29 = vld [vmem:[#allocation6 + $0x68] sm:$0xf] }
 0x7a4   :  { %v4487_v37 = vor.u32 %v4845_v45, %v4486_v20  ;;  %3324 = vmatpush.bf16.msrb.mxu0 %v4491_v23  ;;  %3344 = vmatpush.bf16.msrb.mxu2 %v4575_v21  ;;  %v4463_v15 = vor.u32 %v4839_v25, %v4462_v63  ;;  %v4650_v20 = vld [vmem:[#allocation6 + $0x170] sm:$0xf]  ;;  %v4885_v45 = vld [vmem:[#allocation6 + $0x178] sm:$0xf0]  ;;  %v4882_v23 = vld [vmem:[#allocation6 + $0x160] sm:$0xf0] }
 0x7a5   :  { %3305 = vmatpush.bf16.msra.mxu3 %v4583_v62  ;;  %v4467_v62 = vor.u32 %v4838_v16, %v4464_v28  ;;  %v4651_v40 = vor.u32 %v4885_v45, %v4650_v20  ;;  %v4639_v52 = vor.u32 %v4882_v23, %v4638_v12  ;;  %v4626_v21 = vld [vmem:[#allocation6 + $0x140] sm:$0xf]  ;;  %v4602_v63 = vld [vmem:[#allocation6 + $0x110] sm:$0xf]  ;;  %v4873_v25 = vld [vmem:[#allocation6 + $0x118] sm:$0xf0] }
 0x7a6   :  { %3286 = vmatpush.bf16.msrb.mxu1 %v4487_v37  ;;  %v4555_v37 = vor.u32 %v4861_v1, %v4554_v3  ;;  %v4627_v58 = vor.u32 %v4879_v6, %v4626_v21  ;;  %v4849_v16 = vld [vmem:[#allocation6 + $0x58] sm:$0xf0]  ;;  %v4590_v28 = vld [vmem:[#allocation6 + $0xf8] sm:$0xf]  ;;  %v4870_v20 = vld [vmem:[#allocation6 + $0x100] sm:$0xf0] }
 0x7a7   :  { %v3279_v38 = vand.u32 %v4651_v40, %v6272_v53  ;;  %v4852_v53 = vld [vmem:[#allocation6 + $0x70] sm:$0xf0]  ;;  %v4494_v45 = vld [vmem:[#allocation6 + $0x38] sm:$0xf]  ;;  %v4846_v40 = vld [vmem:[#allocation6 + $0x40] sm:$0xf0]  ;;  %v4591_v3 = vor.u32 %v4870_v20, %v4590_v28 }
 0x7a8   :  { %3325 = vmatpush.bf16.msrb.mxu0 %v4479_v31  ;;  %3345 = vmatpush.bf16.msrb.mxu2 %v4563_v5  ;;  %v4519_v9 = vor.u32 %v4852_v53, %v4518_v29  ;;  %v4506_v5 = vld [vmem:[#allocation6 + $0x50] sm:$0xf]  ;;  %v4495_v1 = vor.u32 %v4846_v40, %v4494_v45  ;;  %v4482_v12 = vld [vmem:[#allocation6 + $0x20] sm:$0xf]  ;;  %v4843_v23 = vld [vmem:[#allocation6 + $0x28] sm:$0xf0] }
 0x7a9   :  { %3306 = vmatpush.bf16.msra.mxu3 %v4571_v4  ;;  %v4858_v4 = vld [vmem:[#allocation6 + $0xa0] sm:$0xf0]  ;;  %v4483_v21 = vor.u32 %v4843_v23, %v4482_v12 }
 0x7aa   :  { %3287 = vmatpush.bf16.msrb.mxu1 %v4475_v18  ;;  %v4543_v54 = vor.u32 %v4858_v4, %v4542_v19  ;;  %v4855_v18 = vld [vmem:[#allocation6 + $0x88] sm:$0xf0] }
 0x7ab   :  { %v4531_v31 = vor.u32 %v4855_v18, %v4530_v56 }
 0x7ac   :  { %3326 = vmatpush.bf16.msrb.mxu0 %v4467_v62  ;;  %v4507_v62 = vor.u32 %v4849_v16, %v4506_v5 }
 0x7ad   :  { %3307 = vmatpush.bf16.msra.mxu3 %v4559_v60  ;;  %v4615_v60 = vor.u32 %v4876_v27, %v4614_v51  ;;  %v4470_v51 = vld [vmem:[#allocation6 + $0x8] sm:$0xf]  ;;  %v4840_v27 = vld [vmem:[#allocation6 + $0x10] sm:$0xf0] }
 0x7ae   :  { %3288 = vmatpush.bf16.msrb.mxu1 %v4463_v15  ;;  %v4603_v15 = vor.u32 %v4873_v25, %v4602_v63  ;;  %v4471_v16 = vor.u32 %v4840_v27, %v4470_v51 }
 0x7b1   :  { %3376 = vmatpush.bf16.msrb.mxu3 %v3279_v38  ;;  %v4867_v38 = vld [vmem:[#allocation6 + $0xe8] sm:$0xf0] }
 0x7b2   :  { %3357 = vmatpush.bf16.msra.mxu1 %v4555_v37  ;;  %v4578_v37 = vld [vmem:[#allocation6 + $0xe0] sm:$0xf] }
 0x7b3   :  { %v4579_v4 = vor.u32 %v4867_v38, %v4578_v37 }
 0x7b5   :  { %3377 = vmatpush.bf16.msrb.mxu3 %v4639_v52 }
 0x7b6   :  { %3358 = vmatpush.bf16.msra.mxu1 %v4543_v54 }
 0x7b9   :  { %3378 = vmatpush.bf16.msrb.mxu3 %v4627_v58  ;;  %v4566_v58 = vld [vmem:[#allocation6 + $0xc8] sm:$0xf] }
 0x7ba   :  { %3359 = vmatpush.bf16.msra.mxu1 %v4531_v31  ;;  %v4864_v31 = vld [vmem:[#allocation6 + $0xd0] sm:$0xf0] }
 0x7bd   :  { %3379 = vmatpush.bf16.msrb.mxu3 %v4615_v60 }
 0x7be   :  { %3360 = vmatpush.bf16.msra.mxu1 %v4519_v9 }
 0x7c1   :  { %3380 = vmatpush.bf16.msrb.mxu3 %v4603_v15  ;;  %v4567_v15 = vor.u32 %v4864_v31, %v4566_v58 }
 0x7c2   :  { %3361 = vmatpush.bf16.msra.mxu1 %v4507_v62 }
 0x7c5   :  { %3381 = vmatpush.bf16.msrb.mxu3 %v4591_v3 }
 0x7c6   :  { %3362 = vmatpush.bf16.msra.mxu1 %v4495_v1 }
 0x7c9   :  { %3382 = vmatpush.bf16.msrb.mxu3 %v4579_v4 }
 0x7ca   :  { %3363 = vmatpush.bf16.msra.mxu1 %v4483_v21 }
 0x7cd   :  { %3383 = vmatpush.bf16.msrb.mxu3 %v4567_v15 }
 0x7ce   :  { %3364 = vmatpush.bf16.msra.mxu1 %v4471_v16 }
 0x80b   :  { %v5003_v19 = vpop.permute.xlu1 %5002  ;;  %v5008_v52 = vpop.permute.xlu0 %5007 }
 0x80c   :  { %v5005_v6 = vunpack.i.h.bf16 %v5003_v19  ;;  %v5004_v54 = vunpack.i.l.bf16 %v5003_v19  ;;  %v5010_v56 = vunpack.i.h.bf16 %v5008_v52  ;;  %v5009_v18 = vunpack.i.l.bf16 %v5008_v52 }
 0x80e   :  { %v3001_v29 = vmax.f32 %v2945_v10, %v5005_v6  ;;  %v2999_v53 = vmax.f32 %v2943_v24, %v5004_v54  ;;  %v2987_v60 = vsel %vm1031_vm15, %v5010_v56, %v5005_v6  ;;  %v2986_v9 = vsel %vm1031_vm15, %v5009_v18, %v5004_v54  ;;  %v5013_v24 = vpop.permute.xlu2 %5012 }
 0x80f   :  { %v3000_v63 = vmax.f32 %v2944_v46, %v2987_v60  ;;  %v2998_v25 = vmax.f32 %v2942_v30, %v2986_v9  ;;  %v5015_v0 = vunpack.i.h.bf16 %v5013_v24  ;;  %v5014_v30 = vunpack.i.l.bf16 %v5013_v24 }
 0x810   :  { %v3007_v5 = vpack.c.bf16 %v3001_v29, %v2999_v53 }
 0x811   :  { %v3006_v47 = vpack.c.bf16 %v3000_v63, %v2998_v25  ;;  %v3005_v20 = vmax.f32 %v2949_v48, %v5015_v0  ;;  %v3003_v62 = vmax.f32 %v2947_v13, %v5014_v30 }
 0x812   :  { %4652 = vmatmul.msk.bf16.vlgmr.msra.gmra.mxu3 %vm1031_vm15, %v3007_v5  ;;  %4654 = vmatmul.msk.bf16.vlgmr.msrb.gmra.mxu2 %vm1031_vm15, %v3007_v5 }
 0x813   :  { %3289 = vmatmul.bf16.vlgmr.msrb.gmra.mxu1 %v3006_v47  ;;  %3327 = vmatmul.bf16.vlgmr.msrb.gmra.mxu0 %v3006_v47  ;;  %v3009_v3 = vpack.c.bf16 %v3005_v20, %v3003_v62 }
 0x815   :  { %v5018_v2 = vpop.permute.xlu1 %5017 }
 0x816   :  { %v5020_v39 = vunpack.i.h.bf16 %v5018_v2  ;;  %v5019_v46 = vunpack.i.l.bf16 %v5018_v2 }
 0x818   :  { %v2989_v10 = vsel %vm1031_vm15, %v5020_v39, %v5015_v0  ;;  %v2988_v28 = vsel %vm1031_vm15, %v5019_v46, %v5014_v30 }
 0x819   :  { %v3002_v45 = vmax.f32 %v2946_v11, %v2988_v28  ;;  %v3004_v40 = vmax.f32 %v2948_v50, %v2989_v10 }
 0x81b   :  { %v3008_v1 = vpack.c.bf16 %v3004_v40, %v3002_v45 }
 0x822   :  { %4653 = vmatmul.msk.bf16.gmra.mxu3 %vm1031_vm15, %v3009_v3  ;;  %4655 = vmatmul.msk.bf16.gmra.mxu2 %vm1031_vm15, %v3009_v3 }
 0x823   :  { %3294 = vmatmul.bf16.gmra.mxu1 %v3008_v1  ;;  %3332 = vmatmul.bf16.gmra.mxu0 %v3008_v1 }
 0x832   :  { %4656 = vmatmul.msk.bf16.vlgmr.msrb.gmra.mxu3 %vm1031_vm15, %v3007_v5 }
 0x833   :  { %3365 = vmatmul.bf16.vlgmr.msra.gmra.mxu1 %v3006_v47 }
 0x842   :  { %4657 = vmatmul.msk.bf16.gmra.mxu3 %vm1031_vm15, %v3009_v3 }
 0x843   :  { %3370 = vmatmul.bf16.gmra.mxu1 %v3008_v1 }
 0x890   :  { %v3290_v41 = vpop.f32.mrf.mxu1  ;;  %v3328_v57 = vpop.f32.mrf.mxu0 }
 0x895   :  { %v3309_v34 = vpop.f32.mrf.mxu3  ;;  %v3347_v11 = vpop.f32.mrf.mxu2 }
 0x896   :  { %v3310_v50 = vadd.f32 %v3309_v34, %v3290_v41  ;;  %v3348_v48 = vadd.f32 %v3347_v11, %v3328_v57 }
 0x898   :  { %v3292_v32 = vpop.f32.mrf.mxu1  ;;  %v3330_v13 = vpop.f32.mrf.mxu0  ;;  %v3395_v12 = vpack.c.bf16 %v3348_v48, %v3310_v50 }
 0x89a   :  { %v3408_v21 = vunpack.c.h.b16 %v3395_v12 }
 0x89d   :  { %v3311_v37 = vpop.f32.mrf.mxu3  ;;  %v3349_v38 = vpop.f32.mrf.mxu2 }
 0x89e   :  { %v3312_v23 = vadd.f32 %v3311_v37, %v3292_v32  ;;  %v3350_v19 = vadd.f32 %v3349_v38, %v3330_v13  ;;  %v3407_v37 = vunpack.c.l.b16 %v3395_v12  ;;  %v286_v12 = vld [vmem:[%s6763_s7 + $0x18] sm:$0xff] }
 0x8a0   :  { %v3397_v52 = vpack.c.bf16 %v3350_v19, %v3312_v23  ;;  %v3295_v4 = vpop.f32.mrf.mxu1  ;;  %v3333_v54 = vpop.f32.mrf.mxu0 }
 0x8a2   :  { %v3410_v6 = vunpack.c.h.b16 %v3397_v52  ;;  %v3409_v13 = vunpack.c.l.b16 %v3397_v52  ;;  %v283_v52 = vld [vmem:[%s6763_s7] sm:$0xff] }
 0x8a4   :  { %v6355_v56 = vpack.c.b16 %v3410_v6, %v3408_v21  ;;  %v6366_v23 = vpack.c.b16 %v3409_v13, %v3407_v37  ;;  %v285_v6 = vld [vmem:[%s6763_s7 + $0x10] sm:$0xff] }
 0x8a5   :  { %v3314_v18 = vpop.f32.mrf.mxu3  ;;  %v3352_v58 = vpop.f32.mrf.mxu2 }
 0x8a6   :  { %3455 = vrot.lane.b32.xlu1 %v6355_v56, %s5145_s10  ;;  %v3315_v51 = vadd.f32 %v3314_v18, %v3295_v4  ;;  %v3353_v27 = vadd.f32 %v3352_v58, %v3333_v54  ;;  %v284_v54 = vld [vmem:[%s6763_s7 + $0x8] sm:$0xff] }
 0x8a8   :  { %v3297_v31 = vpop.f32.mrf.mxu1  ;;  %v3335_v29 = vpop.f32.mrf.mxu0  ;;  %v3399_v9 = vpack.c.bf16 %v3353_v27, %v3315_v51 }
 0x8aa   :  { %v3412_v16 = vunpack.c.h.b16 %v3399_v9  ;;  %v3411_v4 = vunpack.c.l.b16 %v3399_v9 }
 0x8ad   :  { %v3316_v53 = vpop.f32.mrf.mxu3  ;;  %v3354_v60 = vpop.f32.mrf.mxu2 }
 0x8ae   :  { %v3317_v63 = vadd.f32 %v3316_v53, %v3297_v31  ;;  %v3355_v25 = vadd.f32 %v3354_v60, %v3335_v29 }
 0x8b0   :  { %v3401_v5 = vpack.c.bf16 %v3355_v25, %v3317_v63  ;;  %v3366_v15 = vpop.f32.mrf.mxu1 }
 0x8b2   :  { %v3414_v47 = vunpack.c.h.b16 %v3401_v5  ;;  %v3413_v19 = vunpack.c.l.b16 %v3401_v5 }
 0x8b4   :  { %v6359_v2 = vpack.c.b16 %v3414_v47, %v3412_v16  ;;  %v6372_v21 = vpack.c.b16 %v3413_v19, %v3411_v4  ;;  %v94_v47 = vld [vmem:[%s6758_s2] sm:$0x3] }
 0x8b5   :  { %v3385_v24 = vpop.f32.mrf.mxu3 }
 0x8b6   :  { %3461 = vrot.lane.b32.xlu0 %v6359_v2, %s5145_s10  ;;  %v3386_v46 = vadd.f32 %v3385_v24, %v3366_v15 }
 0x8b8   :  { %v3368_v39 = vpop.f32.mrf.mxu1  ;;  %v3396_v30 = vpack.c.bf16 %v3386_v46, %v3386_v46  ;;  %v6402_v46 = vperm.slane %v94_v47, 0 }
 0x8ba   :  { %v3427_v20 = vunpack.c.l.b16 %v3396_v30 }
 0x8bd   :  { %v3387_v0 = vpop.f32.mrf.mxu3 }
 0x8be   :  { %v3388_v10 = vadd.f32 %v3387_v0, %v3368_v39 }
 0x8c0   :  { %v3398_v28 = vpack.c.bf16 %v3388_v10, %v3388_v10  ;;  %v3371_v45 = vpop.f32.mrf.mxu1 }
 0x8c2   :  { %v3428_v62 = vunpack.c.l.b16 %v3398_v28 }
 0x8c4   :  { %v3431_v40 = vpack.c.b16 %v3428_v62, %v3427_v20  ;;  %v6407_v20 = vperm.slane %v94_v47, 1 }
 0x8c5   :  { %v3390_v3 = vpop.f32.mrf.mxu3 }
 0x8c6   :  { %3457 = vrot.lane.b32.xlu0 %v3431_v40, %s5145_s10  ;;  %v3391_v1 = vadd.f32 %v3390_v3, %v3371_v45 }
 0x8c8   :  { %v3373_v41 = vpop.f32.mrf.mxu1  ;;  %v3400_v34 = vpack.c.bf16 %v3391_v1, %v3391_v1 }
 0x8ca   :  { %v3429_v50 = vunpack.c.l.b16 %v3400_v34 }
 0x8cd   :  { %v3392_v57 = vpop.f32.mrf.mxu3 }
 0x8ce   :  { %v3393_v11 = vadd.f32 %v3392_v57, %v3373_v41  ;;  %3435 = vrot.lane.b32.xlu0 %v6355_v56, %s5144_s4 }
 0x8d0   :  { %v3402_v32 = vpack.c.bf16 %v3393_v11, %v3393_v11 }
 0x8d2   :  { %v3430_v48 = vunpack.c.l.b16 %v3402_v32 }
 0x8d4   :  { %v3432_v38 = vpack.c.b16 %v3430_v48, %v3429_v50 }
 0x8d6   :  { %3443 = vrot.lane.b32.xlu1 %v3432_v38, %s5144_s4  ;;  %3463 = vrot.lane.b32.xlu2 %v3432_v38, %s5145_s10 }
 0x8d7   :  { %3453 = vrot.lane.b32.xlu0 %v6366_v23, %s5145_s10 }
 0x8de   :  { %3441 = vrot.lane.b32.xlu2 %v6359_v2, %s5144_s4  ;;  %3459 = vrot.lane.b32.xlu1 %v6372_v21, %s5145_s10 }
 0x8df   :  { %2062 = vperm.xlu0 %4918, %v283_v52   ;;  %v5150_v52 = vmov 100.0  }
 0x8e0   :  { %5041 = vrcp.f32 %v5150_v52 }
 0x8e6   :  { %3437 = vrot.lane.b32.xlu2 %v3431_v40, %s5144_s4  ;;  %3433 = vrot.lane.b32.xlu1 %v6366_v23, %s5144_s4 }
 0x8e7   :  { %2077 = vperm.xlu0 %4918, %v286_v12   ;;  %v4887_v12 = vld [vmem:[%s6767_s11 + $0x8] sm:$0xff] }
 0x8ee   :  { %3439 = vrot.lane.b32.xlu2 %v6372_v21, %s5144_s4  ;;  %2072 = vperm.xlu1 %4919, %v285_v6  }
 0x8f6   :  { %2067 = vperm.xlu2 %4920, %v284_v54  }
 0x918   :  { %v3456_v51 = vpop.permute.xlu1 %3455 }
 0x928   :  { %v3462_v18 = vpop.permute.xlu0 %3461 }
 0x930   :  { %v3464_v58 = vpop.permute.xlu2 %3463 }
 0x931   :  { %v3468_v31 = vsel %vm1132_vm1, %v3462_v18, %v3464_v58 }
 0x932   :  { %3531 = vmatpush.bf16.msra.mxu2 %v3468_v31 }
 0x938   :  { %v3442_v27 = vpop.permute.xlu2 %3441  ;;  %v3458_v29 = vpop.permute.xlu0 %3457 }
 0x939   :  { %v3466_v53 = vsel %vm1132_vm1, %v3456_v51, %v3458_v29 }
 0x93a   :  { %3532 = vmatpush.bf16.msra.mxu2 %v3466_v53 }
 0x940   :  { %v3438_v60 = vpop.permute.xlu2 %3437  ;;  %v3436_v9 = vpop.permute.xlu0 %3435 }
 0x941   :  { %v3446_v16 = vsel %vm1031_vm15, %v3436_v9, %v3438_v60 }
 0x948   :  { %v3444_v63 = vpop.permute.xlu1 %3443  ;;  %v3440_v25 = vpop.permute.xlu2 %3439 }
 0x949   :  { %v3454_v5 = vpop.permute.xlu0 %3453  ;;  %v3448_v15 = vsel %vm1031_vm15, %v3442_v27, %v3444_v63  ;;  %v3447_v57 = vsel %vm1031_vm15, %v3440_v25, %v3442_v27 }
 0x94a   :  { %3533 = vmatpush.bf16.msra.mxu2 %v3448_v15 }
 0x94e   :  { %3534 = vmatpush.bf16.msra.mxu2 %v3446_v16 }
 0x950   :  { %v2068_v24 = vpop.permute.xlu2 %2067  ;;  %v3460_v39 = vpop.permute.xlu1 %3459 }
 0x951   :  { %v2063_v0 = vpop.permute.xlu0 %2062  ;;  %v2116_v30 = vadd.f32 %v6155_v49, %v2068_v24  ;;  %v2154_v10 = vadd.f32 %v6159_v22, %v2068_v24  ;;  %v3467_v28 = vsel %vm1132_vm1, %v3460_v39, %v3462_v18 }
 0x952   :  { %v2114_v62 = vadd.f32 %v6149_v42, %v2063_v0  ;;  %v2152_v45 = vadd.f32 %v6153_v26, %v2063_v0  ;;  %3512 = vmatpush.bf16.msra.mxu0 %v3467_v28  ;;  %4896 = vmatpush.bf16.msrb.mxu1 %v3467_v28  ;;  %v3465_v42 = vsel %vm1132_vm1, %v3454_v5, %v3456_v51 }
 0x953   :  { %v6412_v40 = vadd.f32 %v6157_v36, %v2116_v30  ;;  %v6415_v3 = vadd.f32 %v6169_v17, %v2154_v10  ;;  %3535 = vmatpush.bf16.msra.mxu2 %v6359_v2 }
 0x954   :  { %v6419_v49 = vadd.f32 %v6151_v55, %v2114_v62  ;;  %v6422_v22 = vadd.f32 %v6161_v35, %v2152_v45 }
 0x955   :  { %v2187_v26 = vmul.f32 %v6402_v46, %v6412_v40  ;;  %v2188_v36 = vmul.f32 %v6407_v20, %v6415_v3 }
 0x956   :  { %3513 = vmatpush.bf16.msra.mxu0 %v3465_v42  ;;  %4897 = vmatpush.bf16.msrb.mxu1 %v3465_v42  ;;  %v2185_v17 = vmul.f32 %v6402_v46, %v6419_v49  ;;  %v2186_v55 = vmul.f32 %v6407_v20, %v6422_v22 }
 0x957   :  { %3536 = vmatpush.bf16.msra.mxu2 %v6355_v56  ;;  %v2196_v35 = vadd.f32 %v2188_v36, %v2187_v26 }
 0x958   :  { %v3434_v2 = vpop.permute.xlu1 %3433  ;;  %v2193_v1 = vadd.f32 %v2186_v55, %v2185_v17 }
 0x959   :  { %v2078_v41 = vpop.permute.xlu0 %2077  ;;  %2197 = vadd.xlane.f32.xlu1 %v2196_v35  ;;  %v3445_v56 = vsel %vm1031_vm15, %v3434_v2, %v3436_v9 }
 0x95a   :  { %v2121_v34 = vadd.f32 %v6171_v59, %v2078_v41  ;;  %v2159_v11 = vadd.f32 %v6175_v8, %v2078_v41  ;;  %2194 = vadd.xlane.f32.xlu2 %v2193_v1  ;;  %3514 = vmatpush.bf16.msra.mxu0 %v3447_v57 }
 0x95b   :  { %4898 = vmatpush.bf16.msrb.mxu1 %v3447_v57  ;;  %v2508_v57 = vld [vmem:[%s6768_s12 + $0x8] sm:$0xff] }
 0x95c   :  { %v2140_v32 = vadd.f32 %v6173_v43, %v2121_v34  ;;  %v2178_v13 = vadd.f32 %v6179_v44, %v2159_v11  ;;  %v2507_v34 = vld [vmem:[%s6768_s12] sm:$0xff]  ;;  %v2510_v11 = vld [vmem:[%s6768_s12 + $0x18] sm:$0xff] }
 0x95e   :  { %3515 = vmatpush.bf16.msra.mxu0 %v3445_v56  ;;  %v2191_v50 = vmul.f32 %v6402_v46, %v2140_v32  ;;  %v2192_v48 = vmul.f32 %v6407_v20, %v2178_v13 }
 0x95f   :  { %4899 = vmatpush.bf16.msrb.mxu1 %v3445_v56 }
 0x960   :  { %v2073_v37 = vpop.permute.xlu1 %2072  ;;  %v2202_v38 = vadd.f32 %v2192_v48, %v2191_v50 }
 0x961   :  { %v2119_v59 = vadd.f32 %v6163_v33, %v2073_v37  ;;  %v2157_v8 = vadd.f32 %v6167_v7, %v2073_v37  ;;  %v4886_v7 = vld [vmem:[%s6767_s11] sm:$0xff] }
 0x962   :  { %2203 = vadd.xlane.f32.xlu2 %v2202_v38  ;;  %3516 = vmatpush.bf16.msra.mxu0 %v6372_v21 }
 0x963   :  { %v2138_v43 = vadd.f32 %v6165_v14, %v2119_v59  ;;  %v2176_v44 = vadd.f32 %v6177_v61, %v2157_v8  ;;  %4900 = vmatpush.bf16.msrb.mxu1 %v6372_v21  ;;  %4668 = vmatmul.msk.bf16.vlgmr.msra.gmra.mxu2 %vm3503_vm14, %v4886_v7  ;;  %v5042_v14 = vpop.eup %5041 }
 0x964   :  { %v2206_v61 = vmul.f32 100.0, %v5042_v14  ;;  %vm2210_vm15 = vweird.f32 %v5042_v14 }
 0x965   :  { %v2189_v19 = vmul.f32 %v6402_v46, %v2138_v43  ;;  %v2190_v4 = vmul.f32 %v6407_v20, %v2176_v44 }
 0x966   :  { %3517 = vmatpush.bf16.msra.mxu0 %v6366_v23  ;;  %v2207_v21 = vsub.f32 1.0, %v2206_v61 }
 0x967   :  { %4901 = vmatpush.bf16.msrb.mxu1 %v6366_v23  ;;  %v2199_v33 = vadd.f32 %v2190_v4, %v2189_v19 }
 0x968   :  { %v2208_v6 = vmul.f32 %v5042_v14, %v2207_v21 }
 0x969   :  { %2200 = vadd.xlane.f32.xlu0 %v2199_v33  ;;  %4666 = vmatmul.msk.bf16.vlgmr.msra.gmra.mxu0 %vm3503_vm14, %v4886_v7 }
 0x96a   :  { %4667 = vmatmul.msk.bf16.vlgmr.msrb.gmra.mxu1 %vm3503_vm14, %v4887_v12  ;;  %v2209_v23 = vadd.f32 %v5042_v14, %v2208_v6 }
 0x96c   :  { %v6458_v54 = vsel %vm2210_vm15, %v5042_v14, %v2209_v23 }
 0x973   :  { %4669 = vmatmul.msk.bf16.gmra.mxu2 %vm3503_vm14, %v4887_v12 }
 0x9cc   :  { %v2198_v18 = vpop.xlane.xlu1 %2197 }
 0x9cd   :  { %v2213_v58 = vmul.f32 %v6458_v54, %v2198_v18  ;;  %v2195_v31 = vpop.xlane.xlu2 %2194 }
 0x9ce   :  { %v2212_v51 = vmul.f32 %v6458_v54, %v2195_v31 }
 0x9cf   :  { %v6463_v27 = vsub.f32 %v6412_v40, %v2213_v58  ;;  %v6466_v29 = vsub.f32 %v6415_v3, %v2213_v58 }
 0x9d0   :  { %v6469_v53 = vsub.f32 %v6419_v49, %v2212_v51  ;;  %v6472_v60 = vsub.f32 %v6422_v22, %v2212_v51 }
 0x9d1   :  { %v2226_v9 = vmul.f32 %v6463_v27, %v6463_v27  ;;  %v2227_v63 = vmul.f32 %v6466_v29, %v6466_v29 }
 0x9d2   :  { %v2224_v25 = vmul.f32 %v6469_v53, %v6469_v53  ;;  %v2225_v5 = vmul.f32 %v6472_v60, %v6472_v60 }
 0x9d3   :  { %v2234_v15 = vmul.f32 %v2226_v9, %v6402_v46  ;;  %v2235_v16 = vmul.f32 %v2227_v63, %v6407_v20  ;;  %v287_v9 = vld [vmem:[%s6763_s7 + $0x20] sm:$0xff] }
 0x9d4   :  { %v2232_v47 = vmul.f32 %v2224_v25, %v6402_v46  ;;  %v2233_v24 = vmul.f32 %v2225_v5, %v6407_v20 }
 0x9d5   :  { %v2204_v39 = vpop.xlane.xlu2 %2203  ;;  %v2243_v0 = vadd.f32 %v2235_v16, %v2234_v15 }
 0x9d6   :  { %v2215_v30 = vmul.f32 %v6458_v54, %v2204_v39  ;;  %v2240_v10 = vadd.f32 %v2233_v24, %v2232_v47 }
 0x9d7   :  { %2244 = vadd.xlane.f32.xlu0 %v2243_v0 }
 0x9d8   :  { %v6487_v28 = vsub.f32 %v2140_v32, %v2215_v30  ;;  %v6489_v62 = vsub.f32 %v2178_v13, %v2215_v30  ;;  %2241 = vadd.xlane.f32.xlu1 %v2240_v10  ;;  %v291_v32 = vld [vmem:[%s6763_s7 + $0x40] sm:$0xff] }
 0x9da   :  { %v2230_v45 = vmul.f32 %v6487_v28, %v6487_v28  ;;  %v2231_v40 = vmul.f32 %v6489_v62, %v6489_v62 }
 0x9dc   :  { %v2201_v3 = vpop.xlane.xlu0 %2200  ;;  %v2238_v49 = vmul.f32 %v2230_v45, %v6402_v46  ;;  %v2239_v22 = vmul.f32 %v2231_v40, %v6407_v20 }
 0x9dd   :  { %v2214_v42 = vmul.f32 %v6458_v54, %v2201_v3 }
 0x9de   :  { %v2249_v26 = vadd.f32 %v2239_v22, %v2238_v49 }
 0x9df   :  { %v6498_v36 = vsub.f32 %v2138_v43, %v2214_v42  ;;  %v6500_v17 = vsub.f32 %v2176_v44, %v2214_v42 }
 0x9e0   :  { %2250 = vadd.xlane.f32.xlu1 %v2249_v26 }
 0x9e1   :  { %v2228_v55 = vmul.f32 %v6498_v36, %v6498_v36  ;;  %v2229_v35 = vmul.f32 %v6500_v17, %v6500_v17 }
 0x9e3   :  { %v2236_v2 = vmul.f32 %v2228_v55, %v6402_v46  ;;  %v2237_v1 = vmul.f32 %v2229_v35, %v6407_v20 }
 0x9e5   :  { %v2246_v41 = vadd.f32 %v2237_v1, %v2236_v2  ;;  %v2509_v1 = vld [vmem:[%s6768_s12 + $0x10] sm:$0xff] }
 0x9e6   :  { %v3538_v56 = vpop.f32.mrf.mxu2  ;;  %v3519_v51 = vpop.f32.mrf.mxu0 }
 0x9e7   :  { %2247 = vadd.xlane.f32.xlu2 %v2246_v41  ;;  %v6532_v18 = vpop.f32.mrf.mxu1 }
 0x9ee   :  { %v6523_v44 = vpop.f32.mrf.mxu2 }
 0x9ef   :  { %v3526_v26 = vpop.f32.mrf.mxu1 }
 0x9f6   :  { %v6534_v58 = vpop.f32.mrf.mxu2 }
 0x9f9   :  { %3480 = vperm.xlu1 %4919, %v2508_v57  }
 0x9fe   :  { %v3545_v55 = vpop.f32.mrf.mxu2 }
 0x9ff   :  { %3475 = vperm.xlu2 %4920, %v2507_v34  }
 0xa07   :  { %3490 = vperm.xlu2 %4920, %v2510_v11  }
 0xa0f   :  { %2334 = vperm.xlu2 %4920, %v291_v32  }
 0xa4a   :  { %v2245_v13 = vpop.xlane.xlu0 %2244 }
 0xa4b   :  { %v2253_v50 = vmul.f32 %v2245_v13, %v6458_v54  ;;  %v2242_v48 = vpop.xlane.xlu1 %2241 }
 0xa4c   :  { %v2252_v37 = vmul.f32 %v2242_v48, %v6458_v54 }
 0xa4d   :  { %v2257_v59 = vadd.f32 1e-05, %v2253_v50  ;;  %v289_v50 = vld [vmem:[%s6763_s7 + $0x30] sm:$0xff] }
 0xa4e   :  { %v2256_v38 = vadd.f32 1e-05, %v2252_v37 }
 0xa4f   :  { %vm2276_vm8 = vweird.f32 %v2257_v59 }
 0xa50   :  { %5043 = vrsqrt.f32 %v2256_v38  ;;  %vm2266_vm4 = vweird.f32 %v2256_v38 }
 0xa51   :  { %5045 = vrsqrt.f32 %v2257_v59 }
 0xa53   :  { %v2251_v8 = vpop.xlane.xlu1 %2250 }
 0xa54   :  { %v2255_v43 = vmul.f32 %v2251_v8, %v6458_v54 }
 0xa56   :  { %v5044_v19 = vpop.eup %5043  ;;  %v6525_v33 = vadd.f32 1e-05, %v2255_v43 }
 0xa57   :  { %v2261_v4 = vmul.f32 %v5044_v19, %v2256_v38  ;;  %v6527_v7 = vpop.eup %5045  ;;  %vm2267_vm1 = vweird.f32 %v5044_v19 }
 0xa58   :  { %5047 = vrsqrt.f32 %v6525_v33  ;;  %v2271_v12 = vmul.f32 %v6527_v7, %v2257_v59  ;;  %vm2268_vm5 = vmor %vm2266_vm4, %vm2267_vm1  ;;  %vm2277_vm6 = vweird.f32 %v6527_v7  ;;  %v288_v59 = vld [vmem:[%s6763_s7 + $0x28] sm:$0xff]  ;;  %vm2296_vm13 = vweird.f32 %v6525_v33 }
 0xa59   :  { %v2262_v52 = vmul.f32 %v5044_v19, %v2261_v4  ;;  %vm2278_vm9 = vmor %vm2276_vm8, %vm2277_vm6 }
 0xa5a   :  { %v2248_v14 = vpop.xlane.xlu2 %2247  ;;  %v2272_v31 = vmul.f32 %v6527_v7, %v2271_v12  ;;  %v3521_v12 = vpop.f32.mrf.mxu0 }
 0xa5b   :  { %v2263_v61 = vmul.f32 0.5, %v2262_v52  ;;  %v2254_v21 = vmul.f32 %v2248_v14, %v6458_v54  ;;  %v290_v14 = vld [vmem:[%s6763_s7 + $0x38] sm:$0xff] }
 0xa5c   :  { %v2273_v39 = vmul.f32 0.5, %v2272_v31 }
 0xa5d   :  { %v2264_v6 = vsub.f32 1.5, %v2263_v61  ;;  %v2258_v23 = vadd.f32 1e-05, %v2254_v21 }
 0xa5e   :  { %v5048_v25 = vpop.eup %5047  ;;  %v2274_v49 = vsub.f32 1.5, %v2273_v39 }
 0xa5f   :  { %5049 = vrsqrt.f32 %v2258_v23  ;;  %v2265_v63 = vmul.f32 %v5044_v19, %v2264_v6  ;;  %v2291_v0 = vmul.f32 %v5048_v25, %v6525_v33  ;;  %vm2286_vm10 = vweird.f32 %v2258_v23 }
 0xa60   :  { %v2275_v32 = vmul.f32 %v6527_v7, %v2274_v49  ;;  %vm2297_vm12 = vweird.f32 %v5048_v25 }
 0xa61   :  { %v2269_v15 = vsel %vm2268_vm5, %v5044_v19, %v2265_v63  ;;  %v2292_v22 = vmul.f32 %v5048_v25, %v2291_v0  ;;  %vm2298_vm2 = vmor %vm2296_vm13, %vm2297_vm12  ;;  %v294_v63 = vld [vmem:[%s6763_s7 + $0x58] sm:$0xff] }
 0xa62   :  { %v3476_v5 = vpop.permute.xlu2 %3475  ;;  %v2300_v24 = vmul.f32 %v2269_v15, %v287_v9  ;;  %v2279_v8 = vsel %vm2278_vm9, %v6527_v7, %v2275_v32  ;;  %v293_v7 = vld [vmem:[%s6763_s7 + $0x50] sm:$0xff]  ;;  %vm2393_vm9 = vcmask 7168  }
 0xa63   :  { %v6540_v16 = vadd.f32 %v3519_v51, %v3476_v5  ;;  %v6542_v47 = vadd.f32 %v3538_v56, %v3476_v5  ;;  %v2293_v34 = vmul.f32 0.5, %v2292_v22  ;;  %v2301_v4 = vmul.f32 %v2279_v8, %v288_v59 }
 0xa64   :  { %2306 = vperm.xlu0 %4918, %v2300_v24  }
 0xa65   :  { %v5050_v30 = vpop.eup %5049  ;;  %v3548_v10 = vmul.f32 %v6540_v16, %v6402_v46  ;;  %v3549_v45 = vmul.f32 %v6542_v47, %v6407_v20  ;;  %v2294_v38 = vsub.f32 1.5, %v2293_v34 }
 0xa66   :  { %v2281_v40 = vmul.f32 %v5050_v30, %v2258_v23  ;;  %vm2287_vm7 = vweird.f32 %v5050_v30 }
 0xa67   :  { %v3556_v3 = vadd.f32 %v3549_v45, %v3548_v10  ;;  %vm2288_vm11 = vmor %vm2286_vm10, %vm2287_vm7  ;;  %v2295_v52 = vmul.f32 %v5048_v25, %v2294_v38 }
 0xa68   :  { %v2282_v42 = vmul.f32 %v5050_v30, %v2281_v40 }
 0xa69   :  { %3557 = vadd.xlane.f32.xlu2 %v3556_v3  ;;  %v2299_v61 = vsel %vm2298_vm2, %v5048_v25, %v2295_v52 }
 0xa6a   :  { %v2283_v35 = vmul.f32 0.5, %v2282_v42  ;;  %v3491_v2 = vpop.permute.xlu2 %3490  ;;  %v2303_v21 = vmul.f32 %v2299_v61, %v290_v14 }
 0xa6b   :  { %v6553_v41 = vadd.f32 %v3526_v26, %v3491_v2  ;;  %v6555_v57 = vadd.f32 %v3545_v55, %v3491_v2  ;;  %v3481_v6 = vpop.permute.xlu1 %3480 }
 0xa6c   :  { %v2284_v11 = vsub.f32 1.5, %v2283_v35  ;;  %3485 = vperm.xlu0 %4918, %v2509_v1   ;;  %v3522_v23 = vadd.f32 %v3521_v12, %v3481_v6  ;;  %v3541_v31 = vadd.f32 %v6523_v44, %v3481_v6 }
 0xa6d   :  { %v3554_v13 = vmul.f32 %v6553_v41, %v6402_v46  ;;  %v3555_v56 = vmul.f32 %v6555_v57, %v6407_v20 }
 0xa6e   :  { %v2285_v48 = vmul.f32 %v5050_v30, %v2284_v11  ;;  %v3550_v33 = vmul.f32 %v3522_v23, %v6402_v46  ;;  %v3551_v51 = vmul.f32 %v3541_v31, %v6407_v20 }
 0xa6f   :  { %v3565_v37 = vadd.f32 %v3555_v56, %v3554_v13 }
 0xa70   :  { %v2289_v43 = vsel %vm2288_vm11, %v5050_v30, %v2285_v48  ;;  %v3559_v9 = vadd.f32 %v3551_v51, %v3550_v33  ;;  %vm2398_vm11 = vcmask 15360  }
 0xa71   :  { %3566 = vadd.xlane.f32.xlu2 %v3565_v37  ;;  %v2302_v19 = vmul.f32 %v2289_v43, %v289_v50 }
 0xa72   :  { %v2335_v25 = vpop.permute.xlu2 %2334 }
 0xa73   :  { %2316 = vperm.xlu1 %4919, %v2302_v19  }
 0xa74   :  { %2311 = vperm.xlu0 %4918, %v2301_v4  }
 0xa7c   :  { %2321 = vperm.xlu0 %4918, %v2303_v21  }
 0xa89   :  { %2344 = vperm.xlu2 %4920, %v293_v7  }
 0xaa6   :  { %3560 = vadd.xlane.f32.xlu0 %v3559_v9 }
 0xaba   :  { %2349 = vperm.xlu0 %4918, %v294_v63  }
 0xad6   :  { %v2307_v5 = vpop.permute.xlu0 %2306 }
 0xad7   :  { %v2324_v15 = vmul.f32 %v2307_v5, %v6469_v53  ;;  %v2325_v24 = vmul.f32 %v2307_v5, %v6472_v60 }
 0xad9   :  { %v6584_v39 = vadd.f32 %v2335_v25, %v2324_v15  ;;  %v6586_v44 = vadd.f32 %v2335_v25, %v2325_v24 }
 0xadc   :  { %v3558_v0 = vpop.xlane.xlu2 %3557 }
 0xadd   :  { %v3568_v30 = vmul.f32 %v3558_v0, %v6458_v54 }
 0xade   :  { %v3486_v40 = vpop.permute.xlu0 %3485 }
 0xadf   :  { %v6590_v10 = vsub.f32 %v6540_v16, %v3568_v30  ;;  %v6593_v45 = vsub.f32 %v6542_v47, %v3568_v30  ;;  %v3525_v3 = vadd.f32 %v6532_v18, %v3486_v40  ;;  %v3544_v53 = vadd.f32 %v6534_v58, %v3486_v40 }
 0xae1   :  { %v3580_v60 = vmul.f32 %v6590_v10, %v6590_v10  ;;  %v3581_v49 = vmul.f32 %v6593_v45, %v6593_v45  ;;  %v3552_v22 = vmul.f32 %v3525_v3, %v6402_v46  ;;  %v3553_v42 = vmul.f32 %v3544_v53, %v6407_v20 }
 0xae3   :  { %v3588_v16 = vmul.f32 %v3580_v60, %v6402_v46  ;;  %v3589_v47 = vmul.f32 %v3581_v49, %v6407_v20  ;;  %v3562_v26 = vadd.f32 %v3553_v42, %v3552_v22 }
 0xae4   :  { %v3567_v55 = vpop.xlane.xlu2 %3566 }
 0xae5   :  { %v3571_v18 = vmul.f32 %v3567_v55, %v6458_v54  ;;  %v3596_v35 = vadd.f32 %v3589_v47, %v3588_v16  ;;  %3563 = vadd.xlane.f32.xlu1 %v3562_v26 }
 0xae7   :  { %v6607_v58 = vsub.f32 %v6553_v41, %v3571_v18  ;;  %v6610_v2 = vsub.f32 %v6555_v57, %v3571_v18  ;;  %3597 = vadd.xlane.f32.xlu0 %v3596_v35  ;;  %v292_v41 = vld [vmem:[%s6763_s7 + $0x48] sm:$0xff]  ;;  %v2312_v57 = vpop.permute.xlu0 %2311 }
 0xae8   :  { %v2326_v49 = vmul.f32 %v2312_v57, %v6463_v27  ;;  %v2327_v22 = vmul.f32 %v2312_v57, %v6466_v29 }
 0xae9   :  { %v3586_v1 = vmul.f32 %v6607_v58, %v6607_v58  ;;  %v3587_v34 = vmul.f32 %v6610_v2, %v6610_v2 }
 0xaeb   :  { %v3594_v11 = vmul.f32 %v3586_v1, %v6402_v46  ;;  %v3595_v32 = vmul.f32 %v3587_v34, %v6407_v20 }
 0xaec   :  { %v2345_v47 = vpop.permute.xlu2 %2344 }
 0xaed   :  { %v3605_v13 = vadd.f32 %v3595_v32, %v3594_v11 }
 0xaef   :  { %3606 = vadd.xlane.f32.xlu0 %v3605_v13  ;;  %v2322_v56 = vpop.permute.xlu0 %2321 }
 0xaf0   :  { %v2330_v52 = vmul.f32 %v2322_v56, %v6487_v28  ;;  %v2331_v14 = vmul.f32 %v2322_v56, %v6489_v62  ;;  %v2517_v28 = vld [vmem:[%s6768_s12 + $0x50] sm:$0xff]  ;;  %v2511_v56 = vld [vmem:[%s6768_s12 + $0x20] sm:$0xff] }
 0xafe   :  { %2339 = vperm.xlu1 %4919, %v292_v41  }
 0xb19   :  { %v3561_v50 = vpop.xlane.xlu0 %3560 }
 0xb1a   :  { %v3569_v48 = vmul.f32 %v3561_v50, %v6458_v54 }
 0xb1c   :  { %v6622_v37 = vsub.f32 %v3522_v23, %v3569_v48  ;;  %v6624_v38 = vsub.f32 %v3541_v31, %v3569_v48  ;;  %v2515_v23 = vld [vmem:[%s6768_s12 + $0x40] sm:$0xff]  ;;  %v6643_v31 = vpop.permute.xlu1 %2316 }
 0xb1d   :  { %v2328_v26 = vmul.f32 %v6643_v31, %v6498_v36 }
 0xb1e   :  { %v3582_v59 = vmul.f32 %v6622_v37, %v6622_v37  ;;  %v3583_v8 = vmul.f32 %v6624_v38, %v6624_v38 }
 0xb20   :  { %v3590_v43 = vmul.f32 %v3582_v59, %v6402_v46  ;;  %v3591_v19 = vmul.f32 %v3583_v8, %v6407_v20 }
 0xb22   :  { %v3599_v4 = vadd.f32 %v3591_v19, %v3590_v43  ;;  %v2516_v19 = vld [vmem:[%s6768_s12 + $0x48] sm:$0xff] }
 0xb24   :  { %3600 = vadd.xlane.f32.xlu2 %v3599_v4 }
 0xb2c   :  { %v2350_v61 = vpop.permute.xlu0 %2349 }
 0xb2d   :  { %v2358_v21 = vadd.f32 %v2350_v61, %v2330_v52  ;;  %v6634_v7 = vadd.f32 %v2350_v61, %v2331_v14  ;;  %v2518_v61 = vld [vmem:[%s6768_s12 + $0x58] sm:$0xff] }
 0xb2f   :  { %v2366_v12 = vmax.f32 %v2358_v21, 0.0 }
 0xb31   :  { %v2378_v6 = vsel %vm2368_vm3, %v2366_v12, -inf }
 0xb32   :  { %2379 = vmax.xlane.f32.xlu2 %v2378_v6 }
 0xb4a   :  { %3690 = vperm.xlu2 %4920, %v2515_v23   ;;  %v2514_v23 = vld [vmem:[%s6768_s12 + $0x38] sm:$0xff] }
 0xb52   :  { %3700 = vperm.xlu2 %4920, %v2517_v28  }
 0xb58   :  { %v3564_v62 = vpop.xlane.xlu1 %3563 }
 0xb59   :  { %v3570_v33 = vmul.f32 %v3564_v62, %v6458_v54 }
 0xb5a   :  { %v3598_v5 = vpop.xlane.xlu0 %3597 }
 0xb5b   :  { %v6646_v51 = vsub.f32 %v3525_v3, %v3570_v33  ;;  %v6648_v9 = vsub.f32 %v3544_v53, %v3570_v33  ;;  %v3608_v0 = vmul.f32 %v3598_v5, %v6458_v54  ;;  %v2360_v3 = vmax.f32 %v6584_v39, 0.0 }
 0xb5c   :  { %v2356_v39 = vadd.f32 %v2345_v47, %v2328_v26 }
 0xb5d   :  { %v3584_v63 = vmul.f32 %v6646_v51, %v6646_v51  ;;  %v3585_v25 = vmul.f32 %v6648_v9, %v6648_v9  ;;  %v3612_v40 = vadd.f32 1e-05, %v3608_v0  ;;  %v2369_v53 = vsel %vm2368_vm3, %v2360_v3, -inf }
 0xb5e   :  { %v2364_v29 = vmax.f32 %v2356_v39, 0.0  ;;  %v2329_v3 = vmul.f32 %v6643_v31, %v6500_v17 }
 0xb5f   :  { %v3592_v15 = vmul.f32 %v3584_v63, %v6402_v46  ;;  %v3593_v24 = vmul.f32 %v3585_v25, %v6407_v20  ;;  %5051 = vrsqrt.f32 %v3612_v40  ;;  %vm3622_vm14 = vweird.f32 %v3612_v40 }
 0xb60   :  { %v2375_v57 = vsel %vm2368_vm3, %v2364_v29, -inf }
 0xb61   :  { %v3602_v30 = vadd.f32 %v3593_v24, %v3592_v15  ;;  %v2512_v24 = vld [vmem:[%s6768_s12 + $0x28] sm:$0xff] }
 0xb62   :  { %v3607_v1 = vpop.xlane.xlu0 %3606 }
 0xb63   :  { %3603 = vadd.xlane.f32.xlu1 %v3602_v30  ;;  %v3611_v27 = vmul.f32 %v3607_v1, %v6458_v54 }
 0xb65   :  { %v5052_v60 = vpop.eup %5051  ;;  %v3615_v13 = vadd.f32 1e-05, %v3611_v27 }
 0xb66   :  { %v3617_v46 = vmul.f32 %v5052_v60, %v3612_v40  ;;  %vm3623_vm0 = vweird.f32 %v5052_v60 }
 0xb67   :  { %5053 = vrsqrt.f32 %v3615_v13  ;;  %vm3624_vm15 = vmor %vm3622_vm14, %vm3623_vm0  ;;  %vm3652_vm4 = vweird.f32 %v3615_v13 }
 0xb68   :  { %v3618_v35 = vmul.f32 %v5052_v60, %v3617_v46 }
 0xb6a   :  { %v3619_v32 = vmul.f32 0.5, %v3618_v35 }
 0xb6b   :  { %2370 = vmax.xlane.f32.xlu1 %v2369_v53  ;;  %v2357_v53 = vadd.f32 %v2345_v47, %v2329_v3  ;;  %v2513_v47 = vld [vmem:[%s6768_s12 + $0x30] sm:$0xff] }
 0xb6c   :  { %v3620_v41 = vsub.f32 1.5, %v3619_v32 }
 0xb6d   :  { %v5054_v48 = vpop.eup %5053 }
 0xb6e   :  { %v3621_v36 = vmul.f32 %v5052_v60, %v3620_v41  ;;  %v3647_v8 = vmul.f32 %v5054_v48, %v3615_v13  ;;  %vm3653_vm1 = vweird.f32 %v5054_v48 }
 0xb6f   :  { %vm3654_vm5 = vmor %vm3652_vm4, %vm3653_vm1 }
 0xb70   :  { %v2340_v42 = vpop.permute.xlu1 %2339  ;;  %v3625_v50 = vsel %vm3624_vm15, %v5052_v60, %v3621_v36  ;;  %v3648_v43 = vmul.f32 %v5054_v48, %v3647_v8  ;;  %v2365_v60 = vmax.f32 %v2357_v53, 0.0 }
 0xb71   :  { %v2354_v16 = vadd.f32 %v2340_v42, %v2326_v49  ;;  %v2355_v20 = vadd.f32 %v2340_v42, %v2327_v22  ;;  %v3656_v59 = vmul.f32 %v3625_v50, %v2511_v56 }
 0xb72   :  { %v3649_v4 = vmul.f32 0.5, %v3648_v43  ;;  %v2387_v42 = vsel %vm2368_vm3, %v2365_v60, -inf }
 0xb73   :  { %v2362_v55 = vmax.f32 %v2354_v16, 0.0  ;;  %v2363_v18 = vmax.f32 %v2355_v20, 0.0 }
 0xb74   :  { %v3650_v52 = vsub.f32 1.5, %v3649_v4 }
 0xb75   :  { %v2372_v34 = vsel %vm2368_vm3, %v2362_v55, -inf  ;;  %v2384_v11 = vsel %vm2368_vm3, %v2363_v18, -inf }
 0xb76   :  { %2373 = vmax.xlane.f32.xlu1 %v2372_v34  ;;  %2385 = vmax.xlane.f32.xlu0 %v2384_v11  ;;  %v3651_v12 = vmul.f32 %v5054_v48, %v3650_v52 }
 0xb78   :  { %v3655_v28 = vsel %vm3654_vm5, %v5054_v48, %v3651_v12 }
 0xb79   :  { %v3659_v62 = vmul.f32 %v3655_v28, %v2514_v23 }
 0xb7e   :  { %2376 = vmax.xlane.f32.xlu1 %v2375_v57 }
 0xb8a   :  { %3662 = vperm.xlu0 %4918, %v3656_v59  }
 0xb92   :  { %3695 = vperm.xlu0 %4918, %v2516_v19  }
 0xb97   :  { %v3601_v14 = vpop.xlane.xlu2 %3600 }
 0xb98   :  { %v3609_v21 = vmul.f32 %v3601_v14, %v6458_v54 }
 0xb9a   :  { %v3613_v6 = vadd.f32 1e-05, %v3609_v21  ;;  %3705 = vperm.xlu0 %4918, %v2518_v61   ;;  %v2361_v61 = vmax.f32 %v6586_v44, 0.0 }
 0xb9c   :  { %5055 = vrsqrt.f32 %v3613_v6  ;;  %vm3632_vm7 = vweird.f32 %v3613_v6  ;;  %v2381_v28 = vsel %vm2368_vm3, %v2361_v61, -inf }
 0xba2   :  { %v5056_v33 = vpop.eup %5055  ;;  %3677 = vperm.xlu0 %4918, %v3659_v62  }
 0xba3   :  { %v3627_v63 = vmul.f32 %v5056_v33, %v3613_v6  ;;  %vm3633_vm6 = vweird.f32 %v5056_v33 }
 0xba4   :  { %vm3634_vm8 = vmor %vm3632_vm7, %vm3633_vm6 }
 0xba5   :  { %v3628_v25 = vmul.f32 %v5056_v33, %v3627_v63  ;;  %v6697_v11 = vpop.xlane.xlu2 %2379 }
 0xba7   :  { %v3629_v5 = vmul.f32 0.5, %v3628_v25  ;;  %v2367_v25 = vmax.f32 %v6634_v7, 0.0 }
 0xba9   :  { %v3630_v15 = vsub.f32 1.5, %v3629_v5  ;;  %v2390_v44 = vsel %vm2368_vm3, %v2367_v25, -inf }
 0xbab   :  { %v3631_v0 = vmul.f32 %v5056_v33, %v3630_v15 }
 0xbad   :  { %v3635_v30 = vsel %vm3634_vm8, %v5056_v33, %v3631_v0  ;;  %v3691_v27 = vpop.permute.xlu2 %3690 }
 0xbae   :  { %v3657_v40 = vmul.f32 %v3635_v30, %v2512_v24 }
 0xbb0   :  { %3667 = vperm.xlu2 %4920, %v3657_v40  }
 0xbb5   :  { %v3701_v50 = vpop.permute.xlu2 %3700 }
 0xbd6   :  { %v3604_v49 = vpop.xlane.xlu1 %3603 }
 0xbd7   :  { %v3610_v22 = vmul.f32 %v3604_v49, %v6458_v54 }
 0xbd9   :  { %v3614_v46 = vadd.f32 1e-05, %v3610_v22  ;;  %2388 = vmax.xlane.f32.xlu2 %v2387_v42 }
 0xbdb   :  { %5057 = vrsqrt.f32 %v3614_v46  ;;  %vm3642_vm12 = vweird.f32 %v3614_v46 }
 0xbde   :  { %v6687_v20 = vpop.xlane.xlu1 %2370 }
 0xbe1   :  { %v5058_v16 = vpop.eup %5057 }
 0xbe2   :  { %v3637_v26 = vmul.f32 %v5058_v16, %v3614_v46  ;;  %vm3643_vm10 = vweird.f32 %v5058_v16 }
 0xbe3   :  { %vm3644_vm13 = vmor %vm3642_vm12, %vm3643_vm10 }
 0xbe4   :  { %v3638_v55 = vmul.f32 %v5058_v16, %v3637_v26 }
 0xbe6   :  { %v3639_v18 = vmul.f32 0.5, %v3638_v55 }
 0xbe8   :  { %v3640_v39 = vsub.f32 1.5, %v3639_v18 }
 0xbe9   :  { %v2374_v17 = vpop.xlane.xlu1 %2373  ;;  %v2386_v31 = vpop.xlane.xlu0 %2385 }
 0xbea   :  { %v2395_v54 = vsel %vm2393_vm9, %v2374_v17, %v2386_v31  ;;  %v3641_v35 = vmul.f32 %v5058_v16, %v3640_v39 }
 0xbeb   :  { %2400 = vst.msk [vmem:[%s6769_s13 + $0x8] sm:$0xff] %vm2398_vm11, %v2395_v54 }
 0xbec   :  { %v3645_v1 = vsel %vm3644_vm13, %v5058_v16, %v3641_v35 }
 0xbed   :  { %v3658_v34 = vmul.f32 %v3645_v1, %v2513_v47 }
 0xbef   :  { %3672 = vperm.xlu1 %4919, %v3658_v34  }
 0xbfc   :  { %v3663_v29 = vpop.permute.xlu0 %3662 }
 0xbfd   :  { %v3680_v32 = vmul.f32 %v3663_v29, %v6590_v10  ;;  %v3681_v13 = vmul.f32 %v3663_v29, %v6593_v45 }
 0xbff   :  { %v3708_v41 = vadd.f32 %v3691_v27, %v3680_v32  ;;  %v3709_v57 = vadd.f32 %v3691_v27, %v3681_v13 }
 0xc01   :  { %v3717_v36 = vmax.f32 %v3709_v57, 0.0  ;;  %v3716_v56 = vmax.f32 %v3708_v41, 0.0 }
 0xc03   :  { %v3736_v48 = vsel %vm2368_vm3, %v3717_v36, -inf  ;;  %v3724_v59 = vsel %vm2368_vm3, %v3716_v56, -inf }
 0xc04   :  { %v3696_v8 = vpop.permute.xlu0 %3695  ;;  %3737 = vmax.xlane.f32.xlu2 %v3736_v48  ;;  %3725 = vmax.xlane.f32.xlu0 %v3724_v59 }
 0xc0a   :  { %v3668_v43 = vpop.permute.xlu2 %3667 }
 0xc0b   :  { %v3682_v19 = vmul.f32 %v3668_v43, %v6622_v37  ;;  %v3683_v7 = vmul.f32 %v3668_v43, %v6624_v38 }
 0xc0c   :  { %v3706_v4 = vpop.permute.xlu0 %3705 }
 0xc0d   :  { %v3710_v52 = vadd.f32 %v3696_v8, %v3682_v19  ;;  %v3711_v60 = vadd.f32 %v3696_v8, %v3683_v7 }
 0xc0f   :  { %v3718_v10 = vmax.f32 %v3710_v52, 0.0  ;;  %v3719_v42 = vmax.f32 %v3711_v60, 0.0 }
 0xc11   :  { %v3727_v45 = vsel %vm2368_vm3, %v3718_v10, -inf  ;;  %v3739_v46 = vsel %vm2368_vm3, %v3719_v42, -inf }
 0xc12   :  { %3728 = vmax.xlane.f32.xlu2 %v3727_v45 }
 0xc14   :  { %v3678_v14 = vpop.permute.xlu0 %3677 }
 0xc15   :  { %v3686_v21 = vmul.f32 %v3678_v14, %v6607_v58  ;;  %v3687_v12 = vmul.f32 %v3678_v14, %v6610_v2  ;;  %v2377_v58 = vpop.xlane.xlu1 %2376 }
 0xc17   :  { %v3714_v6 = vadd.f32 %v3706_v4, %v3686_v21  ;;  %v3715_v23 = vadd.f32 %v3706_v4, %v3687_v12 }
 0xc19   :  { %2382 = vmax.xlane.f32.xlu1 %v2381_v28  ;;  %v3722_v62 = vmax.f32 %v3714_v6, 0.0  ;;  %v3723_v37 = vmax.f32 %v3715_v23, 0.0 }
 0xc1b   :  { %v3733_v33 = vsel %vm2368_vm3, %v3722_v62, -inf  ;;  %v3745_v63 = vsel %vm2368_vm3, %v3723_v37, -inf }
 0xc1c   :  { %3734 = vmax.xlane.f32.xlu0 %v3733_v33  ;;  %3746 = vmax.xlane.f32.xlu2 %v3745_v63 }
 0xc21   :  { %2391 = vmax.xlane.f32.xlu1 %v2390_v44 }
 0xc4c   :  { %v2389_v2 = vpop.xlane.xlu2 %2388 }
 0xc4d   :  { %v2396_v5 = vsel %vm2393_vm9, %v2377_v58, %v2389_v2 }
 0xc4e   :  { %2401 = vst.msk [vmem:[%s6769_s13 + $0x10] sm:$0xff] %vm2398_vm11, %v2396_v5 }
 0xc61   :  { %v3673_v15 = vpop.permute.xlu1 %3672 }
 0xc62   :  { %v3684_v24 = vmul.f32 %v3673_v15, %v6646_v51  ;;  %v3685_v0 = vmul.f32 %v3673_v15, %v6648_v9 }
 0xc64   :  { %v3712_v30 = vadd.f32 %v3701_v50, %v3684_v24  ;;  %v3713_v40 = vadd.f32 %v3701_v50, %v3685_v0 }
 0xc66   :  { %v3721_v3 = vmax.f32 %v3713_v40, 0.0  ;;  %v3720_v53 = vmax.f32 %v3712_v30, 0.0 }
 0xc68   :  { %v3742_v49 = vsel %vm2368_vm3, %v3721_v3, -inf  ;;  %v3730_v22 = vsel %vm2368_vm3, %v3720_v53, -inf }
 0xc69   :  { %3743 = vmax.xlane.f32.xlu0 %v3742_v49  ;;  %3731 = vmax.xlane.f32.xlu1 %v3730_v22 }
 0xc71   :  { %3740 = vmax.xlane.f32.xlu1 %v3739_v46 }
 0xc77   :  { %v3726_v51 = vpop.xlane.xlu0 %3725  ;;  %v3738_v16 = vpop.xlane.xlu2 %3737 }
 0xc78   :  { %v3748_v9 = vsel %vm2393_vm9, %v3726_v51, %v3738_v16 }
 0xc79   :  { %3752 = vst.msk [vmem:[%s6770_s14] sm:$0xff] %vm2398_vm11, %v3748_v9 }
 0xc85   :  { %v3729_v38 = vpop.xlane.xlu2 %3728 }
 0xc8c   :  { %v2383_v26 = vpop.xlane.xlu1 %2382 }
 0xc8d   :  { %v2394_v55 = vsel %vm2393_vm9, %v6687_v20, %v2383_v26 }
 0xc8e   :  { %2399 = vst.msk [vmem:[%s6769_s13] sm:$0xff] %vm2398_vm11, %v2394_v55 }
 0xc8f   :  { %v3735_v18 = vpop.xlane.xlu0 %3734  ;;  %v3747_v39 = vpop.xlane.xlu2 %3746 }
 0xc90   :  { %v3751_v17 = vsel %vm2393_vm9, %v3735_v18, %v3747_v39 }
 0xc91   :  { %3755 = vst.msk [vmem:[%s6770_s14 + $0x18] sm:$0xff] %vm2398_vm11, %v3751_v17 }
 0xc94   :  { %v2392_v31 = vpop.xlane.xlu1 %2391 }
 0xc95   :  { %v2397_v54 = vsel %vm2393_vm9, %v6697_v11, %v2392_v31 }
 0xc96   :  { %2402 = vst.msk [vmem:[%s6769_s13 + $0x18] sm:$0xff] %vm2398_vm11, %v2397_v54 }
 0xcdc   :  { %v3744_v20 = vpop.xlane.xlu0 %3743  ;;  %v3732_v47 = vpop.xlane.xlu1 %3731 }
 0xcdd   :  { %v3750_v35 = vsel %vm2393_vm9, %v3732_v47, %v3744_v20 }
 0xcde   :  { %3754 = vst.msk [vmem:[%s6770_s14 + $0x10] sm:$0xff] %vm2398_vm11, %v3750_v35 }
 0xce4   :  { %v3741_v1 = vpop.xlane.xlu1 %3740 }
 0xce5   :  { %v3749_v34 = vsel %vm2393_vm9, %v3729_v38, %v3741_v1 }
 0xce6   :  { %3753 = vst.msk [vmem:[%s6770_s14 + $0x8] sm:$0xff] %vm2398_vm11, %v3749_v34 }
 0xce7   :  { %3764 = vsyncpa [#allocation3], 1 }
 0xce8   :  { %3765 = vsyncpa [#allocation5], 1 }

</bundles_post_ra>
